<compile_context>
chip_gen: v7x
topology: tpu7x:2x2x1
jax: 0.10.0
libtpu: 0.0.40
codegen_flags: <defaults>
</compile_context>

<pallas_src>
import math
import functools

import jax
import jax.numpy as jnp
from jax.experimental import pallas as pl
from jax.experimental.pallas import tpu as pltpu


# --------------------------------------------------------------------------
# One fused kernel for the whole decoder stack + final LN + LM head
# --------------------------------------------------------------------------

def _gpt_stack_kernel(x_ref,
                      wqkv_ref, bqkv_ref, wo_ref, bo_ref,
                      w1_ref, b1_ref, w2_ref, b2_ref,
                      ln1g_ref, ln1b_ref, ln3g_ref, ln3b_ref,
                      lnfg_ref, lnfb_ref, headw_ref,
                      o_ref,
                      *, B, S, D, H, L, eps, scale):
    Dh = D // H
    BS = B * S

    x = x_ref[...]                                   # (BS, D) f32 activation

    # Causal additive bias, hoisted out of the layer/head loops (review item).
    row = jax.lax.broadcasted_iota(jnp.int32, (S, S), 0)
    col = jax.lax.broadcasted_iota(jnp.int32, (S, S), 1)
    neg_bias = jnp.where(col <= row, 0.0, -1e30)     # (S, S) f32, finite mask

    def layer_norm(h, g, b):
        mean = jnp.mean(h, axis=-1, keepdims=True)
        c = h - mean
        var = jnp.mean(c * c, axis=-1, keepdims=True)
        return c * jax.lax.rsqrt(var + eps) * g + b

    for l in range(L):                               # static unrolled layer loop
        # ---- self-attention block: x = norm1(x + out_proj(MHA(x))) --------
        xb = x.astype(jnp.bfloat16)
        qkv = jnp.dot(xb, wqkv_ref[l],
                      preferred_element_type=jnp.float32) + bqkv_ref[l]  # (BS,3D)
        q = qkv[:, :D] * scale
        k = qkv[:, D:2 * D]
        v = qkv[:, 2 * D:]

        head_outs = []
        for h in range(H):                           # static head loop (tiny)
            sl = slice(h * Dh, (h + 1) * Dh)
            qh = q[:, sl].reshape(B, S, Dh).astype(jnp.bfloat16)
            kh = k[:, sl].reshape(B, S, Dh).astype(jnp.bfloat16)
            vh = v[:, sl].reshape(B, S, Dh).astype(jnp.bfloat16)

            # Scores batched over the batch axis: (B, S, S) f32.
            s = jnp.einsum('bqd,bkd->bqk', qh, kh,
                           preferred_element_type=jnp.float32)
            s = s + neg_bias[None]
            m = jnp.max(s, axis=-1, keepdims=True)
            p = jnp.exp(s - m)
            denom = jnp.sum(p, axis=-1, keepdims=True)

            oh = jnp.einsum('bqk,bkd->bqd', p.astype(jnp.bfloat16), vh,
                            preferred_element_type=jnp.float32)
            # Normalize AFTER the PV matmul (EUP reciprocal, review-approved).
            oh = oh * pl.reciprocal(denom, approx=True)
            head_outs.append(oh.reshape(BS, Dh))

        # Merge heads along lanes -> ONE combined output projection.
        attn = jnp.concatenate(head_outs, axis=-1)   # (BS, D) f32
        y = jnp.dot(attn.astype(jnp.bfloat16), wo_ref[l],
                    preferred_element_type=jnp.float32) + bo_ref[l]
        x = layer_norm(x + y, ln1g_ref[l], ln1b_ref[l])

        # Cross-attention + norm2 skipped: module passes memory=None.

        # ---- FFN block: x = norm3(x + lin2(relu(lin1(x)))) -----------------
        h1 = jnp.dot(x.astype(jnp.bfloat16), w1_ref[l],
                     preferred_element_type=jnp.float32) + b1_ref[l]
        h1 = jnp.maximum(h1, 0.0)
        y = jnp.dot(h1.astype(jnp.bfloat16), w2_ref[l],
                    preferred_element_type=jnp.float32) + b2_ref[l]
        x = layer_norm(x + y, ln3g_ref[l], ln3b_ref[l])

    # ---- final LayerNorm + bias-free LM head (lane-dense padded output) ----
    xn = layer_norm(x, lnfg_ref[...], lnfb_ref[...])
    o_ref[...] = jnp.dot(xn.astype(jnp.bfloat16), headw_ref[...],
                         preferred_element_type=jnp.float32)


def gpt_stack_pallas(x_flat, p, *, B, S, D, H, L, V, eps=1e-5):
    """x_flat: (B*S, D) f32 -> logits (B*S, V) f32 via ONE pallas_call."""
    scale = 1.0 / math.sqrt(D // H)
    Vp = p["head_w"].shape[1]                        # lane-dense padded vocab
    out = pl.pallas_call(
        functools.partial(_gpt_stack_kernel,
                          B=B, S=S, D=D, H=H, L=L, eps=eps, scale=scale),
        out_shape=jax.ShapeDtypeStruct((B * S, Vp), jnp.float32),
        compiler_params=pltpu.CompilerParams(vmem_limit_bytes=32 * 1024 * 1024),
    )(x_flat,
      p["wqkv"], p["bqkv"], p["wo"], p["bo"],
      p["w1"], p["b1"], p["w2"], p["b2"],
      p["ln1_g"], p["ln1_b"], p["ln3_g"], p["ln3_b"],
      p["lnf_g"], p["lnf_b"], p["head_w"])
    return out[:, :V]


# --------------------------------------------------------------------------
# Parameters / model glue
# --------------------------------------------------------------------------

def init_params(key, vocab_size, d_model, nhead, num_layers, d_ff, max_seq_len):
    D = d_model
    keys = jax.random.split(key, 2 + num_layers)

    def w(k, shape, dtype=jnp.bfloat16):
        # Matmul weights bf16 (MXU operands, half the VMEM footprint),
        # pre-transposed to (K, N) and stacked per layer at init time.
        return (jax.random.normal(k, shape, jnp.float32) * 0.02).astype(dtype)

    # Lane-dense LM head: pad vocab up to a multiple of 128 lanes.
    Vp = ((vocab_size + 127) // 128) * 128
    head_w = jnp.zeros((D, Vp), jnp.bfloat16)
    head_w = head_w.at[:, :vocab_size].set(w(keys[1], (D, vocab_size)))

    wqkv, bqkv, wo, bo, w1, b1, w2, b2 = ([] for _ in range(8))
    for l in range(num_layers):
        lk = jax.random.split(keys[2 + l], 8)
        wqkv.append(w(lk[0], (D, 3 * D)))
        bqkv.append(w(lk[1], (1, 3 * D), jnp.float32))
        wo.append(w(lk[2], (D, D)))
        bo.append(w(lk[3], (1, D), jnp.float32))
        w1.append(w(lk[4], (D, d_ff)))
        b1.append(w(lk[5], (1, d_ff), jnp.float32))
        w2.append(w(lk[6], (d_ff, D)))
        b2.append(w(lk[7], (1, D), jnp.float32))

    p = {
        "tok_emb": jax.random.normal(keys[0], (vocab_size, D), jnp.float32) * 0.02,
        "head_w": head_w,
        "lnf_g": jnp.ones((1, D), jnp.float32),
        "lnf_b": jnp.zeros((1, D), jnp.float32),
        "wqkv": jnp.stack(wqkv), "bqkv": jnp.stack(bqkv),
        "wo": jnp.stack(wo), "bo": jnp.stack(bo),
        "w1": jnp.stack(w1), "b1": jnp.stack(b1),
        "w2": jnp.stack(w2), "b2": jnp.stack(b2),
        "ln1_g": jnp.ones((num_layers, 1, D), jnp.float32),
        "ln1_b": jnp.zeros((num_layers, 1, D), jnp.float32),
        "ln3_g": jnp.ones((num_layers, 1, D), jnp.float32),
        "ln3_b": jnp.zeros((num_layers, 1, D), jnp.float32),
    }

    # PositionalEncoding buffer (interleaved sin/cos, matching the PyTorch module).
    position = jnp.arange(max_seq_len, dtype=jnp.float32)[:, None]
    div_term = jnp.exp(jnp.arange(0, d_model, 2, dtype=jnp.float32)
                       * (-math.log(10000.0) / d_model))
    pe = jnp.stack([jnp.sin(position * div_term), jnp.cos(position * div_term)],
                   axis=-1)
    p["pe"] = pe.reshape(max_seq_len, d_model)
    return p


def gpt_transformer_forward(params, input_ids, *, d_model, nhead, num_layers,
                            vocab_size):
    """input_ids: (B, S) int32 -> logits (B, S, vocab_size)."""
    B, S = input_ids.shape

    # TODO(synk): token-embedding gather + positional-encoding add stay in XLA;
    # a Pallas gather kernel buys nothing at these shapes.
    x = jnp.take(params["tok_emb"], input_ids, axis=0) * math.sqrt(d_model)
    x = (x + params["pe"][None, :S, :]).astype(jnp.float32)      # (B, S, D)

    logits = gpt_stack_pallas(x.reshape(B * S, d_model), params,
                              B=B, S=S, D=d_model, H=nhead, L=num_layers,
                              V=vocab_size)
    return logits.reshape(B, S, vocab_size)


if __name__ == "__main__":
    VOCAB = 64
    D_MODEL = 32
    NHEAD = 4
    NUM_LAYERS = 2
    D_FF = 2048          # nn.TransformerDecoderLayer default dim_feedforward
    MAX_SEQ = 64
    B, S = 2, 8

    key = jax.random.PRNGKey(0)
    pkey, ikey = jax.random.split(key)
    params = init_params(pkey, VOCAB, D_MODEL, NHEAD, NUM_LAYERS, D_FF, MAX_SEQ)
    input_ids = jax.random.randint(ikey, (B, S), 0, VOCAB, dtype=jnp.int32)

    fwd = jax.jit(functools.partial(gpt_transformer_forward,
                                    d_model=D_MODEL, nhead=NHEAD,
                                    num_layers=NUM_LAYERS, vocab_size=VOCAB))
    logits = fwd(params, input_ids)
    jax.block_until_ready(logits)

    assert logits.shape == (B, S, VOCAB), logits.shape
    assert bool(jnp.all(jnp.isfinite(logits)))
    print("KERNEL_OK")
</pallas_src>

<mosaic_0001>
module attributes {stable_mosaic.version = 11 : i64} {
  func.func @_gpt_stack_kernel(%arg0: memref<16x32xf32, #tpu.memory_space<vmem>>, %arg1: memref<2x32x96xbf16, #tpu.memory_space<vmem>>, %arg2: memref<2x1x96xf32, #tpu.memory_space<vmem>>, %arg3: memref<2x32x32xbf16, #tpu.memory_space<vmem>>, %arg4: memref<2x1x32xf32, #tpu.memory_space<vmem>>, %arg5: memref<2x32x2048xbf16, #tpu.memory_space<vmem>>, %arg6: memref<2x1x2048xf32, #tpu.memory_space<vmem>>, %arg7: memref<2x2048x32xbf16, #tpu.memory_space<vmem>>, %arg8: memref<2x1x32xf32, #tpu.memory_space<vmem>>, %arg9: memref<2x1x32xf32, #tpu.memory_space<vmem>>, %arg10: memref<2x1x32xf32, #tpu.memory_space<vmem>>, %arg11: memref<2x1x32xf32, #tpu.memory_space<vmem>>, %arg12: memref<2x1x32xf32, #tpu.memory_space<vmem>>, %arg13: memref<1x32xf32, #tpu.memory_space<vmem>>, %arg14: memref<1x32xf32, #tpu.memory_space<vmem>>, %arg15: memref<32x128xbf16, #tpu.memory_space<vmem>>, %arg16: memref<16x128xf32, #tpu.memory_space<vmem>>) attributes {dimension_semantics = [], scalar_prefetch = 0 : i64, scratch_operands = 0 : i64, tpu.core_type = #tpu.core_type<tc>} {
    %c0 = arith.constant 0 : index
    %c0_0 = arith.constant 0 : index
    %0 = vector.load %arg0[%c0, %c0_0] : memref<16x32xf32, #tpu.memory_space<vmem>>, vector<16x32xf32>
    %1 = tpu.iota {dimensions = array<i32: 0>} : vector<8x8xi32>
    %2 = tpu.iota {dimensions = array<i32: 1>} : vector<8x8xi32>
    %3 = arith.cmpi sle, %2, %1 : vector<8x8xi32>
    %cst = arith.constant 0.000000e+00 : f32
    %cst_1 = arith.constant -1.000000e+30 : f32
    %4 = vector.broadcast %cst : f32 to vector<8x8xf32>
    %5 = vector.broadcast %cst_1 : f32 to vector<8x8xf32>
    %6 = arith.select %3, %4, %5 : vector<8x8xi1>, vector<8x8xf32>
    %7 = arith.truncf %0 : vector<16x32xf32> to vector<16x32xbf16>
    %c0_2 = arith.constant 0 : index
    %c0_3 = arith.constant 0 : index
    %c0_4 = arith.constant 0 : index
    %8 = vector.load %arg1[%c0_2, %c0_3, %c0_4] : memref<2x32x96xbf16, #tpu.memory_space<vmem>>, vector<1x32x96xbf16>
    %9 = vector.shape_cast %8 : vector<1x32x96xbf16> to vector<32x96xbf16>
    %cst_5 = arith.constant dense<0.000000e+00> : vector<16x96xf32>
    %10 = tpu.matmul %7, %9, %cst_5 {dimension_numbers = #tpu.dot_dimension_numbers<[1], [0], [0], [1], [0, 0, 1, 1], [], []>} : vector<16x32xbf16>, vector<32x96xbf16>, vector<16x96xf32> -> vector<16x96xf32>
    %c0_6 = arith.constant 0 : index
    %c0_7 = arith.constant 0 : index
    %c0_8 = arith.constant 0 : index
    %11 = vector.load %arg2[%c0_6, %c0_7, %c0_8] : memref<2x1x96xf32, #tpu.memory_space<vmem>>, vector<1x1x96xf32>
    %12 = vector.shape_cast %11 : vector<1x1x96xf32> to vector<1x96xf32>
    %13 = vector.broadcast %12 : vector<1x96xf32> to vector<16x96xf32>
    %14 = arith.addf %10, %13 : vector<16x96xf32>
    %15 = vector.extract_strided_slice %14 {offsets = [0, 0], sizes = [16, 32], strides = [1, 1]} : vector<16x96xf32> to vector<16x32xf32>
    %cst_9 = arith.constant 0.353553385 : f32
    %16 = vector.broadcast %cst_9 : f32 to vector<16x32xf32>
    %17 = arith.mulf %15, %16 : vector<16x32xf32>
    %18 = vector.extract_strided_slice %14 {offsets = [0, 32], sizes = [16, 32], strides = [1, 1]} : vector<16x96xf32> to vector<16x32xf32>
    %19 = vector.extract_strided_slice %14 {offsets = [0, 64], sizes = [16, 32], strides = [1, 1]} : vector<16x96xf32> to vector<16x32xf32>
    %20 = vector.extract_strided_slice %17 {offsets = [0, 0], sizes = [16, 8], strides = [1, 1]} : vector<16x32xf32> to vector<16x8xf32>
    %21 = vector.shape_cast %20 : vector<16x8xf32> to vector<2x8x8xf32>
    %22 = arith.truncf %21 : vector<2x8x8xf32> to vector<2x8x8xbf16>
    %23 = vector.extract_strided_slice %18 {offsets = [0, 0], sizes = [16, 8], strides = [1, 1]} : vector<16x32xf32> to vector<16x8xf32>
    %24 = vector.shape_cast %23 : vector<16x8xf32> to vector<2x8x8xf32>
    %25 = arith.truncf %24 : vector<2x8x8xf32> to vector<2x8x8xbf16>
    %26 = vector.extract_strided_slice %19 {offsets = [0, 0], sizes = [16, 8], strides = [1, 1]} : vector<16x32xf32> to vector<16x8xf32>
    %27 = vector.shape_cast %26 : vector<16x8xf32> to vector<2x8x8xf32>
    %28 = arith.truncf %27 : vector<2x8x8xf32> to vector<2x8x8xbf16>
    "tpu.trace_start"() <{level = 10 : i32, message = "bqd,bkd->bqk"}> : () -> ()
    %cst_10 = arith.constant dense<0.000000e+00> : vector<2x8x8xf32>
    %29 = tpu.matmul %22, %25, %cst_10 {dimension_numbers = #tpu.dot_dimension_numbers<[2], [2], [1], [1], [0, 0, 0, 1, 1, 1], [0], [0]>} : vector<2x8x8xbf16>, vector<2x8x8xbf16>, vector<2x8x8xf32> -> vector<2x8x8xf32>
    "tpu.trace_stop"() : () -> ()
    %30 = vector.shape_cast %6 : vector<8x8xf32> to vector<1x8x8xf32>
    %31 = vector.broadcast %30 : vector<1x8x8xf32> to vector<2x8x8xf32>
    %32 = arith.addf %29, %31 : vector<2x8x8xf32>
    %cst_11 = arith.constant dense<0xFF800000> : vector<2x8xf32>
    %33 = vector.multi_reduction <maximumf>, %32, %cst_11 [2] : vector<2x8x8xf32> to vector<2x8xf32>
    %34 = vector.shape_cast %33 : vector<2x8xf32> to vector<2x8x1xf32>
    %35 = vector.broadcast %34 : vector<2x8x1xf32> to vector<2x8x8xf32>
    %36 = arith.subf %32, %35 : vector<2x8x8xf32>
    %37 = math.exp %36 : vector<2x8x8xf32>
    %cst_12 = arith.constant dense<0.000000e+00> : vector<2x8xf32>
    %38 = vector.multi_reduction <add>, %37, %cst_12 [2] : vector<2x8x8xf32> to vector<2x8xf32>
    %39 = vector.shape_cast %38 : vector<2x8xf32> to vector<2x8x1xf32>
    %40 = arith.truncf %37 : vector<2x8x8xf32> to vector<2x8x8xbf16>
    "tpu.trace_start"() <{level = 10 : i32, message = "bqk,bkd->bqd"}> : () -> ()
    %cst_13 = arith.constant dense<0.000000e+00> : vector<2x8x8xf32>
    %41 = tpu.matmul %40, %28, %cst_13 {dimension_numbers = #tpu.dot_dimension_numbers<[2], [1], [1], [2], [0, 0, 0, 1, 1, 2], [0], [0]>} : vector<2x8x8xbf16>, vector<2x8x8xbf16>, vector<2x8x8xf32> -> vector<2x8x8xf32>
    "tpu.trace_stop"() : () -> ()
    %42 = tpu.reciprocal %39 {approx = true} : vector<2x8x1xf32> -> vector<2x8x1xf32>
    %43 = vector.broadcast %42 : vector<2x8x1xf32> to vector<2x8x8xf32>
    %44 = arith.mulf %41, %43 : vector<2x8x8xf32>
    %45 = vector.shape_cast %44 : vector<2x8x8xf32> to vector<16x8xf32>
    %46 = vector.extract_strided_slice %17 {offsets = [0, 8], sizes = [16, 8], strides = [1, 1]} : vector<16x32xf32> to vector<16x8xf32>
    %47 = vector.shape_cast %46 : vector<16x8xf32> to vector<2x8x8xf32>
    %48 = arith.truncf %47 : vector<2x8x8xf32> to vector<2x8x8xbf16>
    %49 = vector.extract_strided_slice %18 {offsets = [0, 8], sizes = [16, 8], strides = [1, 1]} : vector<16x32xf32> to vector<16x8xf32>
    %50 = vector.shape_cast %49 : vector<16x8xf32> to vector<2x8x8xf32>
    %51 = arith.truncf %50 : vector<2x8x8xf32> to vector<2x8x8xbf16>
    %52 = vector.extract_strided_slice %19 {offsets = [0, 8], sizes = [16, 8], strides = [1, 1]} : vector<16x32xf32> to vector<16x8xf32>
    %53 = vector.shape_cast %52 : vector<16x8xf32> to vector<2x8x8xf32>
    %54 = arith.truncf %53 : vector<2x8x8xf32> to vector<2x8x8xbf16>
    "tpu.trace_start"() <{level = 10 : i32, message = "bqd,bkd->bqk"}> : () -> ()
    %cst_14 = arith.constant dense<0.000000e+00> : vector<2x8x8xf32>
    %55 = tpu.matmul %48, %51, %cst_14 {dimension_numbers = #tpu.dot_dimension_numbers<[2], [2], [1], [1], [0, 0, 0, 1, 1, 1], [0], [0]>} : vector<2x8x8xbf16>, vector<2x8x8xbf16>, vector<2x8x8xf32> -> vector<2x8x8xf32>
    "tpu.trace_stop"() : () -> ()
    %56 = vector.shape_cast %6 : vector<8x8xf32> to vector<1x8x8xf32>
    %57 = vector.broadcast %56 : vector<1x8x8xf32> to vector<2x8x8xf32>
    %58 = arith.addf %55, %57 : vector<2x8x8xf32>
    %cst_15 = arith.constant dense<0xFF800000> : vector<2x8xf32>
    %59 = vector.multi_reduction <maximumf>, %58, %cst_15 [2] : vector<2x8x8xf32> to vector<2x8xf32>
    %60 = vector.shape_cast %59 : vector<2x8xf32> to vector<2x8x1xf32>
    %61 = vector.broadcast %60 : vector<2x8x1xf32> to vector<2x8x8xf32>
    %62 = arith.subf %58, %61 : vector<2x8x8xf32>
    %63 = math.exp %62 : vector<2x8x8xf32>
    %cst_16 = arith.constant dense<0.000000e+00> : vector<2x8xf32>
    %64 = vector.multi_reduction <add>, %63, %cst_16 [2] : vector<2x8x8xf32> to vector<2x8xf32>
    %65 = vector.shape_cast %64 : vector<2x8xf32> to vector<2x8x1xf32>
    %66 = arith.truncf %63 : vector<2x8x8xf32> to vector<2x8x8xbf16>
    "tpu.trace_start"() <{level = 10 : i32, message = "bqk,bkd->bqd"}> : () -> ()
    %cst_17 = arith.constant dense<0.000000e+00> : vector<2x8x8xf32>
    %67 = tpu.matmul %66, %54, %cst_17 {dimension_numbers = #tpu.dot_dimension_numbers<[2], [1], [1], [2], [0, 0, 0, 1, 1, 2], [0], [0]>} : vector<2x8x8xbf16>, vector<2x8x8xbf16>, vector<2x8x8xf32> -> vector<2x8x8xf32>
    "tpu.trace_stop"() : () -> ()
    %68 = tpu.reciprocal %65 {approx = true} : vector<2x8x1xf32> -> vector<2x8x1xf32>
    %69 = vector.broadcast %68 : vector<2x8x1xf32> to vector<2x8x8xf32>
    %70 = arith.mulf %67, %69 : vector<2x8x8xf32>
    %71 = vector.shape_cast %70 : vector<2x8x8xf32> to vector<16x8xf32>
    %72 = vector.extract_strided_slice %17 {offsets = [0, 16], sizes = [16, 8], strides = [1, 1]} : vector<16x32xf32> to vector<16x8xf32>
    %73 = vector.shape_cast %72 : vector<16x8xf32> to vector<2x8x8xf32>
    %74 = arith.truncf %73 : vector<2x8x8xf32> to vector<2x8x8xbf16>
    %75 = vector.extract_strided_slice %18 {offsets = [0, 16], sizes = [16, 8], strides = [1, 1]} : vector<16x32xf32> to vector<16x8xf32>
    %76 = vector.shape_cast %75 : vector<16x8xf32> to vector<2x8x8xf32>
    %77 = arith.truncf %76 : vector<2x8x8xf32> to vector<2x8x8xbf16>
    %78 = vector.extract_strided_slice %19 {offsets = [0, 16], sizes = [16, 8], strides = [1, 1]} : vector<16x32xf32> to vector<16x8xf32>
    %79 = vector.shape_cast %78 : vector<16x8xf32> to vector<2x8x8xf32>
    %80 = arith.truncf %79 : vector<2x8x8xf32> to vector<2x8x8xbf16>
    "tpu.trace_start"() <{level = 10 : i32, message = "bqd,bkd->bqk"}> : () -> ()
    %cst_18 = arith.constant dense<0.000000e+00> : vector<2x8x8xf32>
    %81 = tpu.matmul %74, %77, %cst_18 {dimension_numbers = #tpu.dot_dimension_numbers<[2], [2], [1], [1], [0, 0, 0, 1, 1, 1], [0], [0]>} : vector<2x8x8xbf16>, vector<2x8x8xbf16>, vector<2x8x8xf32> -> vector<2x8x8xf32>
    "tpu.trace_stop"() : () -> ()
    %82 = vector.shape_cast %6 : vector<8x8xf32> to vector<1x8x8xf32>
    %83 = vector.broadcast %82 : vector<1x8x8xf32> to vector<2x8x8xf32>
    %84 = arith.addf %81, %83 : vector<2x8x8xf32>
    %cst_19 = arith.constant dense<0xFF800000> : vector<2x8xf32>
    %85 = vector.multi_reduction <maximumf>, %84, %cst_19 [2] : vector<2x8x8xf32> to vector<2x8xf32>
    %86 = vector.shape_cast %85 : vector<2x8xf32> to vector<2x8x1xf32>
    %87 = vector.broadcast %86 : vector<2x8x1xf32> to vector<2x8x8xf32>
    %88 = arith.subf %84, %87 : vector<2x8x8xf32>
    %89 = math.exp %88 : vector<2x8x8xf32>
    %cst_20 = arith.constant dense<0.000000e+00> : vector<2x8xf32>
    %90 = vector.multi_reduction <add>, %89, %cst_20 [2] : vector<2x8x8xf32> to vector<2x8xf32>
    %91 = vector.shape_cast %90 : vector<2x8xf32> to vector<2x8x1xf32>
    %92 = arith.truncf %89 : vector<2x8x8xf32> to vector<2x8x8xbf16>
    "tpu.trace_start"() <{level = 10 : i32, message = "bqk,bkd->bqd"}> : () -> ()
    %cst_21 = arith.constant dense<0.000000e+00> : vector<2x8x8xf32>
    %93 = tpu.matmul %92, %80, %cst_21 {dimension_numbers = #tpu.dot_dimension_numbers<[2], [1], [1], [2], [0, 0, 0, 1, 1, 2], [0], [0]>} : vector<2x8x8xbf16>, vector<2x8x8xbf16>, vector<2x8x8xf32> -> vector<2x8x8xf32>
    "tpu.trace_stop"() : () -> ()
    %94 = tpu.reciprocal %91 {approx = true} : vector<2x8x1xf32> -> vector<2x8x1xf32>
    %95 = vector.broadcast %94 : vector<2x8x1xf32> to vector<2x8x8xf32>
    %96 = arith.mulf %93, %95 : vector<2x8x8xf32>
    %97 = vector.shape_cast %96 : vector<2x8x8xf32> to vector<16x8xf32>
    %98 = vector.extract_strided_slice %17 {offsets = [0, 24], sizes = [16, 8], strides = [1, 1]} : vector<16x32xf32> to vector<16x8xf32>
    %99 = vector.shape_cast %98 : vector<16x8xf32> to vector<2x8x8xf32>
    %100 = arith.truncf %99 : vector<2x8x8xf32> to vector<2x8x8xbf16>
    %101 = vector.extract_strided_slice %18 {offsets = [0, 24], sizes = [16, 8], strides = [1, 1]} : vector<16x32xf32> to vector<16x8xf32>
    %102 = vector.shape_cast %101 : vector<16x8xf32> to vector<2x8x8xf32>
    %103 = arith.truncf %102 : vector<2x8x8xf32> to vector<2x8x8xbf16>
    %104 = vector.extract_strided_slice %19 {offsets = [0, 24], sizes = [16, 8], strides = [1, 1]} : vector<16x32xf32> to vector<16x8xf32>
    %105 = vector.shape_cast %104 : vector<16x8xf32> to vector<2x8x8xf32>
    %106 = arith.truncf %105 : vector<2x8x8xf32> to vector<2x8x8xbf16>
    "tpu.trace_start"() <{level = 10 : i32, message = "bqd,bkd->bqk"}> : () -> ()
    %cst_22 = arith.constant dense<0.000000e+00> : vector<2x8x8xf32>
    %107 = tpu.matmul %100, %103, %cst_22 {dimension_numbers = #tpu.dot_dimension_numbers<[2], [2], [1], [1], [0, 0, 0, 1, 1, 1], [0], [0]>} : vector<2x8x8xbf16>, vector<2x8x8xbf16>, vector<2x8x8xf32> -> vector<2x8x8xf32>
    "tpu.trace_stop"() : () -> ()
    %108 = vector.shape_cast %6 : vector<8x8xf32> to vector<1x8x8xf32>
    %109 = vector.broadcast %108 : vector<1x8x8xf32> to vector<2x8x8xf32>
    %110 = arith.addf %107, %109 : vector<2x8x8xf32>
    %cst_23 = arith.constant dense<0xFF800000> : vector<2x8xf32>
    %111 = vector.multi_reduction <maximumf>, %110, %cst_23 [2] : vector<2x8x8xf32> to vector<2x8xf32>
    %112 = vector.shape_cast %111 : vector<2x8xf32> to vector<2x8x1xf32>
    %113 = vector.broadcast %112 : vector<2x8x1xf32> to vector<2x8x8xf32>
    %114 = arith.subf %110, %113 : vector<2x8x8xf32>
    %115 = math.exp %114 : vector<2x8x8xf32>
    %cst_24 = arith.constant dense<0.000000e+00> : vector<2x8xf32>
    %116 = vector.multi_reduction <add>, %115, %cst_24 [2] : vector<2x8x8xf32> to vector<2x8xf32>
    %117 = vector.shape_cast %116 : vector<2x8xf32> to vector<2x8x1xf32>
    %118 = arith.truncf %115 : vector<2x8x8xf32> to vector<2x8x8xbf16>
    "tpu.trace_start"() <{level = 10 : i32, message = "bqk,bkd->bqd"}> : () -> ()
    %cst_25 = arith.constant dense<0.000000e+00> : vector<2x8x8xf32>
    %119 = tpu.matmul %118, %106, %cst_25 {dimension_numbers = #tpu.dot_dimension_numbers<[2], [1], [1], [2], [0, 0, 0, 1, 1, 2], [0], [0]>} : vector<2x8x8xbf16>, vector<2x8x8xbf16>, vector<2x8x8xf32> -> vector<2x8x8xf32>
    "tpu.trace_stop"() : () -> ()
    %120 = tpu.reciprocal %117 {approx = true} : vector<2x8x1xf32> -> vector<2x8x1xf32>
    %121 = vector.broadcast %120 : vector<2x8x1xf32> to vector<2x8x8xf32>
    %122 = arith.mulf %119, %121 : vector<2x8x8xf32>
    %123 = vector.shape_cast %122 : vector<2x8x8xf32> to vector<16x8xf32>
    %124 = tpu.concatenate %45, %71, %97, %123 in 1 : vector<16x8xf32>, vector<16x8xf32>, vector<16x8xf32>, vector<16x8xf32> -> vector<16x32xf32>
    %125 = arith.truncf %124 : vector<16x32xf32> to vector<16x32xbf16>
    %c0_26 = arith.constant 0 : index
    %c0_27 = arith.constant 0 : index
    %c0_28 = arith.constant 0 : index
    %126 = vector.load %arg3[%c0_26, %c0_27, %c0_28] : memref<2x32x32xbf16, #tpu.memory_space<vmem>>, vector<1x32x32xbf16>
    %127 = vector.shape_cast %126 : vector<1x32x32xbf16> to vector<32x32xbf16>
    %cst_29 = arith.constant dense<0.000000e+00> : vector<16x32xf32>
    %128 = tpu.matmul %125, %127, %cst_29 {dimension_numbers = #tpu.dot_dimension_numbers<[1], [0], [0], [1], [0, 0, 1, 1], [], []>} : vector<16x32xbf16>, vector<32x32xbf16>, vector<16x32xf32> -> vector<16x32xf32>
    %c0_30 = arith.constant 0 : index
    %c0_31 = arith.constant 0 : index
    %c0_32 = arith.constant 0 : index
    %129 = vector.load %arg4[%c0_30, %c0_31, %c0_32] : memref<2x1x32xf32, #tpu.memory_space<vmem>>, vector<1x1x32xf32>
    %130 = vector.shape_cast %129 : vector<1x1x32xf32> to vector<1x32xf32>
    %131 = vector.broadcast %130 : vector<1x32xf32> to vector<16x32xf32>
    %132 = arith.addf %128, %131 : vector<16x32xf32>
    %133 = arith.addf %0, %132 : vector<16x32xf32>
    %c0_33 = arith.constant 0 : index
    %c0_34 = arith.constant 0 : index
    %c0_35 = arith.constant 0 : index
    %134 = vector.load %arg9[%c0_33, %c0_34, %c0_35] : memref<2x1x32xf32, #tpu.memory_space<vmem>>, vector<1x1x32xf32>
    %135 = vector.shape_cast %134 : vector<1x1x32xf32> to vector<1x32xf32>
    %c0_36 = arith.constant 0 : index
    %c0_37 = arith.constant 0 : index
    %c0_38 = arith.constant 0 : index
    %136 = vector.load %arg10[%c0_36, %c0_37, %c0_38] : memref<2x1x32xf32, #tpu.memory_space<vmem>>, vector<1x1x32xf32>
    %137 = vector.shape_cast %136 : vector<1x1x32xf32> to vector<1x32xf32>
    %cst_39 = arith.constant dense<0.000000e+00> : vector<16xf32>
    %138 = vector.multi_reduction <add>, %133, %cst_39 [1] : vector<16x32xf32> to vector<16xf32>
    %139 = vector.shape_cast %138 : vector<16xf32> to vector<16x1xf32>
    %cst_40 = arith.constant 3.200000e+01 : f32
    %140 = vector.broadcast %cst_40 : f32 to vector<16x1xf32>
    %141 = arith.divf %139, %140 : vector<16x1xf32>
    %142 = vector.broadcast %141 : vector<16x1xf32> to vector<16x32xf32>
    %143 = arith.subf %133, %142 : vector<16x32xf32>
    %144 = arith.mulf %143, %143 : vector<16x32xf32>
    %cst_41 = arith.constant dense<0.000000e+00> : vector<16xf32>
    %145 = vector.multi_reduction <add>, %144, %cst_41 [1] : vector<16x32xf32> to vector<16xf32>
    %146 = vector.shape_cast %145 : vector<16xf32> to vector<16x1xf32>
    %cst_42 = arith.constant 3.200000e+01 : f32
    %147 = vector.broadcast %cst_42 : f32 to vector<16x1xf32>
    %148 = arith.divf %146, %147 : vector<16x1xf32>
    %cst_43 = arith.constant 9.99999974E-6 : f32
    %149 = vector.broadcast %cst_43 : f32 to vector<16x1xf32>
    %150 = arith.addf %148, %149 : vector<16x1xf32>
    %151 = math.rsqrt %150 : vector<16x1xf32>
    %152 = vector.broadcast %151 : vector<16x1xf32> to vector<16x32xf32>
    %153 = arith.mulf %143, %152 : vector<16x32xf32>
    %154 = vector.broadcast %135 : vector<1x32xf32> to vector<16x32xf32>
    %155 = arith.mulf %153, %154 : vector<16x32xf32>
    %156 = vector.broadcast %137 : vector<1x32xf32> to vector<16x32xf32>
    %157 = arith.addf %155, %156 : vector<16x32xf32>
    %158 = arith.truncf %157 : vector<16x32xf32> to vector<16x32xbf16>
    %c0_44 = arith.constant 0 : index
    %c0_45 = arith.constant 0 : index
    %c0_46 = arith.constant 0 : index
    %159 = vector.load %arg5[%c0_44, %c0_45, %c0_46] : memref<2x32x2048xbf16, #tpu.memory_space<vmem>>, vector<1x32x2048xbf16>
    %160 = vector.shape_cast %159 : vector<1x32x2048xbf16> to vector<32x2048xbf16>
    %cst_47 = arith.constant dense<0.000000e+00> : vector<16x2048xf32>
    %161 = tpu.matmul %158, %160, %cst_47 {dimension_numbers = #tpu.dot_dimension_numbers<[1], [0], [0], [1], [0, 0, 1, 1], [], []>} : vector<16x32xbf16>, vector<32x2048xbf16>, vector<16x2048xf32> -> vector<16x2048xf32>
    %c0_48 = arith.constant 0 : index
    %c0_49 = arith.constant 0 : index
    %c0_50 = arith.constant 0 : index
    %162 = vector.load %arg6[%c0_48, %c0_49, %c0_50] : memref<2x1x2048xf32, #tpu.memory_space<vmem>>, vector<1x1x2048xf32>
    %163 = vector.shape_cast %162 : vector<1x1x2048xf32> to vector<1x2048xf32>
    %164 = vector.broadcast %163 : vector<1x2048xf32> to vector<16x2048xf32>
    %165 = arith.addf %161, %164 : vector<16x2048xf32>
    %cst_51 = arith.constant 0.000000e+00 : f32
    %166 = vector.broadcast %cst_51 : f32 to vector<16x2048xf32>
    %167 = arith.maximumf %165, %166 : vector<16x2048xf32>
    %168 = arith.truncf %167 : vector<16x2048xf32> to vector<16x2048xbf16>
    %c0_52 = arith.constant 0 : index
    %c0_53 = arith.constant 0 : index
    %c0_54 = arith.constant 0 : index
    %169 = vector.load %arg7[%c0_52, %c0_53, %c0_54] : memref<2x2048x32xbf16, #tpu.memory_space<vmem>>, vector<1x2048x32xbf16>
    %170 = vector.shape_cast %169 : vector<1x2048x32xbf16> to vector<2048x32xbf16>
    %cst_55 = arith.constant dense<0.000000e+00> : vector<16x32xf32>
    %171 = tpu.matmul %168, %170, %cst_55 {dimension_numbers = #tpu.dot_dimension_numbers<[1], [0], [0], [1], [0, 0, 1, 1], [], []>} : vector<16x2048xbf16>, vector<2048x32xbf16>, vector<16x32xf32> -> vector<16x32xf32>
    %c0_56 = arith.constant 0 : index
    %c0_57 = arith.constant 0 : index
    %c0_58 = arith.constant 0 : index
    %172 = vector.load %arg8[%c0_56, %c0_57, %c0_58] : memref<2x1x32xf32, #tpu.memory_space<vmem>>, vector<1x1x32xf32>
    %173 = vector.shape_cast %172 : vector<1x1x32xf32> to vector<1x32xf32>
    %174 = vector.broadcast %173 : vector<1x32xf32> to vector<16x32xf32>
    %175 = arith.addf %171, %174 : vector<16x32xf32>
    %176 = arith.addf %157, %175 : vector<16x32xf32>
    %c0_59 = arith.constant 0 : index
    %c0_60 = arith.constant 0 : index
    %c0_61 = arith.constant 0 : index
    %177 = vector.load %arg11[%c0_59, %c0_60, %c0_61] : memref<2x1x32xf32, #tpu.memory_space<vmem>>, vector<1x1x32xf32>
    %178 = vector.shape_cast %177 : vector<1x1x32xf32> to vector<1x32xf32>
    %c0_62 = arith.constant 0 : index
    %c0_63 = arith.constant 0 : index
    %c0_64 = arith.constant 0 : index
    %179 = vector.load %arg12[%c0_62, %c0_63, %c0_64] : memref<2x1x32xf32, #tpu.memory_space<vmem>>, vector<1x1x32xf32>
    %180 = vector.shape_cast %179 : vector<1x1x32xf32> to vector<1x32xf32>
    %cst_65 = arith.constant dense<0.000000e+00> : vector<16xf32>
    %181 = vector.multi_reduction <add>, %176, %cst_65 [1] : vector<16x32xf32> to vector<16xf32>
    %182 = vector.shape_cast %181 : vector<16xf32> to vector<16x1xf32>
    %cst_66 = arith.constant 3.200000e+01 : f32
    %183 = vector.broadcast %cst_66 : f32 to vector<16x1xf32>
    %184 = arith.divf %182, %183 : vector<16x1xf32>
    %185 = vector.broadcast %184 : vector<16x1xf32> to vector<16x32xf32>
    %186 = arith.subf %176, %185 : vector<16x32xf32>
    %187 = arith.mulf %186, %186 : vector<16x32xf32>
    %cst_67 = arith.constant dense<0.000000e+00> : vector<16xf32>
    %188 = vector.multi_reduction <add>, %187, %cst_67 [1] : vector<16x32xf32> to vector<16xf32>
    %189 = vector.shape_cast %188 : vector<16xf32> to vector<16x1xf32>
    %cst_68 = arith.constant 3.200000e+01 : f32
    %190 = vector.broadcast %cst_68 : f32 to vector<16x1xf32>
    %191 = arith.divf %189, %190 : vector<16x1xf32>
    %cst_69 = arith.constant 9.99999974E-6 : f32
    %192 = vector.broadcast %cst_69 : f32 to vector<16x1xf32>
    %193 = arith.addf %191, %192 : vector<16x1xf32>
    %194 = math.rsqrt %193 : vector<16x1xf32>
    %195 = vector.broadcast %194 : vector<16x1xf32> to vector<16x32xf32>
    %196 = arith.mulf %186, %195 : vector<16x32xf32>
    %197 = vector.broadcast %178 : vector<1x32xf32> to vector<16x32xf32>
    %198 = arith.mulf %196, %197 : vector<16x32xf32>
    %199 = vector.broadcast %180 : vector<1x32xf32> to vector<16x32xf32>
    %200 = arith.addf %198, %199 : vector<16x32xf32>
    %201 = arith.truncf %200 : vector<16x32xf32> to vector<16x32xbf16>
    %c1 = arith.constant 1 : index
    %c0_70 = arith.constant 0 : index
    %c0_71 = arith.constant 0 : index
    %202 = vector.load %arg1[%c1, %c0_70, %c0_71] : memref<2x32x96xbf16, #tpu.memory_space<vmem>>, vector<1x32x96xbf16>
    %203 = vector.shape_cast %202 : vector<1x32x96xbf16> to vector<32x96xbf16>
    %cst_72 = arith.constant dense<0.000000e+00> : vector<16x96xf32>
    %204 = tpu.matmul %201, %203, %cst_72 {dimension_numbers = #tpu.dot_dimension_numbers<[1], [0], [0], [1], [0, 0, 1, 1], [], []>} : vector<16x32xbf16>, vector<32x96xbf16>, vector<16x96xf32> -> vector<16x96xf32>
    %c1_73 = arith.constant 1 : index
    %c0_74 = arith.constant 0 : index
    %c0_75 = arith.constant 0 : index
    %205 = vector.load %arg2[%c1_73, %c0_74, %c0_75] : memref<2x1x96xf32, #tpu.memory_space<vmem>>, vector<1x1x96xf32>
    %206 = vector.shape_cast %205 : vector<1x1x96xf32> to vector<1x96xf32>
    %207 = vector.broadcast %206 : vector<1x96xf32> to vector<16x96xf32>
    %208 = arith.addf %204, %207 : vector<16x96xf32>
    %209 = vector.extract_strided_slice %208 {offsets = [0, 0], sizes = [16, 32], strides = [1, 1]} : vector<16x96xf32> to vector<16x32xf32>
    %cst_76 = arith.constant 0.353553385 : f32
    %210 = vector.broadcast %cst_76 : f32 to vector<16x32xf32>
    %211 = arith.mulf %209, %210 : vector<16x32xf32>
    %212 = vector.extract_strided_slice %208 {offsets = [0, 32], sizes = [16, 32], strides = [1, 1]} : vector<16x96xf32> to vector<16x32xf32>
    %213 = vector.extract_strided_slice %208 {offsets = [0, 64], sizes = [16, 32], strides = [1, 1]} : vector<16x96xf32> to vector<16x32xf32>
    %214 = vector.extract_strided_slice %211 {offsets = [0, 0], sizes = [16, 8], strides = [1, 1]} : vector<16x32xf32> to vector<16x8xf32>
    %215 = vector.shape_cast %214 : vector<16x8xf32> to vector<2x8x8xf32>
    %216 = arith.truncf %215 : vector<2x8x8xf32> to vector<2x8x8xbf16>
    %217 = vector.extract_strided_slice %212 {offsets = [0, 0], sizes = [16, 8], strides = [1, 1]} : vector<16x32xf32> to vector<16x8xf32>
    %218 = vector.shape_cast %217 : vector<16x8xf32> to vector<2x8x8xf32>
    %219 = arith.truncf %218 : vector<2x8x8xf32> to vector<2x8x8xbf16>
    %220 = vector.extract_strided_slice %213 {offsets = [0, 0], sizes = [16, 8], strides = [1, 1]} : vector<16x32xf32> to vector<16x8xf32>
    %221 = vector.shape_cast %220 : vector<16x8xf32> to vector<2x8x8xf32>
    %222 = arith.truncf %221 : vector<2x8x8xf32> to vector<2x8x8xbf16>
    "tpu.trace_start"() <{level = 10 : i32, message = "bqd,bkd->bqk"}> : () -> ()
    %cst_77 = arith.constant dense<0.000000e+00> : vector<2x8x8xf32>
    %223 = tpu.matmul %216, %219, %cst_77 {dimension_numbers = #tpu.dot_dimension_numbers<[2], [2], [1], [1], [0, 0, 0, 1, 1, 1], [0], [0]>} : vector<2x8x8xbf16>, vector<2x8x8xbf16>, vector<2x8x8xf32> -> vector<2x8x8xf32>
    "tpu.trace_stop"() : () -> ()
    %224 = vector.shape_cast %6 : vector<8x8xf32> to vector<1x8x8xf32>
    %225 = vector.broadcast %224 : vector<1x8x8xf32> to vector<2x8x8xf32>
    %226 = arith.addf %223, %225 : vector<2x8x8xf32>
    %cst_78 = arith.constant dense<0xFF800000> : vector<2x8xf32>
    %227 = vector.multi_reduction <maximumf>, %226, %cst_78 [2] : vector<2x8x8xf32> to vector<2x8xf32>
    %228 = vector.shape_cast %227 : vector<2x8xf32> to vector<2x8x1xf32>
    %229 = vector.broadcast %228 : vector<2x8x1xf32> to vector<2x8x8xf32>
    %230 = arith.subf %226, %229 : vector<2x8x8xf32>
    %231 = math.exp %230 : vector<2x8x8xf32>
    %cst_79 = arith.constant dense<0.000000e+00> : vector<2x8xf32>
    %232 = vector.multi_reduction <add>, %231, %cst_79 [2] : vector<2x8x8xf32> to vector<2x8xf32>
    %233 = vector.shape_cast %232 : vector<2x8xf32> to vector<2x8x1xf32>
    %234 = arith.truncf %231 : vector<2x8x8xf32> to vector<2x8x8xbf16>
    "tpu.trace_start"() <{level = 10 : i32, message = "bqk,bkd->bqd"}> : () -> ()
    %cst_80 = arith.constant dense<0.000000e+00> : vector<2x8x8xf32>
    %235 = tpu.matmul %234, %222, %cst_80 {dimension_numbers = #tpu.dot_dimension_numbers<[2], [1], [1], [2], [0, 0, 0, 1, 1, 2], [0], [0]>} : vector<2x8x8xbf16>, vector<2x8x8xbf16>, vector<2x8x8xf32> -> vector<2x8x8xf32>
    "tpu.trace_stop"() : () -> ()
    %236 = tpu.reciprocal %233 {approx = true} : vector<2x8x1xf32> -> vector<2x8x1xf32>
    %237 = vector.broadcast %236 : vector<2x8x1xf32> to vector<2x8x8xf32>
    %238 = arith.mulf %235, %237 : vector<2x8x8xf32>
    %239 = vector.shape_cast %238 : vector<2x8x8xf32> to vector<16x8xf32>
    %240 = vector.extract_strided_slice %211 {offsets = [0, 8], sizes = [16, 8], strides = [1, 1]} : vector<16x32xf32> to vector<16x8xf32>
    %241 = vector.shape_cast %240 : vector<16x8xf32> to vector<2x8x8xf32>
    %242 = arith.truncf %241 : vector<2x8x8xf32> to vector<2x8x8xbf16>
    %243 = vector.extract_strided_slice %212 {offsets = [0, 8], sizes = [16, 8], strides = [1, 1]} : vector<16x32xf32> to vector<16x8xf32>
    %244 = vector.shape_cast %243 : vector<16x8xf32> to vector<2x8x8xf32>
    %245 = arith.truncf %244 : vector<2x8x8xf32> to vector<2x8x8xbf16>
    %246 = vector.extract_strided_slice %213 {offsets = [0, 8], sizes = [16, 8], strides = [1, 1]} : vector<16x32xf32> to vector<16x8xf32>
    %247 = vector.shape_cast %246 : vector<16x8xf32> to vector<2x8x8xf32>
    %248 = arith.truncf %247 : vector<2x8x8xf32> to vector<2x8x8xbf16>
    "tpu.trace_start"() <{level = 10 : i32, message = "bqd,bkd->bqk"}> : () -> ()
    %cst_81 = arith.constant dense<0.000000e+00> : vector<2x8x8xf32>
    %249 = tpu.matmul %242, %245, %cst_81 {dimension_numbers = #tpu.dot_dimension_numbers<[2], [2], [1], [1], [0, 0, 0, 1, 1, 1], [0], [0]>} : vector<2x8x8xbf16>, vector<2x8x8xbf16>, vector<2x8x8xf32> -> vector<2x8x8xf32>
    "tpu.trace_stop"() : () -> ()
    %250 = vector.shape_cast %6 : vector<8x8xf32> to vector<1x8x8xf32>
    %251 = vector.broadcast %250 : vector<1x8x8xf32> to vector<2x8x8xf32>
    %252 = arith.addf %249, %251 : vector<2x8x8xf32>
    %cst_82 = arith.constant dense<0xFF800000> : vector<2x8xf32>
    %253 = vector.multi_reduction <maximumf>, %252, %cst_82 [2] : vector<2x8x8xf32> to vector<2x8xf32>
    %254 = vector.shape_cast %253 : vector<2x8xf32> to vector<2x8x1xf32>
    %255 = vector.broadcast %254 : vector<2x8x1xf32> to vector<2x8x8xf32>
    %256 = arith.subf %252, %255 : vector<2x8x8xf32>
    %257 = math.exp %256 : vector<2x8x8xf32>
    %cst_83 = arith.constant dense<0.000000e+00> : vector<2x8xf32>
    %258 = vector.multi_reduction <add>, %257, %cst_83 [2] : vector<2x8x8xf32> to vector<2x8xf32>
    %259 = vector.shape_cast %258 : vector<2x8xf32> to vector<2x8x1xf32>
    %260 = arith.truncf %257 : vector<2x8x8xf32> to vector<2x8x8xbf16>
    "tpu.trace_start"() <{level = 10 : i32, message = "bqk,bkd->bqd"}> : () -> ()
    %cst_84 = arith.constant dense<0.000000e+00> : vector<2x8x8xf32>
    %261 = tpu.matmul %260, %248, %cst_84 {dimension_numbers = #tpu.dot_dimension_numbers<[2], [1], [1], [2], [0, 0, 0, 1, 1, 2], [0], [0]>} : vector<2x8x8xbf16>, vector<2x8x8xbf16>, vector<2x8x8xf32> -> vector<2x8x8xf32>
    "tpu.trace_stop"() : () -> ()
    %262 = tpu.reciprocal %259 {approx = true} : vector<2x8x1xf32> -> vector<2x8x1xf32>
    %263 = vector.broadcast %262 : vector<2x8x1xf32> to vector<2x8x8xf32>
    %264 = arith.mulf %261, %263 : vector<2x8x8xf32>
    %265 = vector.shape_cast %264 : vector<2x8x8xf32> to vector<16x8xf32>
    %266 = vector.extract_strided_slice %211 {offsets = [0, 16], sizes = [16, 8], strides = [1, 1]} : vector<16x32xf32> to vector<16x8xf32>
    %267 = vector.shape_cast %266 : vector<16x8xf32> to vector<2x8x8xf32>
    %268 = arith.truncf %267 : vector<2x8x8xf32> to vector<2x8x8xbf16>
    %269 = vector.extract_strided_slice %212 {offsets = [0, 16], sizes = [16, 8], strides = [1, 1]} : vector<16x32xf32> to vector<16x8xf32>
    %270 = vector.shape_cast %269 : vector<16x8xf32> to vector<2x8x8xf32>
    %271 = arith.truncf %270 : vector<2x8x8xf32> to vector<2x8x8xbf16>
    %272 = vector.extract_strided_slice %213 {offsets = [0, 16], sizes = [16, 8], strides = [1, 1]} : vector<16x32xf32> to vector<16x8xf32>
    %273 = vector.shape_cast %272 : vector<16x8xf32> to vector<2x8x8xf32>
    %274 = arith.truncf %273 : vector<2x8x8xf32> to vector<2x8x8xbf16>
    "tpu.trace_start"() <{level = 10 : i32, message = "bqd,bkd->bqk"}> : () -> ()
    %cst_85 = arith.constant dense<0.000000e+00> : vector<2x8x8xf32>
    %275 = tpu.matmul %268, %271, %cst_85 {dimension_numbers = #tpu.dot_dimension_numbers<[2], [2], [1], [1], [0, 0, 0, 1, 1, 1], [0], [0]>} : vector<2x8x8xbf16>, vector<2x8x8xbf16>, vector<2x8x8xf32> -> vector<2x8x8xf32>
    "tpu.trace_stop"() : () -> ()
    %276 = vector.shape_cast %6 : vector<8x8xf32> to vector<1x8x8xf32>
    %277 = vector.broadcast %276 : vector<1x8x8xf32> to vector<2x8x8xf32>
    %278 = arith.addf %275, %277 : vector<2x8x8xf32>
    %cst_86 = arith.constant dense<0xFF800000> : vector<2x8xf32>
    %279 = vector.multi_reduction <maximumf>, %278, %cst_86 [2] : vector<2x8x8xf32> to vector<2x8xf32>
    %280 = vector.shape_cast %279 : vector<2x8xf32> to vector<2x8x1xf32>
    %281 = vector.broadcast %280 : vector<2x8x1xf32> to vector<2x8x8xf32>
    %282 = arith.subf %278, %281 : vector<2x8x8xf32>
    %283 = math.exp %282 : vector<2x8x8xf32>
    %cst_87 = arith.constant dense<0.000000e+00> : vector<2x8xf32>
    %284 = vector.multi_reduction <add>, %283, %cst_87 [2] : vector<2x8x8xf32> to vector<2x8xf32>
    %285 = vector.shape_cast %284 : vector<2x8xf32> to vector<2x8x1xf32>
    %286 = arith.truncf %283 : vector<2x8x8xf32> to vector<2x8x8xbf16>
    "tpu.trace_start"() <{level = 10 : i32, message = "bqk,bkd->bqd"}> : () -> ()
    %cst_88 = arith.constant dense<0.000000e+00> : vector<2x8x8xf32>
    %287 = tpu.matmul %286, %274, %cst_88 {dimension_numbers = #tpu.dot_dimension_numbers<[2], [1], [1], [2], [0, 0, 0, 1, 1, 2], [0], [0]>} : vector<2x8x8xbf16>, vector<2x8x8xbf16>, vector<2x8x8xf32> -> vector<2x8x8xf32>
    "tpu.trace_stop"() : () -> ()
    %288 = tpu.reciprocal %285 {approx = true} : vector<2x8x1xf32> -> vector<2x8x1xf32>
    %289 = vector.broadcast %288 : vector<2x8x1xf32> to vector<2x8x8xf32>
    %290 = arith.mulf %287, %289 : vector<2x8x8xf32>
    %291 = vector.shape_cast %290 : vector<2x8x8xf32> to vector<16x8xf32>
    %292 = vector.extract_strided_slice %211 {offsets = [0, 24], sizes = [16, 8], strides = [1, 1]} : vector<16x32xf32> to vector<16x8xf32>
    %293 = vector.shape_cast %292 : vector<16x8xf32> to vector<2x8x8xf32>
    %294 = arith.truncf %293 : vector<2x8x8xf32> to vector<2x8x8xbf16>
    %295 = vector.extract_strided_slice %212 {offsets = [0, 24], sizes = [16, 8], strides = [1, 1]} : vector<16x32xf32> to vector<16x8xf32>
    %296 = vector.shape_cast %295 : vector<16x8xf32> to vector<2x8x8xf32>
    %297 = arith.truncf %296 : vector<2x8x8xf32> to vector<2x8x8xbf16>
    %298 = vector.extract_strided_slice %213 {offsets = [0, 24], sizes = [16, 8], strides = [1, 1]} : vector<16x32xf32> to vector<16x8xf32>
    %299 = vector.shape_cast %298 : vector<16x8xf32> to vector<2x8x8xf32>
    %300 = arith.truncf %299 : vector<2x8x8xf32> to vector<2x8x8xbf16>
    "tpu.trace_start"() <{level = 10 : i32, message = "bqd,bkd->bqk"}> : () -> ()
    %cst_89 = arith.constant dense<0.000000e+00> : vector<2x8x8xf32>
    %301 = tpu.matmul %294, %297, %cst_89 {dimension_numbers = #tpu.dot_dimension_numbers<[2], [2], [1], [1], [0, 0, 0, 1, 1, 1], [0], [0]>} : vector<2x8x8xbf16>, vector<2x8x8xbf16>, vector<2x8x8xf32> -> vector<2x8x8xf32>
    "tpu.trace_stop"() : () -> ()
    %302 = vector.shape_cast %6 : vector<8x8xf32> to vector<1x8x8xf32>
    %303 = vector.broadcast %302 : vector<1x8x8xf32> to vector<2x8x8xf32>
    %304 = arith.addf %301, %303 : vector<2x8x8xf32>
    %cst_90 = arith.constant dense<0xFF800000> : vector<2x8xf32>
    %305 = vector.multi_reduction <maximumf>, %304, %cst_90 [2] : vector<2x8x8xf32> to vector<2x8xf32>
    %306 = vector.shape_cast %305 : vector<2x8xf32> to vector<2x8x1xf32>
    %307 = vector.broadcast %306 : vector<2x8x1xf32> to vector<2x8x8xf32>
    %308 = arith.subf %304, %307 : vector<2x8x8xf32>
    %309 = math.exp %308 : vector<2x8x8xf32>
    %cst_91 = arith.constant dense<0.000000e+00> : vector<2x8xf32>
    %310 = vector.multi_reduction <add>, %309, %cst_91 [2] : vector<2x8x8xf32> to vector<2x8xf32>
    %311 = vector.shape_cast %310 : vector<2x8xf32> to vector<2x8x1xf32>
    %312 = arith.truncf %309 : vector<2x8x8xf32> to vector<2x8x8xbf16>
    "tpu.trace_start"() <{level = 10 : i32, message = "bqk,bkd->bqd"}> : () -> ()
    %cst_92 = arith.constant dense<0.000000e+00> : vector<2x8x8xf32>
    %313 = tpu.matmul %312, %300, %cst_92 {dimension_numbers = #tpu.dot_dimension_numbers<[2], [1], [1], [2], [0, 0, 0, 1, 1, 2], [0], [0]>} : vector<2x8x8xbf16>, vector<2x8x8xbf16>, vector<2x8x8xf32> -> vector<2x8x8xf32>
    "tpu.trace_stop"() : () -> ()
    %314 = tpu.reciprocal %311 {approx = true} : vector<2x8x1xf32> -> vector<2x8x1xf32>
    %315 = vector.broadcast %314 : vector<2x8x1xf32> to vector<2x8x8xf32>
    %316 = arith.mulf %313, %315 : vector<2x8x8xf32>
    %317 = vector.shape_cast %316 : vector<2x8x8xf32> to vector<16x8xf32>
    %318 = tpu.concatenate %239, %265, %291, %317 in 1 : vector<16x8xf32>, vector<16x8xf32>, vector<16x8xf32>, vector<16x8xf32> -> vector<16x32xf32>
    %319 = arith.truncf %318 : vector<16x32xf32> to vector<16x32xbf16>
    %c1_93 = arith.constant 1 : index
    %c0_94 = arith.constant 0 : index
    %c0_95 = arith.constant 0 : index
    %320 = vector.load %arg3[%c1_93, %c0_94, %c0_95] : memref<2x32x32xbf16, #tpu.memory_space<vmem>>, vector<1x32x32xbf16>
    %321 = vector.shape_cast %320 : vector<1x32x32xbf16> to vector<32x32xbf16>
    %cst_96 = arith.constant dense<0.000000e+00> : vector<16x32xf32>
    %322 = tpu.matmul %319, %321, %cst_96 {dimension_numbers = #tpu.dot_dimension_numbers<[1], [0], [0], [1], [0, 0, 1, 1], [], []>} : vector<16x32xbf16>, vector<32x32xbf16>, vector<16x32xf32> -> vector<16x32xf32>
    %c1_97 = arith.constant 1 : index
    %c0_98 = arith.constant 0 : index
    %c0_99 = arith.constant 0 : index
    %323 = vector.load %arg4[%c1_97, %c0_98, %c0_99] : memref<2x1x32xf32, #tpu.memory_space<vmem>>, vector<1x1x32xf32>
    %324 = vector.shape_cast %323 : vector<1x1x32xf32> to vector<1x32xf32>
    %325 = vector.broadcast %324 : vector<1x32xf32> to vector<16x32xf32>
    %326 = arith.addf %322, %325 : vector<16x32xf32>
    %327 = arith.addf %200, %326 : vector<16x32xf32>
    %c1_100 = arith.constant 1 : index
    %c0_101 = arith.constant 0 : index
    %c0_102 = arith.constant 0 : index
    %328 = vector.load %arg9[%c1_100, %c0_101, %c0_102] : memref<2x1x32xf32, #tpu.memory_space<vmem>>, vector<1x1x32xf32>
    %329 = vector.shape_cast %328 : vector<1x1x32xf32> to vector<1x32xf32>
    %c1_103 = arith.constant 1 : index
    %c0_104 = arith.constant 0 : index
    %c0_105 = arith.constant 0 : index
    %330 = vector.load %arg10[%c1_103, %c0_104, %c0_105] : memref<2x1x32xf32, #tpu.memory_space<vmem>>, vector<1x1x32xf32>
    %331 = vector.shape_cast %330 : vector<1x1x32xf32> to vector<1x32xf32>
    %cst_106 = arith.constant dense<0.000000e+00> : vector<16xf32>
    %332 = vector.multi_reduction <add>, %327, %cst_106 [1] : vector<16x32xf32> to vector<16xf32>
    %333 = vector.shape_cast %332 : vector<16xf32> to vector<16x1xf32>
    %cst_107 = arith.constant 3.200000e+01 : f32
    %334 = vector.broadcast %cst_107 : f32 to vector<16x1xf32>
    %335 = arith.divf %333, %334 : vector<16x1xf32>
    %336 = vector.broadcast %335 : vector<16x1xf32> to vector<16x32xf32>
    %337 = arith.subf %327, %336 : vector<16x32xf32>
    %338 = arith.mulf %337, %337 : vector<16x32xf32>
    %cst_108 = arith.constant dense<0.000000e+00> : vector<16xf32>
    %339 = vector.multi_reduction <add>, %338, %cst_108 [1] : vector<16x32xf32> to vector<16xf32>
    %340 = vector.shape_cast %339 : vector<16xf32> to vector<16x1xf32>
    %cst_109 = arith.constant 3.200000e+01 : f32
    %341 = vector.broadcast %cst_109 : f32 to vector<16x1xf32>
    %342 = arith.divf %340, %341 : vector<16x1xf32>
    %cst_110 = arith.constant 9.99999974E-6 : f32
    %343 = vector.broadcast %cst_110 : f32 to vector<16x1xf32>
    %344 = arith.addf %342, %343 : vector<16x1xf32>
    %345 = math.rsqrt %344 : vector<16x1xf32>
    %346 = vector.broadcast %345 : vector<16x1xf32> to vector<16x32xf32>
    %347 = arith.mulf %337, %346 : vector<16x32xf32>
    %348 = vector.broadcast %329 : vector<1x32xf32> to vector<16x32xf32>
    %349 = arith.mulf %347, %348 : vector<16x32xf32>
    %350 = vector.broadcast %331 : vector<1x32xf32> to vector<16x32xf32>
    %351 = arith.addf %349, %350 : vector<16x32xf32>
    %352 = arith.truncf %351 : vector<16x32xf32> to vector<16x32xbf16>
    %c1_111 = arith.constant 1 : index
    %c0_112 = arith.constant 0 : index
    %c0_113 = arith.constant 0 : index
    %353 = vector.load %arg5[%c1_111, %c0_112, %c0_113] : memref<2x32x2048xbf16, #tpu.memory_space<vmem>>, vector<1x32x2048xbf16>
    %354 = vector.shape_cast %353 : vector<1x32x2048xbf16> to vector<32x2048xbf16>
    %cst_114 = arith.constant dense<0.000000e+00> : vector<16x2048xf32>
    %355 = tpu.matmul %352, %354, %cst_114 {dimension_numbers = #tpu.dot_dimension_numbers<[1], [0], [0], [1], [0, 0, 1, 1], [], []>} : vector<16x32xbf16>, vector<32x2048xbf16>, vector<16x2048xf32> -> vector<16x2048xf32>
    %c1_115 = arith.constant 1 : index
    %c0_116 = arith.constant 0 : index
    %c0_117 = arith.constant 0 : index
    %356 = vector.load %arg6[%c1_115, %c0_116, %c0_117] : memref<2x1x2048xf32, #tpu.memory_space<vmem>>, vector<1x1x2048xf32>
    %357 = vector.shape_cast %356 : vector<1x1x2048xf32> to vector<1x2048xf32>
    %358 = vector.broadcast %357 : vector<1x2048xf32> to vector<16x2048xf32>
    %359 = arith.addf %355, %358 : vector<16x2048xf32>
    %cst_118 = arith.constant 0.000000e+00 : f32
    %360 = vector.broadcast %cst_118 : f32 to vector<16x2048xf32>
    %361 = arith.maximumf %359, %360 : vector<16x2048xf32>
    %362 = arith.truncf %361 : vector<16x2048xf32> to vector<16x2048xbf16>
    %c1_119 = arith.constant 1 : index
    %c0_120 = arith.constant 0 : index
    %c0_121 = arith.constant 0 : index
    %363 = vector.load %arg7[%c1_119, %c0_120, %c0_121] : memref<2x2048x32xbf16, #tpu.memory_space<vmem>>, vector<1x2048x32xbf16>
    %364 = vector.shape_cast %363 : vector<1x2048x32xbf16> to vector<2048x32xbf16>
    %cst_122 = arith.constant dense<0.000000e+00> : vector<16x32xf32>
    %365 = tpu.matmul %362, %364, %cst_122 {dimension_numbers = #tpu.dot_dimension_numbers<[1], [0], [0], [1], [0, 0, 1, 1], [], []>} : vector<16x2048xbf16>, vector<2048x32xbf16>, vector<16x32xf32> -> vector<16x32xf32>
    %c1_123 = arith.constant 1 : index
    %c0_124 = arith.constant 0 : index
    %c0_125 = arith.constant 0 : index
    %366 = vector.load %arg8[%c1_123, %c0_124, %c0_125] : memref<2x1x32xf32, #tpu.memory_space<vmem>>, vector<1x1x32xf32>
    %367 = vector.shape_cast %366 : vector<1x1x32xf32> to vector<1x32xf32>
    %368 = vector.broadcast %367 : vector<1x32xf32> to vector<16x32xf32>
    %369 = arith.addf %365, %368 : vector<16x32xf32>
    %370 = arith.addf %351, %369 : vector<16x32xf32>
    %c1_126 = arith.constant 1 : index
    %c0_127 = arith.constant 0 : index
    %c0_128 = arith.constant 0 : index
    %371 = vector.load %arg11[%c1_126, %c0_127, %c0_128] : memref<2x1x32xf32, #tpu.memory_space<vmem>>, vector<1x1x32xf32>
    %372 = vector.shape_cast %371 : vector<1x1x32xf32> to vector<1x32xf32>
    %c1_129 = arith.constant 1 : index
    %c0_130 = arith.constant 0 : index
    %c0_131 = arith.constant 0 : index
    %373 = vector.load %arg12[%c1_129, %c0_130, %c0_131] : memref<2x1x32xf32, #tpu.memory_space<vmem>>, vector<1x1x32xf32>
    %374 = vector.shape_cast %373 : vector<1x1x32xf32> to vector<1x32xf32>
    %cst_132 = arith.constant dense<0.000000e+00> : vector<16xf32>
    %375 = vector.multi_reduction <add>, %370, %cst_132 [1] : vector<16x32xf32> to vector<16xf32>
    %376 = vector.shape_cast %375 : vector<16xf32> to vector<16x1xf32>
    %cst_133 = arith.constant 3.200000e+01 : f32
    %377 = vector.broadcast %cst_133 : f32 to vector<16x1xf32>
    %378 = arith.divf %376, %377 : vector<16x1xf32>
    %379 = vector.broadcast %378 : vector<16x1xf32> to vector<16x32xf32>
    %380 = arith.subf %370, %379 : vector<16x32xf32>
    %381 = arith.mulf %380, %380 : vector<16x32xf32>
    %cst_134 = arith.constant dense<0.000000e+00> : vector<16xf32>
    %382 = vector.multi_reduction <add>, %381, %cst_134 [1] : vector<16x32xf32> to vector<16xf32>
    %383 = vector.shape_cast %382 : vector<16xf32> to vector<16x1xf32>
    %cst_135 = arith.constant 3.200000e+01 : f32
    %384 = vector.broadcast %cst_135 : f32 to vector<16x1xf32>
    %385 = arith.divf %383, %384 : vector<16x1xf32>
    %cst_136 = arith.constant 9.99999974E-6 : f32
    %386 = vector.broadcast %cst_136 : f32 to vector<16x1xf32>
    %387 = arith.addf %385, %386 : vector<16x1xf32>
    %388 = math.rsqrt %387 : vector<16x1xf32>
    %389 = vector.broadcast %388 : vector<16x1xf32> to vector<16x32xf32>
    %390 = arith.mulf %380, %389 : vector<16x32xf32>
    %391 = vector.broadcast %372 : vector<1x32xf32> to vector<16x32xf32>
    %392 = arith.mulf %390, %391 : vector<16x32xf32>
    %393 = vector.broadcast %374 : vector<1x32xf32> to vector<16x32xf32>
    %394 = arith.addf %392, %393 : vector<16x32xf32>
    %c0_137 = arith.constant 0 : index
    %c0_138 = arith.constant 0 : index
    %395 = vector.load %arg13[%c0_137, %c0_138] : memref<1x32xf32, #tpu.memory_space<vmem>>, vector<1x32xf32>
    %c0_139 = arith.constant 0 : index
    %c0_140 = arith.constant 0 : index
    %396 = vector.load %arg14[%c0_139, %c0_140] : memref<1x32xf32, #tpu.memory_space<vmem>>, vector<1x32xf32>
    %cst_141 = arith.constant dense<0.000000e+00> : vector<16xf32>
    %397 = vector.multi_reduction <add>, %394, %cst_141 [1] : vector<16x32xf32> to vector<16xf32>
    %398 = vector.shape_cast %397 : vector<16xf32> to vector<16x1xf32>
    %cst_142 = arith.constant 3.200000e+01 : f32
    %399 = vector.broadcast %cst_142 : f32 to vector<16x1xf32>
    %400 = arith.divf %398, %399 : vector<16x1xf32>
    %401 = vector.broadcast %400 : vector<16x1xf32> to vector<16x32xf32>
    %402 = arith.subf %394, %401 : vector<16x32xf32>
    %403 = arith.mulf %402, %402 : vector<16x32xf32>
    %cst_143 = arith.constant dense<0.000000e+00> : vector<16xf32>
    %404 = vector.multi_reduction <add>, %403, %cst_143 [1] : vector<16x32xf32> to vector<16xf32>
    %405 = vector.shape_cast %404 : vector<16xf32> to vector<16x1xf32>
    %cst_144 = arith.constant 3.200000e+01 : f32
    %406 = vector.broadcast %cst_144 : f32 to vector<16x1xf32>
    %407 = arith.divf %405, %406 : vector<16x1xf32>
    %cst_145 = arith.constant 9.99999974E-6 : f32
    %408 = vector.broadcast %cst_145 : f32 to vector<16x1xf32>
    %409 = arith.addf %407, %408 : vector<16x1xf32>
    %410 = math.rsqrt %409 : vector<16x1xf32>
    %411 = vector.broadcast %410 : vector<16x1xf32> to vector<16x32xf32>
    %412 = arith.mulf %402, %411 : vector<16x32xf32>
    %413 = vector.broadcast %395 : vector<1x32xf32> to vector<16x32xf32>
    %414 = arith.mulf %412, %413 : vector<16x32xf32>
    %415 = vector.broadcast %396 : vector<1x32xf32> to vector<16x32xf32>
    %416 = arith.addf %414, %415 : vector<16x32xf32>
    %417 = arith.truncf %416 : vector<16x32xf32> to vector<16x32xbf16>
    %c0_146 = arith.constant 0 : index
    %c0_147 = arith.constant 0 : index
    %418 = vector.load %arg15[%c0_146, %c0_147] : memref<32x128xbf16, #tpu.memory_space<vmem>>, vector<32x128xbf16>
    %cst_148 = arith.constant dense<0.000000e+00> : vector<16x128xf32>
    %419 = tpu.matmul %417, %418, %cst_148 {dimension_numbers = #tpu.dot_dimension_numbers<[1], [0], [0], [1], [0, 0, 1, 1], [], []>} : vector<16x32xbf16>, vector<32x128xbf16>, vector<16x128xf32> -> vector<16x128xf32>
    %c0_149 = arith.constant 0 : index
    %c0_150 = arith.constant 0 : index
    %420 = vector.load %arg16[%c0_149, %c0_150] : memref<16x128xf32, #tpu.memory_space<vmem>>, vector<16x128xf32>
    tpu.vector_store %arg16[%c0_149, %c0_150], %419 {strides = array<i32>} : memref<16x128xf32, #tpu.memory_space<vmem>>, vector<16x128xf32>,
    return
  }
}

</mosaic_0001>

<bundles_post_ra>
// kernel: gpt_transformer_forward.1
= control target key start
LH: loop header
LB: loop body
LE: loop exit
PB: predicated region body
PF: predicated region fallthrough
CT: control target
= control target key end

     0   :  { %v8306_v0 = vmov 0.0   ;;  %vm8307_vm0 = vmmov 0   ;;  %vm86_vm1 = vcmask 261120   ;;  %s8309_s17 = smov 64   ;;  %s8310_s18 = smov 88   ;;  %vm140_vm2 = vcmask 64512   ;;  %s10151_s1 = inlined_call_operand.vmem [shape: bf16[2,32,96], index: 1, kind: input, shape index: {}]   ;;  %s10152_s0 = inlined_call_operand.vmem [shape: f32[16,32], index: 0, kind: input, shape index: {}]   ;;  %s10153_s2 = inlined_call_operand.vmem [shape: f32[2,1,96], index: 2, kind: input, shape index: {}]   ;;  %s10154_s3 = inlined_call_operand.vmem [shape: bf16[2,32,32], index: 3, kind: input, shape index: {}]   ;;  %s10155_s4 = inlined_call_operand.vmem [shape: f32[2,1,32], index: 4, kind: input, shape index: {}]   ;;  %s10156_s5 = inlined_call_operand.vmem [shape: bf16[2,32,2048], index: 5, kind: input, shape index: {}]   ;;  %s10157_s7 = inlined_call_operand.vmem [shape: bf16[2,2048,32], index: 7, kind: input, shape index: {}]   ;;  %s10158_s9 = inlined_call_operand.vmem [shape: f32[2,1,32], index: 9, kind: input, shape index: {}]   ;;  %s10159_s10 = inlined_call_operand.vmem [shape: f32[2,1,32], index: 10, kind: input, shape index: {}]   ;;  %s10160_s6 = inlined_call_operand.vmem [shape: f32[2,1,2048], index: 6, kind: input, shape index: {}]   ;;  %s10161_s8 = inlined_call_operand.vmem [shape: f32[2,1,32], index: 8, kind: input, shape index: {}]   ;;  %s10162_s11 = inlined_call_operand.vmem [shape: f32[2,1,32], index: 11, kind: input, shape index: {}]   ;;  %s10163_s12 = inlined_call_operand.vmem [shape: f32[2,1,32], index: 12, kind: input, shape index: {}]   ;;  %s10164_s15 = inlined_call_operand.vmem [shape: bf16[32,128], index: 15, kind: input, shape index: {}]   ;;  %s10165_s13 = inlined_call_operand.vmem [shape: f32[1,32], index: 13, kind: input, shape index: {}]   ;;  %s10166_s14 = inlined_call_operand.vmem [shape: f32[1,32], index: 14, kind: input, shape index: {}]   ;;  %s10167_s16 = inlined_call_operand.vmem [shape: f32[16,128], index: 16, kind: output, shape index: {}]  }
   0x1   :  { %10184 = sst [smem:[#allocation2_spill]] %s10151_s1  ;;  %7676 = vmatprep.subr.bf16.mxu0 %v8306_v0  ;;  %7680 = vmatprep.mubr.msk.bf16.mxu0 %vm8307_vm0, %v8306_v0  ;;  %v8424_v3 = vld [vmem:[%s10152_s0] sm:$0xff]  ;;  %v8429_v4 = vld [vmem:[%s10152_s0 + $0x8] sm:$0xff]  ;;  %s8308_s0 = smov 96   ;;  %vm261_vm3 = vcmask 1043456   ;;  %v56_v25 = vlaneseq  ;;  %vm1045_vm5 = vcmask 130048  }
   0x2   :  { %s10185_s23 = sld [smem:[#allocation2_spill]]  ;;  %7684 = vmatprep.subr.bf16.mxu1 %v8306_v0  ;;  %7686 = vmatprep.mubr.msk.bf16.mxu1 %vm8307_vm0, %v8306_v0  ;;  %v62_v5 = vpack.c.bf16 %v8429_v4, %v8424_v3  ;;  %v6541_v6 = vld [vmem:[%s10153_s2] ss:$0 sm:$0xff]  ;;  %s8311_s19 = smov 120   ;;  %v8313_v28 = vmov -1e+30  }
   0x3   :  { %s8312_s20 = smov 56   ;;  %v8479_v26 = vshrl.u32 %v56_v25, 7  ;;  %v59_v27 = vand.u32 127, %v56_v25  ;;  %s10182_s21 = smov 80   ;;  %vm1048_vm6 = vcmask 195584  }
   0x4   :  { %s10180_s22 = smov 112   ;;  %s10178_s24 = smov 48  }
   0x5   :  { %vm60_vm4 = vcmp.le.s32.totalorder %v59_v27, %v8479_v26  ;;  %s10176_s25 = smov 72   ;;  %s10171_s26 = smov 104  }
   0x6   :  { %v8482_v29 = vsel %vm60_vm4, 0.0, %v8313_v28  ;;  %s10169_s27 = smov 40   ;;  %s10175_s28 = smov 8  }
   0x7   :  { %s10174_s29 = smov 16   ;;  %s10173_s30 = smov 24  }
   0x8   :  { %v7956_v1 = vld [vmem:[%s10185_s23] sm:$0xff]   ;;  %v7957_v2 = vld [vmem:[%s10185_s23 + $0x8] sm:$0xff]  }
   0x9   :  { %7677 = vmatpush3.bf16.msra.mxu0 %v7956_v1 }
   0xa   :  { %7678 = vmatprep.subr.bf16.mxu0 %v8306_v0 }
   0xd   :  { %7679 = vmatpush3.bf16.msra.mxu0 %v7957_v2 }
   0xe   :  { %7690 = vmatprep.subr.bf16.mxu0 %v8306_v0 }
  0x10   :  { %7681 = vmatmul.mubr.msk.bf16.vlgmr.msra.gmra.mrb[0].mxu0 %vm86_vm1, %v62_v5 }
  0x11   :  { %7692 = vmatprep.mubr.msk.bf16.mxu0 %vm8307_vm0, %v8306_v0 }
  0xe3   :  { %v124_v7 = vpop.f32.mrb[0].mxu0 }
  0xe4   :  { %v125_v8 = vadd.f32 %v6541_v6, %v124_v7  ;;  %v7682_v9 = vpop.f32.mrb[1].mxu0 }
  0xe5   :  { %v127_v10 = vpop.f32.mrb[2].mxu0 }
  0xe6   :  { %v8441_v11 = vpack.c.bf16 %v125_v8, %v125_v8  ;;  %v128_v12 = vadd.f32 %v6541_v6, %v127_v10  ;;  %v7683_v13 = vpop.f32.mrb[3].mxu0  ;;  %v131_v15 = vmul.f32 0.35355338, %v125_v8 }
  0xe8   :  { %138 = vrot.lane.b32.xlu0 %v8441_v11, %s8308_s0  ;;  %v8445_v14 = vpack.c.bf16 %v128_v12, %v128_v12  ;;  %v8455_v16 = vpack.c.bf16 %v131_v15, %v131_v15  ;;  %v132_v17 = vmul.f32 0.35355338, %v128_v12 }
  0xea   :  { %v8459_v18 = vpack.c.bf16 %v132_v17, %v132_v17 }
  0xec   :  { %188 = vrot.lane.b32.xlu0 %v8445_v14, %s8308_s0 }
  0xf0   :  { %256 = vrot.lane.b32.xlu0 %v8441_v11, %s8309_s17 }
  0xf4   :  { %360 = vrot.lane.b32.xlu0 %v8441_v11, %s8310_s18 }
  0xf8   :  { %411 = vrot.lane.b32.xlu0 %v8445_v14, %s8310_s18 }
  0xfc   :  { %358 = vrot.lane.b32.xlu0 %v8455_v16, %s8311_s19 }
 0x100   :  { %409 = vrot.lane.b32.xlu0 %v8459_v18, %s8311_s19 }
 0x104   :  { %479 = vrot.lane.b32.xlu0 %v8441_v11, %s8312_s20 }
 0x15a   :  { %v139_v19 = vpop.permute.xlu0 %138 }
 0x15b   :  { %v145_v20 = vsel %vm140_vm2, %v139_v19, 0 }
 0x15c   :  { %7685 = vmatpush3.bf16.xpose.msra.mxu1 %v145_v20 }
 0x15d   :  { %7696 = vmatprep.subr.bf16.mxu1 %v8306_v0 }
 0x15e   :  { %v189_v21 = vpop.permute.xlu0 %188 }
 0x15f   :  { %v194_v22 = vsel %vm140_vm2, %v189_v21, 0 }
 0x160   :  { %7691 = vmatpush3.bf16.xpose.msra.mxu0 %v194_v22 }
 0x161   :  { %7702 = vmatprep.subr.bf16.mxu0 %v8306_v0 }
 0x162   :  { %v257_v23 = vpop.permute.xlu0 %256 }
 0x163   :  { %v263_v24 = vsel %vm261_vm3, %v257_v23, 0  ;;  %7687 = vmatmul.mubr.msk.bf16.vlgmr.msra.gmra.mrb[0].mxu1 %vm140_vm2, %v8455_v16 }
 0x164   :  { %7697 = vmatpush3.bf16.msra.mxu1 %v263_v24  ;;  %7698 = vmatprep.mubr.msk.bf16.mxu1 %vm8307_vm0, %v8306_v0 }
 0x165   :  { %7708 = vmatprep.subr.bf16.mxu1 %v8306_v0 }
 0x166   :  { %v361_v42 = vpop.permute.xlu0 %360 }
 0x167   :  { %7693 = vmatmul.mubr.msk.bf16.vlgmr.msra.gmra.mrb[4].mxu0 %vm140_vm2, %v8459_v18  ;;  %v366_v56 = vsel %vm140_vm2, %v361_v42, 0 }
 0x168   :  { %7704 = vmatprep.mubr.msk.bf16.mxu0 %vm8307_vm0, %v8306_v0 }
 0x16a   :  { %v412_v47 = vpop.permute.xlu0 %411 }
 0x16b   :  { %v417_v59 = vsel %vm140_vm2, %v412_v47, 0 }
 0x16e   :  { %v359_v52 = vpop.permute.xlu0 %358 }
 0x172   :  { %v410_v55 = vpop.permute.xlu0 %409 }
 0x176   :  { %v480_v60 = vpop.permute.xlu0 %479 }
 0x177   :  { %v485_v61 = vsel %vm261_vm3, %v480_v60, 0 }
 0x236   :  { %v181_v30 = vpop.f32.mrb[0].mxu1 }
 0x237   :  { %v182_v31 = vadd.f32 %v181_v30, %v8482_v29  ;;  %v7688_v32 = vpop.f32.mrb[1].mxu1 }
 0x238   :  { %v184_v33 = vpop.f32.mrb[2].mxu1 }
 0x239   :  { %v7689_v34 = vpop.f32.mrb[3].mxu1  ;;  %v236_v35 = vsel %vm140_vm2, %v182_v31, -inf }
 0x23a   :  { %237 = vmax.xlane.f32.xlu1 %v236_v35  ;;  %v230_v36 = vpop.f32.mrb[4].mxu0 }
 0x23b   :  { %v231_v37 = vadd.f32 %v230_v36, %v8482_v29  ;;  %v7694_v38 = vpop.f32.mrb[5].mxu0 }
 0x23c   :  { %v233_v39 = vpop.f32.mrb[6].mxu0 }
 0x23d   :  { %v7695_v40 = vpop.f32.mrb[7].mxu0  ;;  %v239_v41 = vsel %vm140_vm2, %v231_v37, -inf }
 0x23e   :  { %240 = vmax.xlane.f32.xlu1 %v239_v41 }
 0x24f   :  { %305 = vrot.lane.b32.xlu1 %v8445_v14, %s8309_s17 }
 0x253   :  { %527 = vrot.lane.b32.xlu1 %v8445_v14, %s8312_s20 }
 0x2c7   :  { %v238_v43 = vpop.xlane.xlu1 %237 }
 0x2c8   :  { %v242_v44 = vsub.f32 %v182_v31, %v238_v43 }
 0x2ca   :  { %v244_v45 = vmul.f32 1.442695, %v242_v44 }
 0x2cb   :  { %v241_v46 = vpop.xlane.xlu1 %240 }
 0x2cc   :  { %8222 = vpow2.f32 %v244_v45  ;;  %v243_v48 = vsub.f32 %v231_v37, %v241_v46 }
 0x2ce   :  { %v246_v49 = vmul.f32 1.442695, %v243_v48 }
 0x2cf   :  { %v306_v50 = vpop.permute.xlu1 %305 }
 0x2d0   :  { %8224 = vpow2.f32 %v246_v49  ;;  %v311_v51 = vsel %vm261_vm3, %v306_v50, 0 }
 0x2d1   :  { %7703 = vmatpush3.bf16.msra.mxu0 %v311_v51 }
 0x2d2   :  { %7714 = vmatprep.subr.bf16.mxu0 %v8306_v0 }
 0x2d3   :  { %v528_v62 = vpop.permute.xlu1 %527 }
 0x2d4   :  { %v533_v63 = vsel %vm261_vm3, %v528_v62, 0 }
 0x2d6   :  { %v8494_v53 = vpop.eup %8222 }
 0x2d7   :  { %v254_v54 = vpack.c.bf16 %v8494_v53, %v8494_v53 }
 0x2d9   :  { %7699 = vmatmul.mubr.msk.bf16.vlgmr.msra.gmra.mrb[4].mxu1 %vm140_vm2, %v254_v54 }
 0x2da   :  { %v8500_v57 = vpop.eup %8224  ;;  %7709 = vmatpush3.bf16.xpose.msra.mxu1 %v366_v56  ;;  %7710 = vmatprep.mubr.msk.bf16.mxu1 %vm8307_vm0, %v8306_v0 }
 0x2db   :  { %v255_v58 = vpack.c.bf16 %v8500_v57, %v8500_v57  ;;  %7720 = vmatprep.subr.bf16.mxu1 %v8306_v0 }
 0x2dd   :  { %7705 = vmatmul.mubr.msk.bf16.vlgmr.msra.gmra.mrb[8].mxu0 %vm140_vm2, %v255_v58 }
 0x2de   :  { %7715 = vmatpush3.bf16.xpose.msra.mxu0 %v417_v59  ;;  %7716 = vmatprep.mubr.msk.bf16.mxu0 %vm8307_vm0, %v8306_v0 }
 0x2df   :  { %7726 = vmatprep.subr.bf16.mxu0 %v8306_v0 }
 0x2e1   :  { %7711 = vmatmul.mubr.msk.bf16.vlgmr.msra.gmra.mrb[8].mxu1 %vm140_vm2, %v359_v52 }
 0x2e2   :  { %7721 = vmatpush3.bf16.msra.mxu1 %v485_v61  ;;  %7722 = vmatprep.mubr.msk.bf16.mxu1 %vm8307_vm0, %v8306_v0 }
 0x2e3   :  { %7732 = vmatprep.subr.bf16.mxu1 %v8306_v0 }
 0x2e5   :  { %7717 = vmatmul.mubr.msk.bf16.vlgmr.msra.gmra.mrb[12].mxu0 %vm140_vm2, %v410_v55 }
 0x2e6   :  { %7727 = vmatpush3.bf16.msra.mxu0 %v533_v63  ;;  %7728 = vmatprep.mubr.msk.bf16.mxu0 %vm8307_vm0, %v8306_v0 }
 0x2e7   :  { %7738 = vmatprep.subr.bf16.mxu0 %v8306_v0 }
 0x3ac   :  { %v8522_v1 = vpop.f32.mrb[4].mxu1 }
 0x3ad   :  { %v7700_v2 = vpop.f32.mrb[5].mxu1 }
 0x3ae   :  { %v302_v5 = vpop.f32.mrb[6].mxu1 }
 0x3af   :  { %v7701_v6 = vpop.f32.mrb[7].mxu1 }
 0x3b0   :  { %v8524_v7 = vpop.f32.mrb[8].mxu0 }
 0x3b1   :  { %v7706_v8 = vpop.f32.mrb[9].mxu0 }
 0x3b2   :  { %v350_v9 = vpop.f32.mrb[10].mxu0 }
 0x3b3   :  { %v7707_v10 = vpop.f32.mrb[11].mxu0 }
 0x3b4   :  { %v402_v12 = vpop.f32.mrb[8].mxu1 }
 0x3b5   :  { %v403_v13 = vadd.f32 %v402_v12, %v8482_v29  ;;  %v7712_v15 = vpop.f32.mrb[9].mxu1 }
 0x3b6   :  { %v405_v17 = vpop.f32.mrb[10].mxu1 }
 0x3b7   :  { %v7713_v19 = vpop.f32.mrb[11].mxu1  ;;  %v459_v20 = vsel %vm140_vm2, %v403_v13, -inf }
 0x3b8   :  { %460 = vmax.xlane.f32.xlu1 %v459_v20  ;;  %v453_v21 = vpop.f32.mrb[12].mxu0 }
 0x3b9   :  { %v454_v22 = vadd.f32 %v453_v21, %v8482_v29  ;;  %v7718_v23 = vpop.f32.mrb[13].mxu0 }
 0x3ba   :  { %v456_v24 = vpop.f32.mrb[14].mxu0 }
 0x3bb   :  { %v7719_v25 = vpop.f32.mrb[15].mxu0  ;;  %v462_v27 = vsel %vm140_vm2, %v454_v22, -inf }
 0x3bc   :  { %463 = vmax.xlane.f32.xlu0 %v462_v27 }
 0x3c9   :  { %581 = vrot.lane.b32.xlu1 %v8441_v11, %s10182_s21 }
 0x3cd   :  { %579 = vrot.lane.b32.xlu1 %v8455_v16, %s10180_s22 }
 0x3d1   :  { %747 = vrot.lane.b32.xlu1 %v8445_v14, %s10178_s24 }
 0x3d2   :  { %631 = vrot.lane.b32.xlu0 %v8445_v14, %s10182_s21 }
 0x3d6   :  { %629 = vrot.lane.b32.xlu0 %v8459_v18, %s10180_s22 }
 0x3da   :  { %699 = vrot.lane.b32.xlu0 %v8441_v11, %s10178_s24  ;;  %s10193_s24 = smov 16  }
 0x445   :  { %v461_v28 = vpop.xlane.xlu1 %460 }
 0x446   :  { %v465_v30 = vsub.f32 %v403_v13, %v461_v28 }
 0x448   :  { %v467_v31 = vmul.f32 1.442695, %v465_v30 }
 0x449   :  { %v464_v32 = vpop.xlane.xlu0 %463  ;;  %v582_v37 = vpop.permute.xlu1 %581 }
 0x44a   :  { %8226 = vpow2.f32 %v467_v31  ;;  %v466_v33 = vsub.f32 %v454_v22, %v464_v32  ;;  %v587_v40 = vsel %vm140_vm2, %v582_v37, 0 }
 0x44c   :  { %v469_v34 = vmul.f32 1.442695, %v466_v33 }
 0x44d   :  { %v632_v35 = vpop.permute.xlu0 %631  ;;  %v580_v43 = vpop.permute.xlu1 %579 }
 0x44e   :  { %8228 = vpow2.f32 %v469_v34  ;;  %v637_v44 = vsel %vm140_vm2, %v632_v35, 0 }
 0x451   :  { %v630_v39 = vpop.permute.xlu0 %629  ;;  %v748_v47 = vpop.permute.xlu1 %747 }
 0x452   :  { %v753_v48 = vsel %vm261_vm3, %v748_v47, 0 }
 0x454   :  { %v8542_v36 = vpop.eup %8226 }
 0x455   :  { %v477_v38 = vpack.c.bf16 %v8542_v36, %v8542_v36  ;;  %v700_v45 = vpop.permute.xlu0 %699 }
 0x456   :  { %v705_v46 = vsel %vm261_vm3, %v700_v45, 0 }
 0x457   :  { %7723 = vmatmul.mubr.msk.bf16.vlgmr.msra.gmra.mrb[12].mxu1 %vm140_vm2, %v477_v38 }
 0x458   :  { %v8548_v41 = vpop.eup %8228  ;;  %7733 = vmatpush3.bf16.xpose.msra.mxu1 %v587_v40  ;;  %7734 = vmatprep.mubr.msk.bf16.mxu1 %vm8307_vm0, %v8306_v0 }
 0x459   :  { %v478_v42 = vpack.c.bf16 %v8548_v41, %v8548_v41  ;;  %7744 = vmatprep.subr.bf16.mxu1 %v8306_v0 }
 0x45b   :  { %7729 = vmatmul.mubr.msk.bf16.vlgmr.msra.gmra.mrb[16].mxu0 %vm140_vm2, %v478_v42 }
 0x45c   :  { %7739 = vmatpush3.bf16.xpose.msra.mxu0 %v637_v44  ;;  %7740 = vmatprep.mubr.msk.bf16.mxu0 %vm8307_vm0, %v8306_v0 }
 0x45d   :  { %7750 = vmatprep.subr.bf16.mxu0 %v8306_v0 }
 0x45f   :  { %7735 = vmatmul.mubr.msk.bf16.vlgmr.msra.gmra.mrb[16].mxu1 %vm140_vm2, %v580_v43 }
 0x460   :  { %7745 = vmatpush3.bf16.msra.mxu1 %v705_v46  ;;  %7746 = vmatprep.mubr.msk.bf16.mxu1 %vm8307_vm0, %v8306_v0 }
 0x461   :  { %7756 = vmatprep.subr.bf16.mxu1 %v8306_v0 }
 0x463   :  { %7741 = vmatmul.mubr.msk.bf16.vlgmr.msra.gmra.mrb[20].mxu0 %vm140_vm2, %v630_v39 }
 0x464   :  { %7751 = vmatpush3.bf16.msra.mxu0 %v753_v48  ;;  %7752 = vmatprep.mubr.msk.bf16.mxu0 %vm8307_vm0, %v8306_v0 }
 0x465   :  { %7762 = vmatprep.subr.bf16.mxu0 %v8306_v0 }
 0x52a   :  { %v8570_v49 = vpop.f32.mrb[12].mxu1 }
 0x52b   :  { %v7724_v50 = vpop.f32.mrb[13].mxu1 }
 0x52c   :  { %v524_v51 = vpop.f32.mrb[14].mxu1 }
 0x52d   :  { %v7725_v52 = vpop.f32.mrb[15].mxu1 }
 0x52e   :  { %v8572_v54 = vpop.f32.mrb[16].mxu0 }
 0x52f   :  { %v7730_v55 = vpop.f32.mrb[17].mxu0 }
 0x530   :  { %v572_v56 = vpop.f32.mrb[18].mxu0 }
 0x531   :  { %v7731_v58 = vpop.f32.mrb[19].mxu0 }
 0x532   :  { %v623_v59 = vpop.f32.mrb[16].mxu1  ;;  %v471_v58 = vsel %vm140_vm2, %v8542_v36, 0.0 }
 0x533   :  { %v624_v60 = vadd.f32 %v623_v59, %v8482_v29  ;;  %v7736_v61 = vpop.f32.mrb[17].mxu1 }
 0x534   :  { %v626_v62 = vpop.f32.mrb[18].mxu1 }
 0x535   :  { %v7737_v63 = vpop.f32.mrb[19].mxu1  ;;  %v679_v2 = vsel %vm140_vm2, %v624_v60, -inf }
 0x536   :  { %680 = vmax.xlane.f32.xlu1 %v679_v2  ;;  %v673_v5 = vpop.f32.mrb[20].mxu0 }
 0x537   :  { %v674_v6 = vadd.f32 %v673_v5, %v8482_v29  ;;  %v7742_v8 = vpop.f32.mrb[21].mxu0 }
 0x538   :  { %v676_v9 = vpop.f32.mrb[22].mxu0 }
 0x539   :  { %v7743_v10 = vpop.f32.mrb[23].mxu0  ;;  %v682_v12 = vsel %vm140_vm2, %v674_v6, -inf }
 0x53a   :  { %683 = vmax.xlane.f32.xlu0 %v682_v12 }
 0x547   :  { %801 = vrot.lane.b32.xlu1 %v8441_v11, %s10176_s25 }
 0x54b   :  { %799 = vrot.lane.b32.xlu1 %v8455_v16, %s10171_s26 }
 0x550   :  { %851 = vrot.lane.b32.xlu0 %v8445_v14, %s10176_s25 }
 0x554   :  { %849 = vrot.lane.b32.xlu0 %v8459_v18, %s10171_s26  ;;  %s10194_s26 = smov 24  }
 0x5c3   :  { %v681_v13 = vpop.xlane.xlu1 %680 }
 0x5c4   :  { %v685_v15 = vsub.f32 %v624_v60, %v681_v13  ;;  %v474_v60 = vsel %vm140_vm2, %v8548_v41, 0.0 }
 0x5c6   :  { %v687_v17 = vmul.f32 1.442695, %v685_v15  ;;  %v248_v15 = vsel %vm140_vm2, %v8494_v53, 0.0 }
 0x5c7   :  { %v684_v19 = vpop.xlane.xlu0 %683  ;;  %v802_v23 = vpop.permute.xlu1 %801 }
 0x5c8   :  { %8230 = vpow2.f32 %v687_v17  ;;  %v686_v20 = vsub.f32 %v674_v6, %v684_v19  ;;  %v807_v25 = vsel %vm140_vm2, %v802_v23, 0 }
 0x5ca   :  { %v689_v21 = vmul.f32 1.442695, %v686_v20  ;;  %v251_v20 = vsel %vm140_vm2, %v8500_v57, 0.0 }
 0x5cb   :  { %v852_v27 = vpop.permute.xlu0 %851  ;;  %v800_v30 = vpop.permute.xlu1 %799 }
 0x5cc   :  { %8232 = vpow2.f32 %v689_v21  ;;  %v857_v28 = vsel %vm140_vm2, %v852_v27, 0 }
 0x5cf   :  { %v850_v31 = vpop.permute.xlu0 %849 }
 0x5d2   :  { %v8231_v22 = vpop.eup %8230 }
 0x5d3   :  { %v697_v24 = vpack.c.bf16 %v8231_v22, %v8231_v22  ;;  %v691_v61 = vsel %vm140_vm2, %v8231_v22, 0.0 }
 0x5d5   :  { %7747 = vmatmul.mubr.msk.bf16.vlgmr.msra.gmra.mrb[20].mxu1 %vm140_vm2, %v697_v24 }
 0x5d6   :  { %v8233_v16 = vpop.eup %8232  ;;  %7757 = vmatpush3.bf16.xpose.msra.mxu1 %v807_v25  ;;  %7758 = vmatprep.mubr.msk.bf16.mxu1 %vm8307_vm0, %v8306_v0 }
 0x5d7   :  { %v698_v18 = vpack.c.bf16 %v8233_v16, %v8233_v16  ;;  %7768 = vmatprep.subr.bf16.mxu1 %v8306_v0  ;;  %v694_v59 = vsel %vm140_vm2, %v8233_v16, 0.0 }
 0x5d9   :  { %7753 = vmatmul.mubr.msk.bf16.vlgmr.msra.gmra.mrb[24].mxu0 %vm140_vm2, %v698_v18 }
 0x5da   :  { %7763 = vmatpush3.bf16.xpose.msra.mxu0 %v857_v28  ;;  %7764 = vmatprep.mubr.msk.bf16.mxu0 %vm8307_vm0, %v8306_v0 }
 0x5db   :  { %7774 = vmatprep.subr.bf16.mxu0 %v8306_v0 }
 0x5dd   :  { %7759 = vmatmul.mubr.msk.bf16.vlgmr.msra.gmra.mrb[24].mxu1 %vm140_vm2, %v800_v30 }
 0x5de   :  { %7770 = vmatprep.mubr.msk.bf16.mxu1 %vm8307_vm0, %v8306_v0 }
 0x5e1   :  { %7765 = vmatmul.mubr.msk.bf16.vlgmr.msra.gmra.mrb[28].mxu0 %vm140_vm2, %v850_v31 }
 0x5e2   :  { %7776 = vmatprep.mubr.msk.bf16.mxu0 %vm8307_vm0, %v8306_v0 }
 0x6a8   :  { %v8602_v32 = vpop.f32.mrb[20].mxu1 }
 0x6a9   :  { %v7748_v33 = vpop.f32.mrb[21].mxu1 }
 0x6aa   :  { %v744_v34 = vpop.f32.mrb[22].mxu1 }
 0x6ab   :  { %v7749_v35 = vpop.f32.mrb[23].mxu1  ;;  %v7958_v34 = vld [vmem:[%s10154_s3] sm:$0xff]  }
 0x6ac   :  { %v8604_v37 = vpop.f32.mrb[24].mxu0 }
 0x6ad   :  { %v7754_v38 = vpop.f32.mrb[25].mxu0 }
 0x6ae   :  { %v792_v39 = vpop.f32.mrb[26].mxu0 }
 0x6af   :  { %v7755_v40 = vpop.f32.mrb[27].mxu0 }
 0x6b0   :  { %v843_v42 = vpop.f32.mrb[24].mxu1 }
 0x6b1   :  { %v844_v43 = vadd.f32 %v843_v42, %v8482_v29  ;;  %v7760_v44 = vpop.f32.mrb[25].mxu1 }
 0x6b2   :  { %v846_v45 = vpop.f32.mrb[26].mxu1 }
 0x6b3   :  { %v7761_v46 = vpop.f32.mrb[27].mxu1  ;;  %v899_v47 = vsel %vm140_vm2, %v844_v43, -inf }
 0x6b4   :  { %900 = vmax.xlane.f32.xlu1 %v899_v47  ;;  %v893_v48 = vpop.f32.mrb[28].mxu0 }
 0x6b5   :  { %v894_v50 = vadd.f32 %v893_v48, %v8482_v29  ;;  %v7766_v51 = vpop.f32.mrb[29].mxu0 }
 0x6b6   :  { %v896_v52 = vpop.f32.mrb[30].mxu0 }
 0x6b7   :  { %v7767_v55 = vpop.f32.mrb[31].mxu0  ;;  %v902_v56 = vsel %vm140_vm2, %v894_v50, -inf }
 0x6b8   :  { %903 = vmax.xlane.f32.xlu0 %v902_v56 }
 0x6c5   :  { %967 = vrot.lane.b32.xlu1 %v8445_v14, %s10169_s27 }
 0x6ce   :  { %919 = vrot.lane.b32.xlu0 %v8441_v11, %s10169_s27 }
 0x6e9   :  { %472 = vadd.xlane.f32.xlu1 %v471_v58 }
 0x6ed   :  { %695 = vadd.xlane.f32.xlu1 %v694_v59  ;;  %475 = vadd.xlane.f32.xlu0 %v474_v60 }
 0x6f1   :  { %692 = vadd.xlane.f32.xlu0 %v691_v61 }
 0x741   :  { %v901_v62 = vpop.xlane.xlu1 %900 }
 0x742   :  { %v905_v63 = vsub.f32 %v844_v43, %v901_v62 }
 0x744   :  { %v907_v14 = vmul.f32 1.442695, %v905_v63 }
 0x745   :  { %v968_v2 = vpop.permute.xlu1 %967  ;;  %v904_v5 = vpop.xlane.xlu0 %903 }
 0x746   :  { %8234 = vpow2.f32 %v907_v14  ;;  %v973_v11 = vsel %vm261_vm3, %v968_v2, 0  ;;  %v906_v36 = vsub.f32 %v894_v50, %v904_v5 }
 0x747   :  { %7775 = vmatpush3.bf16.msra.mxu0 %v973_v11 }
 0x748   :  { %v909_v6 = vmul.f32 1.442695, %v906_v36 }
 0x749   :  { %v920_v8 = vpop.permute.xlu0 %919 }
 0x74a   :  { %8236 = vpow2.f32 %v909_v6  ;;  %v925_v41 = vsel %vm261_vm3, %v920_v8, 0 }
 0x74b   :  { %7769 = vmatpush3.bf16.msra.mxu1 %v925_v41 }
 0x74c   :  { %7780 = vmatprep.subr.bf16.mxu1 %v8306_v0 }
 0x750   :  { %v8235_v9 = vpop.eup %8234 }
 0x751   :  { %v911_v10 = vsel %vm140_vm2, %v8235_v9, 0.0  ;;  %v917_v12 = vpack.c.bf16 %v8235_v9, %v8235_v9 }
 0x752   :  { %912 = vadd.xlane.f32.xlu0 %v911_v10 }
 0x753   :  { %7771 = vmatmul.mubr.msk.bf16.vlgmr.msra.gmra.mrb[28].mxu1 %vm140_vm2, %v917_v12 }
 0x754   :  { %v8237_v13 = vpop.eup %8236  ;;  %7784 = vmatprep.mubr.msk.bf16.mxu1 %vm8307_vm0, %v8306_v0  ;;  %7781 = vmatpush3.bf16.msra.mxu1 %v7958_v34  ;;  %v1175_v34 = vld [vmem:[%s10156_s5 + $0x40] sm:$0xff] }
 0x755   :  { %v914_v17 = vsel %vm140_vm2, %v8237_v13, 0.0  ;;  %v918_v19 = vpack.c.bf16 %v8237_v13, %v8237_v13  ;;  %7782 = vmatprep.subr.bf16.mxu1 %v8306_v0 }
 0x756   :  { %249 = vadd.xlane.f32.xlu0 %v248_v15  ;;  %915 = vadd.xlane.f32.xlu1 %v914_v17 }
 0x757   :  { %7777 = vmatmul.mubr.msk.bf16.vlgmr.msra.gmra.mrb[32].mxu0 %vm140_vm2, %v918_v19 }
 0x75a   :  { %252 = vadd.xlane.f32.xlu1 %v251_v20 }
 0x776   :  { %v473_v21 = vpop.xlane.xlu1 %472 }
 0x777   :  { %8238 = vrcp.f32 %v473_v21 }
 0x77a   :  { %v696_v22 = vpop.xlane.xlu1 %695  ;;  %v476_v23 = vpop.xlane.xlu0 %475 }
 0x77b   :  { %8240 = vrcp.f32 %v476_v23 }
 0x77c   :  { %8242 = vrcp.f32 %v696_v22 }
 0x77e   :  { %v693_v24 = vpop.xlane.xlu0 %692 }
 0x77f   :  { %8244 = vrcp.f32 %v693_v24 }
 0x781   :  { %v8239_v53 = vpop.eup %8238 }
 0x782   :  { %v577_v27 = vmul.f32 %v8239_v53, %v8570_v49 }
 0x785   :  { %v8241_v25 = vpop.eup %8240 }
 0x786   :  { %v8243_v16 = vpop.eup %8242  ;;  %v578_v18 = vmul.f32 %v8241_v25, %v8572_v54 }
 0x787   :  { %v798_v31 = vmul.f32 %v8243_v16, %v8604_v37 }
 0x788   :  { %v7926_v30 = vpack.i.bf16 %v578_v18, %v577_v27 }
 0x789   :  { %v8245_v28 = vpop.eup %8244 }
 0x78a   :  { %v797_v57 = vmul.f32 %v8245_v28, %v8602_v32  ;;  %7927 = vrot.lane.b32.xlu0 %v7926_v30, %s10175_s28  ;;  %v7959_v32 = vld [vmem:[%s10154_s3 + $0x8] sm:$0xff]  }
 0x78b   :  { %7783 = vmatpush3.bf16.msra.mxu1 %v7959_v32  ;;  %v1176_v32 = vld [vmem:[%s10156_s5 + $0x48] sm:$0xff] }
 0x78c   :  { %v7931_v33 = vpack.i.bf16 %v798_v31, %v797_v57 }
 0x78e   :  { %7932 = vrot.lane.b32.xlu1 %v7931_v33, %s10174_s29  ;;  %s10192_s29 = smov 8  }
 0x7df   :  { %v913_v49 = vpop.xlane.xlu0 %912 }
 0x7e0   :  { %8246 = vrcp.f32 %v913_v49  ;;  %v1168_v49 = vld [vmem:[%s10156_s5 + $0x8] sm:$0xff] }
 0x7e3   :  { %v916_v54 = vpop.xlane.xlu1 %915  ;;  %v250_v51 = vpop.xlane.xlu0 %249 }
 0x7e4   :  { %8248 = vrcp.f32 %v916_v54 }
 0x7e5   :  { %8250 = vrcp.f32 %v250_v51  ;;  %v1170_v51 = vld [vmem:[%s10156_s5 + $0x18] sm:$0xff] }
 0x7e7   :  { %v253_v52 = vpop.xlane.xlu1 %252 }
 0x7e8   :  { %8252 = vrcp.f32 %v253_v52  ;;  %v8323_v52 = vmov 0  }
 0x7e9   :  { %1478 = vmatprep.mubr.bf16.mxu0 %v8323_v52 }
 0x7ea   :  { %v8247_v39 = vpop.eup %8246 }
 0x7ee   :  { %v8249_v42 = vpop.eup %8248 }
 0x7ef   :  { %v8251_v56 = vpop.eup %8250 }
 0x7f0   :  { %v355_v14 = vmul.f32 %v8251_v56, %v8522_v1  ;;  %v1178_v56 = vld [vmem:[%s10156_s5 + $0x58] sm:$0xff] }
 0x7f2   :  { %v8253_v59 = vpop.eup %8252 }
 0x7f3   :  { %v356_v2 = vmul.f32 %v8253_v59, %v8524_v7  ;;  %v6561_v7 = vld [vmem:[%s10155_s4] ss:$0 sm:$0xff]  ;;  %v6573_v59 = vcombine.low %v1170_v51, %v1178_v56 }
 0x7fc   :  { %v7928_v55 = vpop.permute.xlu0 %7927 }
 0x7fd   :  { %v7930_v60 = vunpack.i.h.bf16 %v7928_v55  ;;  %v7929_v61 = vunpack.i.l.bf16 %v7928_v55 }
 0x7ff   :  { %v1044_v11 = vsel %vm140_vm2, %v356_v2, %v7930_v60  ;;  %v1043_v36 = vsel %vm140_vm2, %v355_v14, %v7929_v61  ;;  %v6574_v60 = vcombine.high %v1170_v51, %v1178_v56  ;;  %v7961_v56 = vld [vmem:[%s10157_s7 + $0xc0] sm:$0xff]  }
 0x800   :  { %v7933_v58 = vpop.permute.xlu1 %7932 }
 0x801   :  { %v7935_v62 = vunpack.i.h.bf16 %v7933_v58  ;;  %v7934_v63 = vunpack.i.l.bf16 %v7933_v58 }
 0x803   :  { %v1046_v41 = vsel %vm1045_vm5, %v1043_v36, %v7934_v63  ;;  %v1047_v9 = vsel %vm1045_vm5, %v1044_v11, %v7935_v62  ;;  %v6565_v36 = vld [vmem:[%s10158_s9] ss:$0 sm:$0xff] }
 0x826   :  { %v961_v35 = vpop.f32.mrb[28].mxu1 }
 0x827   :  { %v7772_v37 = vpop.f32.mrb[29].mxu1  ;;  %v1017_v44 = vmul.f32 %v8247_v39, %v961_v35  ;;  %v1183_v39 = vld [vmem:[%s10156_s5 + $0x80] sm:$0xff] }
 0x828   :  { %v964_v38 = vpop.f32.mrb[30].mxu1  ;;  %v6569_v37 = vcombine.low %v1168_v49, %v1176_v32 }
 0x829   :  { %v7773_v40 = vpop.f32.mrb[31].mxu1  ;;  %v6570_v38 = vcombine.high %v1168_v49, %v1176_v32  ;;  %v1181_v49 = vld [vmem:[%s10156_s5 + $0x70] sm:$0xff]  ;;  %v1182_v32 = vld [vmem:[%s10156_s5 + $0x78] sm:$0xff] }
 0x82a   :  { %v1009_v43 = vpop.f32.mrb[32].mxu0  ;;  %v1191_v40 = vld [vmem:[%s10156_s5 + $0xc0] sm:$0xff] }
 0x82b   :  { %v1018_v45 = vmul.f32 %v8249_v42, %v1009_v43  ;;  %v7778_v46 = vpop.f32.mrb[33].mxu0  ;;  %1489 = vmatprep.subr.bf16.mxu1 %v6570_v38  ;;  %v1184_v42 = vld [vmem:[%s10156_s5 + $0x88] sm:$0xff]  ;;  %v6584_v43 = vcombine.high %v1183_v39, %v1191_v40 }
 0x82c   :  { %v1012_v47 = vpop.f32.mrb[34].mxu0 }
 0x82d   :  { %v7936_v48 = vpack.i.bf16 %v1018_v45, %v1017_v44  ;;  %v7779_v50 = vpop.f32.mrb[35].mxu0  ;;  %v1192_v44 = vld [vmem:[%s10156_s5 + $0xc8] sm:$0xff]  ;;  %v6583_v45 = vcombine.low %v1183_v39, %v1191_v40  ;;  %v1189_v40 = vld [vmem:[%s10156_s5 + $0xb0] sm:$0xff] }
 0x82e   :  { %v6585_v46 = vcombine.low %v1184_v42, %v1192_v44  ;;  %v6586_v47 = vcombine.high %v1184_v42, %v1192_v44  ;;  %v1177_v50 = vld [vmem:[%s10156_s5 + $0x50] sm:$0xff]  ;;  %v1198_v44 = vld [vmem:[%s10156_s5 + $0xf8] sm:$0xff] }
 0x82f   :  { %7937 = vrot.lane.b32.xlu1 %v7936_v48, %s10173_s30  ;;  %v1169_v48 = vld [vmem:[%s10156_s5 + $0x10] sm:$0xff] }
 0x830   :  { %v6572_v55 = vcombine.high %v1169_v48, %v1177_v50  ;;  %v6571_v58 = vcombine.low %v1169_v48, %v1177_v50  ;;  %v1197_v42 = vld [vmem:[%s10156_s5 + $0xf0] sm:$0xff] }
 0x831   :  { %v6596_v50 = vcombine.high %v1189_v40, %v1197_v42 }
 0x8a1   :  { %v7938_v5 = vpop.permute.xlu1 %7937 }
 0x8a2   :  { %v7940_v6 = vunpack.i.h.bf16 %v7938_v5  ;;  %v7939_v8 = vunpack.i.l.bf16 %v7938_v5 }
 0x8a4   :  { %v1050_v10 = vsel %vm1048_vm6, %v1047_v9, %v7940_v6  ;;  %v1049_v12 = vsel %vm1048_vm6, %v1046_v41, %v7939_v8  ;;  %v6566_v41 = vld [vmem:[%s10159_s10] ss:$0 sm:$0xff] }
 0x8a5   :  { %v1051_v1 = vpack.c.bf16 %v1050_v10, %v1049_v12  ;;  %v1185_v12 = vld [vmem:[%s10156_s5 + $0x90] sm:$0xff] }
 0x8a7   :  { %7785 = vmatmul.mubr.msk.bf16.vlgmr.msra.gmra.mrb[32].mxu1 %vm86_vm1, %v1051_v1  ;;  %v1193_v1 = vld [vmem:[%s10156_s5 + $0xd0] sm:$0xff] }
 0x8a8   :  { %1490 = vmatpush1.bf16.msra.mxu1 %v6569_v37  ;;  %1521 = vmatprep.mubr.bf16.mxu1 %v8323_v52 }
 0x8a9   :  { %1491 = vmatprep.subr.bf16.mxu1 %v6586_v47 }
 0x8ac   :  { %1492 = vmatpush1.bf16.msra.mxu1 %v6585_v46 }
 0x8ad   :  { %1575 = vmatprep.subr.bf16.mxu1 %v6574_v60  ;;  %v7962_v60 = vld [vmem:[%s10157_s7] sm:$0xff]  }
 0x97a   :  { %v1112_v13 = vpop.f32.mrb[32].mxu1 }
 0x97b   :  { %v1113_v15 = vadd.f32 %v6561_v7, %v1112_v13  ;;  %v7786_v17 = vpop.f32.mrb[33].mxu1  ;;  %v1194_v13 = vld [vmem:[%s10156_s5 + $0xd8] sm:$0xff] }
 0x97c   :  { %v1115_v19 = vpop.f32.mrb[34].mxu1 }
 0x97d   :  { %v1116_v20 = vadd.f32 %v6561_v7, %v1115_v19  ;;  %v7787_v21 = vpop.f32.mrb[35].mxu1  ;;  %v1119_v22 = vadd.f32 %v1113_v15, %v8424_v3  ;;  %v1186_v7 = vld [vmem:[%s10156_s5 + $0x98] sm:$0xff] }
 0x97e   :  { %v1179_v21 = vld [vmem:[%s10156_s5 + $0x60] sm:$0xff] }
 0x97f   :  { %v1123_v23 = vsel %vm86_vm1, %v1119_v22, 0.0  ;;  %v1120_v24 = vadd.f32 %v1116_v20, %v8429_v4  ;;  %v1167_v4 = vld [vmem:[%s10156_s5] sm:$0xff] }
 0x980   :  { %1124 = vadd.xlane.f32.xlu0 %v1123_v23  ;;  %v6568_v54 = vcombine.high %v1167_v4, %v1175_v34  ;;  %v6567_v35 = vcombine.low %v1167_v4, %v1175_v34  ;;  %v1171_v20 = vld [vmem:[%s10156_s5 + $0x20] sm:$0xff]  ;;  %v1180_v23 = vld [vmem:[%s10156_s5 + $0x68] sm:$0xff]  ;;  %v1173_v34 = vld [vmem:[%s10156_s5 + $0x30] sm:$0xff] }
 0x981   :  { %v1126_v53 = vsel %vm86_vm1, %v1120_v24, 0.0  ;;  %v6579_v47 = vcombine.low %v1173_v34, %v1181_v49 }
 0x982   :  { %1127 = vadd.xlane.f32.xlu1 %v1126_v53  ;;  %1446 = vmatprep.subr.bf16.mxu0 %v6568_v54  ;;  %v6588_v53 = vcombine.high %v1185_v12, %v1193_v1  ;;  %v1174_v54 = vld [vmem:[%s10156_s5 + $0x38] sm:$0xff] }
 0x983   :  { %1447 = vmatpush1.bf16.msra.mxu0 %v6567_v35  ;;  %v6582_v46 = vcombine.high %v1174_v54, %v1182_v32  ;;  %v6581_v48 = vcombine.low %v1174_v54, %v1182_v32 }
 0x984   :  { %1448 = vmatprep.subr.bf16.mxu0 %v6584_v43  ;;  %v1190_v43 = vld [vmem:[%s10156_s5 + $0xb8] sm:$0xff] }
 0x985   :  { %v6598_v51 = vcombine.high %v1190_v43, %v1198_v44 }
 0x987   :  { %1449 = vmatpush1.bf16.msra.mxu0 %v6583_v45  ;;  %v6580_v45 = vcombine.high %v1173_v34, %v1181_v49  ;;  %v8914_v34 = vsub.s32 3, %v8479_v26 }
 0x988   :  { %1532 = vmatprep.subr.bf16.mxu0 %v6572_v55  ;;  %v7960_v55 = vld [vmem:[%s10157_s7 + $0x40] sm:$0xff]  }
 0xa0d   :  { %v1125_v25 = vpop.xlane.xlu0 %1124 }
 0xa0e   :  { %v1130_v16 = vmul.f32 0.03125, %v1125_v25  ;;  %v6590_v25 = vcombine.high %v1186_v7, %v1194_v13 }
 0xa0f   :  { %v1128_v27 = vpop.xlane.xlu1 %1127 }
 0xa10   :  { %v1132_v18 = vsub.f32 %v1119_v22, %v1130_v16  ;;  %v1131_v28 = vmul.f32 0.03125, %v1128_v27  ;;  %v1172_v22 = vld [vmem:[%s10156_s5 + $0x28] sm:$0xff]  ;;  %v6587_v16 = vcombine.low %v1185_v12, %v1193_v1  ;;  %v6589_v27 = vcombine.low %v1186_v7, %v1194_v13  ;;  %v7976_v12 = vld [vmem:[%s10157_s7 + $0x60] sm:$0xff]  }
 0xa11   :  { %v6577_v4 = vcombine.low %v1172_v22, %v1180_v23  ;;  %v7977_v1 = vld [vmem:[%s10157_s7 + $0xe0] sm:$0xff]  }
 0xa12   :  { %v1133_v30 = vsub.f32 %v1120_v24, %v1131_v28  ;;  %v1134_v57 = vmul.f32 %v1132_v18, %v1132_v18  ;;  %v1195_v28 = vld [vmem:[%s10156_s5 + $0xe0] sm:$0xff] }
 0xa13   :  { %v7978_v7 = vld [vmem:[%s10157_s7 + $0x20] sm:$0xff]  }
 0xa14   :  { %v1136_v31 = vsel %vm86_vm1, %v1134_v57, 0.0  ;;  %v1135_v33 = vmul.f32 %v1133_v30, %v1133_v30  ;;  %v1196_v57 = vld [vmem:[%s10156_s5 + $0xe8] sm:$0xff]  ;;  %v7979_v13 = vld [vmem:[%s10157_s7 + $0xa0] sm:$0xff]  }
 0xa15   :  { %1137 = vadd.xlane.f32.xlu0 %v1136_v31  ;;  %v6576_v31 = vcombine.high %v1171_v20, %v1179_v21 }
 0xa16   :  { %v1139_v3 = vsel %vm86_vm1, %v1135_v33, 0.0  ;;  %v6578_v33 = vcombine.high %v1172_v22, %v1180_v23  ;;  %v7983_v22 = vld [vmem:[%s10157_s7 + $0xa8] sm:$0xff]   ;;  %v7984_v23 = vld [vmem:[%s10157_s7 + $0x70] sm:$0xff]  }
 0xa19   :  { %1140 = vadd.xlane.f32.xlu0 %v1139_v3  ;;  %v6575_v3 = vcombine.low %v1171_v20, %v1179_v21  ;;  %v7981_v20 = vld [vmem:[%s10157_s7 + $0xe8] sm:$0xff]  }
 0xa1a   :  { %v7982_v21 = vld [vmem:[%s10157_s7 + $0x28] sm:$0xff]  }
 0xaa2   :  { %v1138_v61 = vpop.xlane.xlu0 %1137 }
 0xaa3   :  { %v1142_v62 = vmul.f32 0.03125, %v1138_v61  ;;  %v7963_v61 = vld [vmem:[%s10157_s7 + $0x80] sm:$0xff]  }
 0xaa5   :  { %v1144_v63 = vadd.f32 1e-05, %v1142_v62  ;;  %v7964_v62 = vld [vmem:[%s10157_s7 + $0x48] sm:$0xff]  }
 0xaa6   :  { %v1141_v14 = vpop.xlane.xlu0 %1140 }
 0xaa7   :  { %8254 = vrsqrt.f32 %v1144_v63  ;;  %v1143_v2 = vmul.f32 0.03125, %v1141_v14  ;;  %v7965_v63 = vld [vmem:[%s10157_s7 + $0xc8] sm:$0xff]  }
 0xaa8   :  { %v7966_v14 = vld [vmem:[%s10157_s7 + $0x8] sm:$0xff]  }
 0xaa9   :  { %v1145_v5 = vadd.f32 1e-05, %v1143_v2  ;;  %v7967_v2 = vld [vmem:[%s10157_s7 + $0x88] sm:$0xff]  }
 0xaab   :  { %8256 = vrsqrt.f32 %v1145_v5  ;;  %v7968_v5 = vld [vmem:[%s10157_s7 + $0x50] sm:$0xff]  }
 0xab1   :  { %v8255_v11 = vpop.eup %8254 }
 0xab2   :  { %v1148_v6 = vmul.f32 %v8255_v11, %v1132_v18  ;;  %v1187_v18 = vld [vmem:[%s10156_s5 + $0xa0] sm:$0xff]  ;;  %v7969_v11 = vld [vmem:[%s10157_s7 + $0xd0] sm:$0xff]  }
 0xab3   :  { %v6592_v35 = vcombine.high %v1187_v18, %v1195_v28  ;;  %v6591_v38 = vcombine.low %v1187_v18, %v1195_v28  ;;  %v7990_v18 = vld [vmem:[%s10157_s7 + $0x38] sm:$0xff]  }
 0xab4   :  { %v1156_v9 = vmul.f32 %v6565_v36, %v1148_v6  ;;  %v7971_v6 = vld [vmem:[%s10157_s7 + $0x90] sm:$0xff]   ;;  %v7991_v28 = vld [vmem:[%s10157_s7 + $0xb8] sm:$0xff]  }
 0xab5   :  { %v8257_v8 = vpop.eup %8256 }
 0xab6   :  { %v1149_v10 = vmul.f32 %v8257_v8, %v1133_v30  ;;  %v8721_v17 = vadd.f32 %v6566_v41, %v1156_v9  ;;  %v1188_v30 = vld [vmem:[%s10156_s5 + $0xa8] sm:$0xff]  ;;  %v7972_v8 = vld [vmem:[%s10157_s7 + $0x58] sm:$0xff]  }
 0xab7   :  { %v6594_v37 = vcombine.high %v1188_v30, %v1196_v57  ;;  %v6593_v39 = vcombine.low %v1188_v30, %v1196_v57  ;;  %v7974_v9 = vld [vmem:[%s10157_s7 + $0x18] sm:$0xff]   ;;  %v7992_v30 = vld [vmem:[%s10157_s7 + $0x140] sm:$0xff]  }
 0xab8   :  { %v1157_v15 = vmul.f32 %v6565_v36, %v1149_v10  ;;  %v7970_v36 = vld [vmem:[%s10157_s7 + $0x10] sm:$0xff]   ;;  %v7975_v10 = vld [vmem:[%s10157_s7 + $0x98] sm:$0xff]   ;;  %v7993_v57 = vld [vmem:[%s10157_s7 + $0x1c0] sm:$0xff]  }
 0xaba   :  { %v8723_v19 = vadd.f32 %v6566_v41, %v1157_v15  ;;  %v7973_v41 = vld [vmem:[%s10157_s7 + $0xd8] sm:$0xff]   ;;  %v7980_v15 = vld [vmem:[%s10157_s7 + $0x68] sm:$0xff]  }
 0xabc   :  { %v8739_v24 = vpack.c.bf16 %v8723_v19, %v8721_v17 }
 0xabe   :  { %6599 = vmatmul.mubr.msk.bf16.vlgmr.msra.gmra.mrb[36].mxu0 %vm86_vm1, %v8739_v24  ;;  %6600 = vmatmul.mubr.msk.bf16.vlgmr.msra.gmra.mrb[36].mxu1 %vm86_vm1, %v8739_v24 }
 0xabf   :  { %1533 = vmatpush1.bf16.msra.mxu0 %v6571_v58  ;;  %1576 = vmatpush1.bf16.msra.mxu1 %v6573_v59  ;;  %v6595_v58 = vcombine.low %v1189_v40, %v1197_v42  ;;  %v6597_v59 = vcombine.low %v1190_v43, %v1198_v44  ;;  %v8927_v42 = vsub.s32 5, %v8479_v26  ;;  %v8930_v43 = vsub.s32 7, %v8479_v26 }
 0xac0   :  { %1534 = vmatprep.subr.bf16.mxu0 %v6588_v53  ;;  %1577 = vmatprep.subr.bf16.mxu1 %v6590_v25  ;;  %v7986_v53 = vld [vmem:[%s10157_s7 + $0x30] sm:$0xff]  }
 0xac1   :  { %1564 = vmatprep.mubr.bf16.mxu0 %v8323_v52  ;;  %1607 = vmatprep.mubr.bf16.mxu1 %v8323_v52  ;;  %v7987_v25 = vld [vmem:[%s10157_s7 + $0xb0] sm:$0xff]  }
 0xac3   :  { %1535 = vmatpush1.bf16.msra.mxu0 %v6587_v16  ;;  %1578 = vmatpush1.bf16.msra.mxu1 %v6589_v27  ;;  %v7988_v16 = vld [vmem:[%s10157_s7 + $0x78] sm:$0xff]  }
 0xac4   :  { %1618 = vmatprep.subr.bf16.mxu0 %v6576_v31  ;;  %1661 = vmatprep.subr.bf16.mxu1 %v6578_v33  ;;  %v7989_v27 = vld [vmem:[%s10157_s7 + $0xf8] sm:$0xff]   ;;  %v8902_v31 = vsub.s32 0, %v8479_v26  ;;  %v8905_v33 = vsub.s32 2, %v8479_v26 }
 0xac6   :  { %6601 = vmatmul.mubr.msk.bf16.vlgmr.msra.gmra.mrb[40].mxu0 %vm86_vm1, %v8739_v24  ;;  %6602 = vmatmul.mubr.msk.bf16.vlgmr.msra.gmra.mrb[40].mxu1 %vm86_vm1, %v8739_v24 }
 0xac7   :  { %1619 = vmatpush1.bf16.msra.mxu0 %v6575_v3  ;;  %1662 = vmatpush1.bf16.msra.mxu1 %v6577_v4  ;;  %v1199_v3 = vld [vmem:[%s10160_s6] sm:$0xff]  ;;  %v8911_v4 = vsub.s32 1, %v8479_v26 }
 0xac8   :  { %1620 = vmatprep.subr.bf16.mxu0 %v6592_v35  ;;  %1663 = vmatprep.subr.bf16.mxu1 %v6594_v37  ;;  %v1206_v49 = vrot.slane %v1199_v3, %v8902_v31  ;;  %v1214_v54 = vrot.slane %v1199_v3, %v8905_v33  ;;  %v1218_v35 = vrot.slane %v1199_v3, %v8914_v34  ;;  %v8921_v37 = vsub.s32 4, %v8479_v26 }
 0xac9   :  { %1650 = vmatprep.mubr.bf16.mxu0 %v8323_v52  ;;  %1693 = vmatprep.mubr.bf16.mxu1 %v8323_v52  ;;  %v1210_v32 = vrot.slane %v1199_v3, %v8911_v4 }
 0xacb   :  { %1621 = vmatpush1.bf16.msra.mxu0 %v6591_v38  ;;  %1664 = vmatpush1.bf16.msra.mxu1 %v6593_v39  ;;  %v8924_v38 = vsub.s32 6, %v8479_v26  ;;  %v1226_v26 = vrot.slane %v1199_v3, %v8927_v42 }
 0xacc   :  { %1704 = vmatprep.subr.bf16.mxu0 %v6580_v45  ;;  %1747 = vmatprep.subr.bf16.mxu1 %v6582_v46 }
 0xace   :  { %6603 = vmatmul.mubr.msk.bf16.vlgmr.msra.gmra.mrb[44].mxu0 %vm86_vm1, %v8739_v24  ;;  %6604 = vmatmul.mubr.msk.bf16.vlgmr.msra.gmra.mrb[44].mxu1 %vm86_vm1, %v8739_v24 }
 0xacf   :  { %1705 = vmatpush1.bf16.msra.mxu0 %v6579_v47  ;;  %1748 = vmatpush1.bf16.msra.mxu1 %v6581_v48 }
 0xad0   :  { %1706 = vmatprep.subr.bf16.mxu0 %v6596_v50  ;;  %1749 = vmatprep.subr.bf16.mxu1 %v6598_v51 }
 0xad1   :  { %1736 = vmatprep.mubr.bf16.mxu0 %v8323_v52  ;;  %1779 = vmatprep.mubr.bf16.mxu1 %v8323_v52 }
 0xad3   :  { %1707 = vmatpush1.bf16.msra.mxu0 %v6595_v58  ;;  %1750 = vmatpush1.bf16.msra.mxu1 %v6597_v59 }
 0xad4   :  { %7283 = vmatprep.subr.bf16.mxu0 %v7960_v55  ;;  %7305 = vmatprep.subr.bf16.mxu1 %v7961_v56 }
 0xad6   :  { %6605 = vmatmul.mubr.msk.bf16.vlgmr.msra.gmra.mrb[48].mxu0 %vm86_vm1, %v8739_v24  ;;  %6606 = vmatmul.mubr.msk.bf16.vlgmr.msra.gmra.mrb[48].mxu1 %vm86_vm1, %v8739_v24  ;;  %v7985_v24 = vld [vmem:[%s10157_s7 + $0xf0] sm:$0xff]  }
 0xad7   :  { %7284 = vmatpush3.bf16.msra.mxu0 %v7962_v60  ;;  %7306 = vmatpush3.bf16.msra.mxu1 %v7963_v61  ;;  %v1222_v61 = vrot.slane %v1199_v3, %v8921_v37 }
 0xad8   :  { %7285 = vmatprep.subr.bf16.mxu0 %v7964_v62  ;;  %7307 = vmatprep.subr.bf16.mxu1 %v7965_v63  ;;  %v1230_v62 = vrot.slane %v1199_v3, %v8924_v38 }
 0xadb   :  { %7286 = vmatpush3.bf16.msra.mxu0 %v7966_v14  ;;  %7308 = vmatpush3.bf16.msra.mxu1 %v7967_v2  ;;  %v1234_v2 = vrot.slane %v1199_v3, %v8930_v43 }
 0xadc   :  { %7287 = vmatprep.subr.bf16.mxu0 %v7968_v5  ;;  %7309 = vmatprep.subr.bf16.mxu1 %v7969_v11 }
 0xadf   :  { %7288 = vmatpush3.bf16.msra.mxu0 %v7970_v36  ;;  %7310 = vmatpush3.bf16.msra.mxu1 %v7971_v6 }
 0xae0   :  { %7289 = vmatprep.subr.bf16.mxu0 %v7972_v8  ;;  %7311 = vmatprep.subr.bf16.mxu1 %v7973_v41 }
 0xae3   :  { %7290 = vmatpush3.bf16.msra.mxu0 %v7974_v9  ;;  %7312 = vmatpush3.bf16.msra.mxu1 %v7975_v10 }
 0xae4   :  { %7291 = vmatprep.subr.bf16.mxu0 %v7976_v12  ;;  %7313 = vmatprep.subr.bf16.mxu1 %v7977_v1  ;;  %v8939_v12 = vld [vmem:[%s10160_s6 + $0x8] sm:$0xff] }
 0xae7   :  { %7292 = vmatpush3.bf16.msra.mxu0 %v7978_v7  ;;  %7314 = vmatpush3.bf16.msra.mxu1 %v7979_v13 }
 0xae8   :  { %7293 = vmatprep.subr.bf16.mxu0 %v7980_v15  ;;  %7315 = vmatprep.subr.bf16.mxu1 %v7981_v20 }
 0xaeb   :  { %7294 = vmatpush3.bf16.msra.mxu0 %v7982_v21  ;;  %7316 = vmatpush3.bf16.msra.mxu1 %v7983_v22  ;;  %v7994_v22 = vld [vmem:[%s10157_s7 + $0x100] sm:$0xff]  }
 0xaec   :  { %7295 = vmatprep.subr.bf16.mxu0 %v7984_v23  ;;  %7317 = vmatprep.subr.bf16.mxu1 %v7985_v24  ;;  %v7995_v23 = vld [vmem:[%s10157_s7 + $0x180] sm:$0xff]  }
 0xaef   :  { %7296 = vmatpush3.bf16.msra.mxu0 %v7986_v53  ;;  %7318 = vmatpush3.bf16.msra.mxu1 %v7987_v25 }
 0xaf0   :  { %7297 = vmatprep.subr.bf16.mxu0 %v7988_v16  ;;  %7319 = vmatprep.subr.bf16.mxu1 %v7989_v27  ;;  %v7996_v27 = vld [vmem:[%s10157_s7 + $0x148] sm:$0xff]  }
 0xaf3   :  { %7298 = vmatpush3.bf16.msra.mxu0 %v7990_v18  ;;  %7320 = vmatpush3.bf16.msra.mxu1 %v7991_v28  ;;  %v7997_v18 = vld [vmem:[%s10157_s7 + $0x1c8] sm:$0xff]   ;;  %v1238_v28 = vrot.slane %v8939_v12, %v8902_v31 }
 0xaf4   :  { %7327 = vmatprep.subr.bf16.mxu0 %v7992_v30  ;;  %7349 = vmatprep.subr.bf16.mxu1 %v7993_v57 }
 0xb91   :  { %v1480_v39 = vpop.f32.mrb[36].mxu0  ;;  %v1523_v40 = vpop.f32.mrb[36].mxu1 }
 0xb92   :  { %v1481_v44 = vadd.f32 %v1480_v39, %v1206_v49  ;;  %v1524_v45 = vadd.f32 %v1523_v40, %v1214_v54  ;;  %v1482_v46 = vpop.f32.mrb[37].mxu0  ;;  %v1525_v47 = vpop.f32.mrb[37].mxu1 }
 0xb93   :  { %v1483_v48 = vadd.f32 %v1482_v46, %v1210_v32  ;;  %v1526_v50 = vadd.f32 %v1525_v47, %v1218_v35  ;;  %v1484_v51 = vpop.f32.mrb[38].mxu0  ;;  %v1527_v55 = vpop.f32.mrb[38].mxu1  ;;  %v7998_v47 = vld [vmem:[%s10157_s7 + $0x108] sm:$0xff]  }
 0xb94   :  { %v1485_v56 = vadd.f32 %v1484_v51, %v1206_v49  ;;  %v1528_v58 = vadd.f32 %v1527_v55, %v1214_v54  ;;  %v1486_v59 = vpop.f32.mrb[39].mxu0  ;;  %v1529_v60 = vpop.f32.mrb[39].mxu1  ;;  %v1790_v5 = vmax.f32 %v1481_v44, 0.0  ;;  %v1792_v11 = vmax.f32 %v1524_v45, 0.0 }
 0xb95   :  { %v1487_v63 = vadd.f32 %v1486_v59, %v1210_v32  ;;  %v1530_v14 = vadd.f32 %v1529_v60, %v1218_v35  ;;  %v1791_v8 = vmax.f32 %v1483_v48, 0.0  ;;  %v1793_v41 = vmax.f32 %v1526_v50, 0.0  ;;  %v7999_v48 = vld [vmem:[%s10157_s7 + $0x188] sm:$0xff]   ;;  %v8000_v59 = vld [vmem:[%s10157_s7 + $0x150] sm:$0xff]  }
 0xb96   :  { %v1806_v36 = vmax.f32 %v1485_v56, 0.0  ;;  %v1808_v6 = vmax.f32 %v1528_v58, 0.0  ;;  %v1246_v54 = vrot.slane %v8939_v12, %v8905_v33  ;;  %v1242_v44 = vrot.slane %v8939_v12, %v8911_v4  ;;  %v8001_v60 = vld [vmem:[%s10157_s7 + $0x1d0] sm:$0xff]  }
 0xb97   :  { %v1807_v9 = vmax.f32 %v1487_v63, 0.0  ;;  %v1809_v10 = vmax.f32 %v1530_v14, 0.0  ;;  %v1250_v50 = vrot.slane %v8939_v12, %v8914_v34 }
 0xb98   :  { %v1822_v1 = vpack.c.bf16 %v1806_v36, %v1790_v5  ;;  %v1824_v7 = vpack.c.bf16 %v1808_v6, %v1792_v11 }
 0xb99   :  { %v1823_v13 = vpack.c.bf16 %v1807_v9, %v1791_v8  ;;  %v1825_v15 = vpack.c.bf16 %v1809_v10, %v1793_v41  ;;  %v1566_v20 = vpop.f32.mrb[40].mxu0  ;;  %v1609_v21 = vpop.f32.mrb[40].mxu1  ;;  %v8002_v8 = vld [vmem:[%s10157_s7 + $0x110] sm:$0xff]  }
 0xb9a   :  { %v1567_v24 = vadd.f32 %v1566_v20, %v1222_v61  ;;  %v1610_v53 = vadd.f32 %v1609_v21, %v1230_v62  ;;  %v1568_v25 = vpop.f32.mrb[41].mxu0  ;;  %v1611_v16 = vpop.f32.mrb[41].mxu1  ;;  %v8003_v41 = vld [vmem:[%s10157_s7 + $0x190] sm:$0xff]  }
 0xb9b   :  { %v1569_v30 = vadd.f32 %v1568_v25, %v1226_v26  ;;  %v1612_v57 = vadd.f32 %v1611_v16, %v1234_v2  ;;  %v1570_v3 = vpop.f32.mrb[42].mxu0  ;;  %v1613_v49 = vpop.f32.mrb[42].mxu1  ;;  %2901 = vmatprep.mubr.bf16.mxu0 %v1823_v13  ;;  %2942 = vmatprep.mubr.bf16.mxu1 %v1825_v15  ;;  %v8004_v13 = vld [vmem:[%s10157_s7 + $0x158] sm:$0xff]  }
 0xb9c   :  { %v1571_v32 = vadd.f32 %v1570_v3, %v1222_v61  ;;  %v1614_v35 = vadd.f32 %v1613_v49, %v1230_v62  ;;  %v1572_v39 = vpop.f32.mrb[43].mxu0  ;;  %v1615_v40 = vpop.f32.mrb[43].mxu1  ;;  %2902 = vmatmul.mubr.bf16.vlgmr.msra.gmra.mrb[52].mxu0 %v1822_v1  ;;  %2943 = vmatmul.mubr.bf16.vlgmr.msra.gmra.mrb[52].mxu1 %v1824_v7  ;;  %v1794_v51 = vmax.f32 %v1567_v24, 0.0  ;;  %v1796_v55 = vmax.f32 %v1610_v53, 0.0  ;;  %v8005_v15 = vld [vmem:[%s10157_s7 + $0x1d8] sm:$0xff]  }
 0xb9d   :  { %v1573_v45 = vadd.f32 %v1572_v39, %v1226_v26  ;;  %v1616_v46 = vadd.f32 %v1615_v40, %v1234_v2  ;;  %7328 = vmatpush3.bf16.msra.mxu0 %v7994_v22  ;;  %7350 = vmatpush3.bf16.msra.mxu1 %v7995_v23  ;;  %v1795_v61 = vmax.f32 %v1569_v30, 0.0  ;;  %v1797_v62 = vmax.f32 %v1612_v57, 0.0  ;;  %v8006_v49 = vld [vmem:[%s10157_s7 + $0x118] sm:$0xff]  }
 0xb9e   :  { %v1810_v56 = vmax.f32 %v1571_v32, 0.0  ;;  %v1812_v58 = vmax.f32 %v1614_v35, 0.0  ;;  %7329 = vmatprep.subr.bf16.mxu0 %v7996_v27  ;;  %7351 = vmatprep.subr.bf16.mxu1 %v7997_v18  ;;  %v1254_v24 = vrot.slane %v8939_v12, %v8921_v37  ;;  %v1262_v18 = vrot.slane %v8939_v12, %v8924_v38 }
 0xb9f   :  { %v1811_v63 = vmax.f32 %v1573_v45, 0.0  ;;  %v1813_v14 = vmax.f32 %v1616_v46, 0.0  ;;  %v1258_v30 = vrot.slane %v8939_v12, %v8927_v42  ;;  %v8009_v45 = vld [vmem:[%s10157_s7 + $0x1e0] sm:$0xff]  }
 0xba0   :  { %v8973_v26 = vpack.c.bf16 %v1810_v56, %v1794_v51  ;;  %v8975_v2 = vpack.c.bf16 %v1812_v58, %v1796_v55 }
 0xba1   :  { %v1827_v5 = vpack.c.bf16 %v1811_v63, %v1795_v61  ;;  %v1829_v11 = vpack.c.bf16 %v1813_v14, %v1797_v62  ;;  %7330 = vmatpush3.bf16.msra.mxu0 %v7998_v47  ;;  %7352 = vmatpush3.bf16.msra.mxu1 %v7999_v48  ;;  %v1652_v36 = vpop.f32.mrb[44].mxu0  ;;  %v1695_v6 = vpop.f32.mrb[44].mxu1  ;;  %v8011_v61 = vld [vmem:[%s10157_s7 + $0x1a0] sm:$0xff]  }
 0xba2   :  { %v1653_v9 = vadd.f32 %v1652_v36, %v1238_v28  ;;  %v1696_v10 = vadd.f32 %v1695_v6, %v1246_v54  ;;  %v1654_v1 = vpop.f32.mrb[45].mxu0  ;;  %v1697_v7 = vpop.f32.mrb[45].mxu1  ;;  %7331 = vmatprep.subr.bf16.mxu0 %v8000_v59  ;;  %7353 = vmatprep.subr.bf16.mxu1 %v8001_v60  ;;  %v8010_v60 = vld [vmem:[%s10157_s7 + $0x120] sm:$0xff]   ;;  %v8013_v36 = vld [vmem:[%s10157_s7 + $0x1e8] sm:$0xff]  }
 0xba3   :  { %v1655_v20 = vadd.f32 %v1654_v1, %v1242_v44  ;;  %v1698_v21 = vadd.f32 %v1697_v7, %v1250_v50  ;;  %v1656_v22 = vpop.f32.mrb[46].mxu0  ;;  %v1699_v23 = vpop.f32.mrb[46].mxu1  ;;  %2983 = vmatprep.mubr.bf16.mxu0 %v1827_v5  ;;  %3024 = vmatprep.mubr.bf16.mxu1 %v1829_v11  ;;  %v8012_v11 = vld [vmem:[%s10157_s7 + $0x168] sm:$0xff]  }
 0xba4   :  { %v1657_v53 = vadd.f32 %v1656_v22, %v1238_v28  ;;  %v1700_v25 = vadd.f32 %v1699_v23, %v1246_v54  ;;  %v1658_v16 = vpop.f32.mrb[47].mxu0  ;;  %v1701_v27 = vpop.f32.mrb[47].mxu1  ;;  %v8007_v28 = vld [vmem:[%s10157_s7 + $0x198] sm:$0xff]   ;;  %v1266_v54 = vrot.slane %v8939_v12, %v8930_v43  ;;  %v1798_v32 = vmax.f32 %v1653_v9, 0.0  ;;  %v8015_v22 = vld [vmem:[%s10157_s7 + $0x1a8] sm:$0xff]  }
 0xba5   :  { %v1659_v57 = vadd.f32 %v1658_v16, %v1242_v44  ;;  %v1702_v3 = vadd.f32 %v1701_v27, %v1250_v50  ;;  %7332 = vmatpush3.bf16.msra.mxu0 %v8002_v8  ;;  %7354 = vmatpush3.bf16.msra.mxu1 %v8003_v41  ;;  %v1800_v35 = vmax.f32 %v1696_v10, 0.0  ;;  %v8008_v44 = vld [vmem:[%s10157_s7 + $0x160] sm:$0xff]   ;;  %v1799_v46 = vmax.f32 %v1655_v20, 0.0  ;;  %v8017_v27 = vld [vmem:[%s10157_s7 + $0x1f0] sm:$0xff]  }
 0xba6   :  { %v1814_v39 = vmax.f32 %v1657_v53, 0.0  ;;  %v1816_v40 = vmax.f32 %v1700_v25, 0.0  ;;  %7333 = vmatprep.subr.bf16.mxu0 %v8004_v13  ;;  %7355 = vmatprep.subr.bf16.mxu1 %v8005_v15  ;;  %v1801_v47 = vmax.f32 %v1698_v21, 0.0  ;;  %v8014_v21 = vld [vmem:[%s10157_s7 + $0x128] sm:$0xff]  }
 0xba7   :  { %v1815_v48 = vmax.f32 %v1659_v57, 0.0  ;;  %v1817_v50 = vmax.f32 %v1702_v3, 0.0 }
 0xba8   :  { %v9009_v51 = vpack.c.bf16 %v1814_v39, %v1798_v32  ;;  %v9011_v12 = vpack.c.bf16 %v1816_v40, %v1800_v35  ;;  %v8018_v35 = vld [vmem:[%s10157_s7 + $0x130] sm:$0xff]   ;;  %v8020_v40 = vld [vmem:[%s10157_s7 + $0x178] sm:$0xff]  }
 0xba9   :  { %v9013_v55 = vpack.c.bf16 %v1815_v48, %v1799_v46  ;;  %v9015_v56 = vpack.c.bf16 %v1817_v50, %v1801_v47  ;;  %7334 = vmatpush3.bf16.msra.mxu0 %v8006_v49  ;;  %7356 = vmatpush3.bf16.msra.mxu1 %v8007_v28  ;;  %v1738_v58 = vpop.f32.mrb[48].mxu0  ;;  %v1781_v59 = vpop.f32.mrb[48].mxu1  ;;  %v8019_v39 = vld [vmem:[%s10157_s7 + $0x1b0] sm:$0xff]   ;;  %v8023_v46 = vld [vmem:[%s10157_s7 + $0x1b8] sm:$0xff]   ;;  %v8024_v47 = vld [vmem:[%s10157_s7 + $0x240] sm:$0xff]  }
 0xbaa   :  { %v1739_v62 = vadd.f32 %v1738_v58, %v1254_v24  ;;  %v1782_v63 = vadd.f32 %v1781_v59, %v1262_v18  ;;  %v1740_v14 = vpop.f32.mrb[49].mxu0  ;;  %v1783_v5 = vpop.f32.mrb[49].mxu1  ;;  %7335 = vmatprep.subr.bf16.mxu0 %v8008_v44  ;;  %7357 = vmatprep.subr.bf16.mxu1 %v8009_v45  ;;  %v8021_v44 = vld [vmem:[%s10157_s7 + $0x1f8] sm:$0xff]   ;;  %v8025_v48 = vld [vmem:[%s10157_s7 + $0x2c0] sm:$0xff]   ;;  %v8028_v59 = vld [vmem:[%s10157_s7 + $0x248] sm:$0xff]  }
 0xbab   :  { %v1741_v6 = vadd.f32 %v1740_v14, %v1258_v30  ;;  %v1784_v8 = vadd.f32 %v1783_v5, %v1266_v54  ;;  %v1742_v41 = vpop.f32.mrb[50].mxu0  ;;  %v1785_v9 = vpop.f32.mrb[50].mxu1  ;;  %v8022_v45 = vld [vmem:[%s10157_s7 + $0x138] sm:$0xff]   ;;  %v8026_v50 = vld [vmem:[%s10157_s7 + $0x200] sm:$0xff]  }
 0xbac   :  { %v1743_v10 = vadd.f32 %v1742_v41, %v1254_v24  ;;  %v1786_v1 = vadd.f32 %v1785_v9, %v1262_v18  ;;  %v1744_v7 = vpop.f32.mrb[51].mxu0  ;;  %v1787_v13 = vpop.f32.mrb[51].mxu1  ;;  %v1802_v23 = vmax.f32 %v1739_v62, 0.0  ;;  %v1804_v53 = vmax.f32 %v1782_v63, 0.0  ;;  %v8016_v24 = vld [vmem:[%s10157_s7 + $0x170] sm:$0xff]   ;;  %v8027_v58 = vld [vmem:[%s10157_s7 + $0x280] sm:$0xff]  }
 0xbad   :  { %v1745_v15 = vadd.f32 %v1744_v7, %v1258_v30  ;;  %v1788_v20 = vadd.f32 %v1787_v13, %v1266_v54  ;;  %7336 = vmatpush3.bf16.msra.mxu0 %v8010_v60  ;;  %7358 = vmatpush3.bf16.msra.mxu1 %v8011_v61  ;;  %v1803_v18 = vmax.f32 %v1741_v6, 0.0  ;;  %v1805_v30 = vmax.f32 %v1784_v8, 0.0  ;;  %v8029_v60 = vld [vmem:[%s10157_s7 + $0x2c8] sm:$0xff]   ;;  %v8036_v63 = vld [vmem:[%s10157_s7 + $0x258] sm:$0xff]   ;;  %v8041_v6 = vld [vmem:[%s10157_s7 + $0x2e0] sm:$0xff]  }
 0xbae   :  { %v1818_v25 = vmax.f32 %v1743_v10, 0.0  ;;  %v1820_v16 = vmax.f32 %v1786_v1, 0.0  ;;  %7337 = vmatprep.subr.bf16.mxu0 %v8012_v11  ;;  %7359 = vmatprep.subr.bf16.mxu1 %v8013_v36  ;;  %v8030_v61 = vld [vmem:[%s10157_s7 + $0x208] sm:$0xff]   ;;  %v8037_v14 = vld [vmem:[%s10157_s7 + $0x2d8] sm:$0xff]   ;;  %v8040_v36 = vld [vmem:[%s10157_s7 + $0x260] sm:$0xff]  }
 0xbaf   :  { %v1819_v57 = vmax.f32 %v1745_v15, 0.0  ;;  %v1821_v3 = vmax.f32 %v1788_v20, 0.0  ;;  %v8031_v62 = vld [vmem:[%s10157_s7 + $0x288] sm:$0xff]   ;;  %v8038_v5 = vld [vmem:[%s10157_s7 + $0x218] sm:$0xff]   ;;  %v8042_v8 = vld [vmem:[%s10157_s7 + $0x220] sm:$0xff]  }
 0xbb0   :  { %v9041_v49 = vpack.c.bf16 %v1818_v25, %v1802_v23  ;;  %v9043_v28 = vpack.c.bf16 %v1820_v16, %v1804_v53  ;;  %v8039_v11 = vld [vmem:[%s10157_s7 + $0x298] sm:$0xff]   ;;  %v8043_v41 = vld [vmem:[%s10157_s7 + $0x2a0] sm:$0xff]   ;;  %v8044_v9 = vld [vmem:[%s10157_s7 + $0x268] sm:$0xff]  }
 0xbb1   :  { %v9045_v54 = vpack.c.bf16 %v1819_v57, %v1803_v18  ;;  %v9047_v32 = vpack.c.bf16 %v1821_v3, %v1805_v30  ;;  %7338 = vmatpush3.bf16.msra.mxu0 %v8014_v21  ;;  %7360 = vmatpush3.bf16.msra.mxu1 %v8015_v22  ;;  %v8045_v10 = vld [vmem:[%s10157_s7 + $0x2e8] sm:$0xff]   ;;  %v8048_v13 = vld [vmem:[%s10157_s7 + $0x270] sm:$0xff]   ;;  %v8052_v22 = vld [vmem:[%s10157_s7 + $0x278] sm:$0xff]  }
 0xbb2   :  { %7339 = vmatprep.subr.bf16.mxu0 %v8016_v24  ;;  %7361 = vmatprep.subr.bf16.mxu1 %v8017_v27  ;;  %v8046_v1 = vld [vmem:[%s10157_s7 + $0x228] sm:$0xff]   ;;  %v8049_v15 = vld [vmem:[%s10157_s7 + $0x2f0] sm:$0xff]   ;;  %v8053_v23 = vld [vmem:[%s10157_s7 + $0x2f8] sm:$0xff]  }
 0xbb3   :  { %v8047_v7 = vld [vmem:[%s10157_s7 + $0x2a8] sm:$0xff]   ;;  %v8050_v20 = vld [vmem:[%s10157_s7 + $0x230] sm:$0xff]   ;;  %v8054_v53 = vld [vmem:[%s10157_s7 + $0x238] sm:$0xff]  }
 0xbb4   :  { %v8051_v21 = vld [vmem:[%s10157_s7 + $0x2b0] sm:$0xff]   ;;  %v8055_v25 = vld [vmem:[%s10157_s7 + $0x2b8] sm:$0xff]   ;;  %v8056_v16 = vld [vmem:[%s10157_s7 + $0x340] sm:$0xff]  }
 0xbb5   :  { %7340 = vmatpush3.bf16.msra.mxu0 %v8018_v35  ;;  %7362 = vmatpush3.bf16.msra.mxu1 %v8019_v39  ;;  %v8057_v24 = vld [vmem:[%s10157_s7 + $0x3c0] sm:$0xff]   ;;  %v8060_v30 = vld [vmem:[%s10157_s7 + $0x348] sm:$0xff]   ;;  %v8067_v39 = vld [vmem:[%s10157_s7 + $0x390] sm:$0xff]  }
 0xbb6   :  { %7341 = vmatprep.subr.bf16.mxu0 %v8020_v40  ;;  %7363 = vmatprep.subr.bf16.mxu1 %v8021_v44  ;;  %v8058_v27 = vld [vmem:[%s10157_s7 + $0x300] sm:$0xff]   ;;  %v8061_v57 = vld [vmem:[%s10157_s7 + $0x3c8] sm:$0xff]   ;;  %v8069_v40 = vld [vmem:[%s10157_s7 + $0x3d8] sm:$0xff]  }
 0xbb7   :  { %v8059_v18 = vld [vmem:[%s10157_s7 + $0x380] sm:$0xff]   ;;  %v8062_v3 = vld [vmem:[%s10157_s7 + $0x308] sm:$0xff]   ;;  %v8070_v44 = vld [vmem:[%s10157_s7 + $0x318] sm:$0xff]  }
 0xbb8   :  { %v8063_v35 = vld [vmem:[%s10157_s7 + $0x388] sm:$0xff]  }
 0xbb9   :  { %7342 = vmatpush3.bf16.msra.mxu0 %v8022_v45  ;;  %7364 = vmatpush3.bf16.msra.mxu1 %v8023_v46  ;;  %v8071_v45 = vld [vmem:[%s10157_s7 + $0x398] sm:$0xff]   ;;  %v8072_v46 = vld [vmem:[%s10157_s7 + $0x360] sm:$0xff]  }
 0xbba   :  { %7371 = vmatprep.subr.bf16.mxu0 %v8024_v47  ;;  %7393 = vmatprep.subr.bf16.mxu1 %v8025_v48  ;;  %v8073_v47 = vld [vmem:[%s10157_s7 + $0x3e0] sm:$0xff]  }
 0xbbb   :  { %v8074_v48 = vld [vmem:[%s10157_s7 + $0x320] sm:$0xff]  }
 0xbbc   :  { %2984 = vmatmul.mubr.bf16.vlgmr.msra.gmra.mrb[56].mxu0 %v8973_v26  ;;  %3025 = vmatmul.mubr.bf16.vlgmr.msra.gmra.mrb[56].mxu1 %v8975_v2  ;;  %v8032_v26 = vld [vmem:[%s10157_s7 + $0x250] sm:$0xff]  }
 0xbbd   :  { %7372 = vmatpush3.bf16.msra.mxu0 %v8026_v50  ;;  %3065 = vmatprep.mubr.bf16.mxu0 %v9013_v55  ;;  %v8033_v2 = vld [vmem:[%s10157_s7 + $0x2d0] sm:$0xff]   ;;  %v8075_v50 = vld [vmem:[%s10157_s7 + $0x3a0] sm:$0xff]  }
 0xbbe   :  { %7394 = vmatpush3.bf16.msra.mxu1 %v8027_v58  ;;  %3106 = vmatprep.mubr.bf16.mxu1 %v9015_v56  ;;  %v8034_v55 = vld [vmem:[%s10157_s7 + $0x210] sm:$0xff]   ;;  %v8076_v58 = vld [vmem:[%s10157_s7 + $0x368] sm:$0xff]  }
 0xbbf   :  { %7373 = vmatprep.subr.bf16.mxu0 %v8028_v59  ;;  %7395 = vmatprep.subr.bf16.mxu1 %v8029_v60  ;;  %v8035_v56 = vld [vmem:[%s10157_s7 + $0x290] sm:$0xff]   ;;  %v8077_v59 = vld [vmem:[%s10157_s7 + $0x3e8] sm:$0xff]  }
 0xbc0   :  { %v8078_v60 = vld [vmem:[%s10157_s7 + $0x328] sm:$0xff]  }
 0xbc1   :  { %7374 = vmatpush3.bf16.msra.mxu0 %v8030_v61  ;;  %v8079_v61 = vld [vmem:[%s10157_s7 + $0x3a8] sm:$0xff]  }
 0xbc2   :  { %7396 = vmatpush3.bf16.msra.mxu1 %v8031_v62  ;;  %7375 = vmatprep.subr.bf16.mxu0 %v8032_v26  ;;  %v8080_v62 = vld [vmem:[%s10157_s7 + $0x370] sm:$0xff]  }
 0xbc3   :  { %7397 = vmatprep.subr.bf16.mxu1 %v8033_v2  ;;  %v8081_v26 = vld [vmem:[%s10157_s7 + $0x3f0] sm:$0xff]  }
 0xbc4   :  { %v8082_v2 = vld [vmem:[%s10157_s7 + $0x330] sm:$0xff]  }
 0xbc5   :  { %7376 = vmatpush3.bf16.msra.mxu0 %v8034_v55  ;;  %v8083_v55 = vld [vmem:[%s10157_s7 + $0x3b0] sm:$0xff]  }
 0xbc6   :  { %7398 = vmatpush3.bf16.msra.mxu1 %v8035_v56  ;;  %7377 = vmatprep.subr.bf16.mxu0 %v8036_v63  ;;  %v8084_v56 = vld [vmem:[%s10157_s7 + $0x378] sm:$0xff]  }
 0xbc7   :  { %7399 = vmatprep.subr.bf16.mxu1 %v8037_v14  ;;  %v8085_v63 = vld [vmem:[%s10157_s7 + $0x3f8] sm:$0xff]  }
 0xbc8   :  { %v8086_v14 = vld [vmem:[%s10157_s7 + $0x338] sm:$0xff]  }
 0xbc9   :  { %7378 = vmatpush3.bf16.msra.mxu0 %v8038_v5  ;;  %v8087_v5 = vld [vmem:[%s10157_s7 + $0x3b8] sm:$0xff]  }
 0xbca   :  { %7400 = vmatpush3.bf16.msra.mxu1 %v8039_v11  ;;  %7379 = vmatprep.subr.bf16.mxu0 %v8040_v36 }
 0xbcb   :  { %7401 = vmatprep.subr.bf16.mxu1 %v8041_v6  ;;  %v6607_v6 = vld [vmem:[%s10161_s8] ss:$0 sm:$0xff] }
 0xbcd   :  { %7380 = vmatpush3.bf16.msra.mxu0 %v8042_v8 }
 0xbce   :  { %7402 = vmatpush3.bf16.msra.mxu1 %v8043_v41  ;;  %7381 = vmatprep.subr.bf16.mxu0 %v8044_v9 }
 0xbcf   :  { %7403 = vmatprep.subr.bf16.mxu1 %v8045_v10 }
 0xbd1   :  { %7382 = vmatpush3.bf16.msra.mxu0 %v8046_v1 }
 0xbd2   :  { %7404 = vmatpush3.bf16.msra.mxu1 %v8047_v7  ;;  %7383 = vmatprep.subr.bf16.mxu0 %v8048_v13 }
 0xbd3   :  { %7405 = vmatprep.subr.bf16.mxu1 %v8049_v15 }
 0xbd5   :  { %7384 = vmatpush3.bf16.msra.mxu0 %v8050_v20 }
 0xbd6   :  { %7406 = vmatpush3.bf16.msra.mxu1 %v8051_v21  ;;  %7385 = vmatprep.subr.bf16.mxu0 %v8052_v22 }
 0xbd7   :  { %7407 = vmatprep.subr.bf16.mxu1 %v8053_v23 }
 0xbd9   :  { %7386 = vmatpush3.bf16.msra.mxu0 %v8054_v53 }
 0xbda   :  { %7408 = vmatpush3.bf16.msra.mxu1 %v8055_v25  ;;  %7415 = vmatprep.subr.bf16.mxu0 %v8056_v16 }
 0xbdb   :  { %7437 = vmatprep.subr.bf16.mxu1 %v8057_v24 }
 0xbdc   :  { %3066 = vmatmul.mubr.bf16.vlgmr.msra.gmra.mrb[60].mxu0 %v9009_v51  ;;  %v8064_v51 = vld [vmem:[%s10157_s7 + $0x350] sm:$0xff]  }
 0xbdd   :  { %3107 = vmatmul.mubr.bf16.vlgmr.msra.gmra.mrb[60].mxu1 %v9011_v12  ;;  %7416 = vmatpush3.bf16.msra.mxu0 %v8058_v27  ;;  %v8065_v12 = vld [vmem:[%s10157_s7 + $0x3d0] sm:$0xff]  }
 0xbde   :  { %3147 = vmatprep.mubr.bf16.mxu0 %v9045_v54  ;;  %7438 = vmatpush3.bf16.msra.mxu1 %v8059_v18  ;;  %v8066_v54 = vld [vmem:[%s10157_s7 + $0x310] sm:$0xff]  }
 0xbdf   :  { %3188 = vmatprep.mubr.bf16.mxu1 %v9047_v32  ;;  %7417 = vmatprep.subr.bf16.mxu0 %v8060_v30  ;;  %v8068_v32 = vld [vmem:[%s10157_s7 + $0x358] sm:$0xff]  }
 0xbe0   :  { %7439 = vmatprep.subr.bf16.mxu1 %v8061_v57 }
 0xbe1   :  { %7418 = vmatpush3.bf16.msra.mxu0 %v8062_v3 }
 0xbe2   :  { %7440 = vmatpush3.bf16.msra.mxu1 %v8063_v35  ;;  %7419 = vmatprep.subr.bf16.mxu0 %v8064_v51 }
 0xbe3   :  { %7441 = vmatprep.subr.bf16.mxu1 %v8065_v12 }
 0xbe5   :  { %7420 = vmatpush3.bf16.msra.mxu0 %v8066_v54 }
 0xbe6   :  { %7442 = vmatpush3.bf16.msra.mxu1 %v8067_v39  ;;  %7421 = vmatprep.subr.bf16.mxu0 %v8068_v32 }
 0xbe7   :  { %7443 = vmatprep.subr.bf16.mxu1 %v8069_v40 }
 0xbe9   :  { %7422 = vmatpush3.bf16.msra.mxu0 %v8070_v44 }
 0xbea   :  { %7444 = vmatpush3.bf16.msra.mxu1 %v8071_v45  ;;  %7423 = vmatprep.subr.bf16.mxu0 %v8072_v46 }
 0xbeb   :  { %7445 = vmatprep.subr.bf16.mxu1 %v8073_v47 }
 0xbed   :  { %7424 = vmatpush3.bf16.msra.mxu0 %v8074_v48 }
 0xbee   :  { %7446 = vmatpush3.bf16.msra.mxu1 %v8075_v50  ;;  %7425 = vmatprep.subr.bf16.mxu0 %v8076_v58 }
 0xbef   :  { %7447 = vmatprep.subr.bf16.mxu1 %v8077_v59 }
 0xbf1   :  { %7426 = vmatpush3.bf16.msra.mxu0 %v8078_v60 }
 0xbf2   :  { %7448 = vmatpush3.bf16.msra.mxu1 %v8079_v61  ;;  %7427 = vmatprep.subr.bf16.mxu0 %v8080_v62 }
 0xbf3   :  { %7449 = vmatprep.subr.bf16.mxu1 %v8081_v26 }
 0xbf5   :  { %7428 = vmatpush3.bf16.msra.mxu0 %v8082_v2 }
 0xbf6   :  { %7450 = vmatpush3.bf16.msra.mxu1 %v8083_v55  ;;  %7429 = vmatprep.subr.bf16.mxu0 %v8084_v56 }
 0xbf7   :  { %7451 = vmatprep.subr.bf16.mxu1 %v8085_v63 }
 0xbf9   :  { %7430 = vmatpush3.bf16.msra.mxu0 %v8086_v14 }
 0xbfa   :  { %7452 = vmatpush3.bf16.msra.mxu1 %v8087_v5  ;;  %7788 = vmatprep.subr.bf16.mxu0 %v8306_v0 }
 0xbfb   :  { %7796 = vmatprep.subr.bf16.mxu1 %v8306_v0 }
 0xbfc   :  { %3148 = vmatmul.mubr.bf16.vlgmr.msra.gmra.mrb[64].mxu0 %v9041_v49 }
 0xbfd   :  { %3189 = vmatmul.mubr.bf16.vlgmr.msra.gmra.mrb[64].mxu1 %v9043_v28  ;;  %7792 = vmatprep.mubr.msk.bf16.mxu0 %vm8307_vm0, %v8306_v0 }
 0xbfe   :  { %7798 = vmatprep.mubr.msk.bf16.mxu1 %vm8307_vm0, %v8306_v0 }
 0xc6f   :  { %v7299_v11 = vpop.f32.mrb[52].mxu0  ;;  %v7321_v36 = vpop.f32.mrb[52].mxu1 }
 0xc70   :  { %v7300_v8 = vpop.f32.mrb[53].mxu0  ;;  %v7322_v41 = vpop.f32.mrb[53].mxu1 }
 0xc71   :  { %v7301_v9 = vadd.f32 %v7300_v8, %v7299_v11  ;;  %v7323_v10 = vadd.f32 %v7322_v41, %v7321_v36  ;;  %v7302_v1 = vpop.f32.mrb[54].mxu0  ;;  %v7324_v49 = vpop.f32.mrb[54].mxu1 }
 0xc72   :  { %v7303_v7 = vpop.f32.mrb[55].mxu0  ;;  %v7325_v28 = vpop.f32.mrb[55].mxu1 }
 0xc73   :  { %v2904_v13 = vadd.f32 %v7301_v9, %v6607_v6  ;;  %v7304_v15 = vadd.f32 %v7303_v7, %v7302_v1  ;;  %v7326_v20 = vadd.f32 %v7325_v28, %v7324_v49 }
 0xc75   :  { %v2945_v21 = vadd.f32 %v7323_v10, %v2904_v13  ;;  %v2907_v22 = vadd.f32 %v7304_v15, %v6607_v6 }
 0xc77   :  { %v2948_v23 = vadd.f32 %v7326_v20, %v2907_v22 }
 0xc8f   :  { %v7343_v53 = vpop.f32.mrb[56].mxu0  ;;  %v7365_v25 = vpop.f32.mrb[56].mxu1 }
 0xc90   :  { %v7344_v16 = vpop.f32.mrb[57].mxu0  ;;  %v7366_v24 = vpop.f32.mrb[57].mxu1 }
 0xc91   :  { %v7345_v27 = vadd.f32 %v7344_v16, %v7343_v53  ;;  %v7367_v18 = vadd.f32 %v7366_v24, %v7365_v25  ;;  %v7346_v30 = vpop.f32.mrb[58].mxu0  ;;  %v7368_v57 = vpop.f32.mrb[58].mxu1 }
 0xc92   :  { %v7347_v3 = vpop.f32.mrb[59].mxu0  ;;  %v7369_v35 = vpop.f32.mrb[59].mxu1 }
 0xc93   :  { %v2986_v51 = vadd.f32 %v7345_v27, %v2945_v21  ;;  %v7348_v12 = vadd.f32 %v7347_v3, %v7346_v30  ;;  %v7370_v54 = vadd.f32 %v7369_v35, %v7368_v57 }
 0xc95   :  { %v3027_v39 = vadd.f32 %v7367_v18, %v2986_v51  ;;  %v2989_v32 = vadd.f32 %v7348_v12, %v2948_v23  ;;  %v8089_v51 = vld [vmem:[%s10185_s23 + $0x18] sm:$0xff]  }
 0xc97   :  { %v3030_v40 = vadd.f32 %v7370_v54, %v2989_v32 }
 0xcaf   :  { %v7387_v44 = vpop.f32.mrb[60].mxu0 }
 0xcb0   :  { %v7409_v45 = vpop.f32.mrb[60].mxu1  ;;  %v7388_v46 = vpop.f32.mrb[61].mxu0 }
 0xcb1   :  { %v7389_v47 = vadd.f32 %v7388_v46, %v7387_v44  ;;  %v7410_v48 = vpop.f32.mrb[61].mxu1  ;;  %v7390_v50 = vpop.f32.mrb[62].mxu0  ;;  %v6736_v46 = vld [vmem:[%s10162_s11] ss:$0 sm:$0xff] }
 0xcb2   :  { %v7411_v58 = vadd.f32 %v7410_v48, %v7409_v45  ;;  %v7412_v59 = vpop.f32.mrb[62].mxu1  ;;  %v7391_v60 = vpop.f32.mrb[63].mxu0 }
 0xcb3   :  { %v3068_v61 = vadd.f32 %v7389_v47, %v3027_v39  ;;  %v7392_v62 = vadd.f32 %v7391_v60, %v7390_v50  ;;  %v7413_v26 = vpop.f32.mrb[63].mxu1 }
 0xcb4   :  { %v7414_v2 = vadd.f32 %v7413_v26, %v7412_v59  ;;  %v6737_v59 = vld [vmem:[%s10163_s12] ss:$0 sm:$0xff] }
 0xcb5   :  { %v3109_v55 = vadd.f32 %v7411_v58, %v3068_v61  ;;  %v3071_v56 = vadd.f32 %v7392_v62, %v3030_v40 }
 0xcb7   :  { %v3112_v63 = vadd.f32 %v7414_v2, %v3071_v56  ;;  %v6743_v2 = vld [vmem:[%s10153_s2 + $0x1] ss:$0 sm:$0xff]  ;;  %s10186_s2 = smov 80  }
 0xccf   :  { %v7431_v14 = vpop.f32.mrb[64].mxu0 }
 0xcd0   :  { %v7453_v5 = vpop.f32.mrb[64].mxu1  ;;  %v7432_v11 = vpop.f32.mrb[65].mxu0 }
 0xcd1   :  { %v7433_v36 = vadd.f32 %v7432_v11, %v7431_v14  ;;  %v7454_v6 = vpop.f32.mrb[65].mxu1  ;;  %v7434_v8 = vpop.f32.mrb[66].mxu0 }
 0xcd2   :  { %v7455_v41 = vadd.f32 %v7454_v6, %v7453_v5  ;;  %v7456_v9 = vpop.f32.mrb[66].mxu1  ;;  %v7435_v10 = vpop.f32.mrb[67].mxu0 }
 0xcd3   :  { %v3150_v1 = vadd.f32 %v7433_v36, %v3109_v55  ;;  %v7436_v49 = vadd.f32 %v7435_v10, %v7434_v8  ;;  %v7457_v7 = vpop.f32.mrb[67].mxu1 }
 0xcd4   :  { %v7458_v28 = vadd.f32 %v7457_v7, %v7456_v9 }
 0xcd5   :  { %v3191_v13 = vadd.f32 %v7455_v41, %v3150_v1  ;;  %v3153_v15 = vadd.f32 %v7436_v49, %v3112_v63 }
 0xcd7   :  { %v3194_v20 = vadd.f32 %v7458_v28, %v3153_v15  ;;  %v3197_v21 = vadd.f32 %v3191_v13, %v8721_v17 }
 0xcd9   :  { %v3201_v22 = vsel %vm86_vm1, %v3197_v21, 0.0  ;;  %v3198_v23 = vadd.f32 %v3194_v20, %v8723_v19  ;;  %v8088_v19 = vld [vmem:[%s10185_s23 + $0x10] sm:$0xff]  }
 0xcda   :  { %3202 = vadd.xlane.f32.xlu1 %v3201_v22  ;;  %7789 = vmatpush3.bf16.msra.mxu0 %v8088_v19 }
 0xcdb   :  { %v3204_v53 = vsel %vm86_vm1, %v3198_v23, 0.0  ;;  %7790 = vmatprep.subr.bf16.mxu0 %v8306_v0 }
 0xcdc   :  { %3205 = vadd.xlane.f32.xlu0 %v3204_v53 }
 0xcde   :  { %7791 = vmatpush3.bf16.msra.mxu0 %v8089_v51 }
 0xcdf   :  { %7802 = vmatprep.subr.bf16.mxu0 %v8306_v0 }
 0xd67   :  { %v3203_v25 = vpop.xlane.xlu1 %3202 }
 0xd68   :  { %v3207_v16 = vmul.f32 0.03125, %v3203_v25 }
 0xd69   :  { %v3206_v24 = vpop.xlane.xlu0 %3205 }
 0xd6a   :  { %v3209_v27 = vsub.f32 %v3197_v21, %v3207_v16  ;;  %v3208_v18 = vmul.f32 0.03125, %v3206_v24 }
 0xd6c   :  { %v3210_v30 = vsub.f32 %v3198_v23, %v3208_v18  ;;  %v3211_v57 = vmul.f32 %v3209_v27, %v3209_v27 }
 0xd6e   :  { %v3213_v3 = vsel %vm86_vm1, %v3211_v57, 0.0  ;;  %v3212_v35 = vmul.f32 %v3210_v30, %v3210_v30 }
 0xd6f   :  { %3214 = vadd.xlane.f32.xlu1 %v3213_v3 }
 0xd70   :  { %v3216_v17 = vsel %vm86_vm1, %v3212_v35, 0.0 }
 0xd71   :  { %3217 = vadd.xlane.f32.xlu0 %v3216_v17 }
 0xdfc   :  { %v3215_v12 = vpop.xlane.xlu1 %3214 }
 0xdfd   :  { %v3219_v54 = vmul.f32 0.03125, %v3215_v12 }
 0xdfe   :  { %v3218_v39 = vpop.xlane.xlu0 %3217 }
 0xdff   :  { %v3221_v32 = vadd.f32 1e-05, %v3219_v54  ;;  %v3220_v40 = vmul.f32 0.03125, %v3218_v39 }
 0xe01   :  { %8258 = vrsqrt.f32 %v3221_v32  ;;  %v3222_v44 = vadd.f32 1e-05, %v3220_v40 }
 0xe03   :  { %8260 = vrsqrt.f32 %v3222_v44 }
 0xe0b   :  { %v8259_v45 = vpop.eup %8258 }
 0xe0c   :  { %v3225_v47 = vmul.f32 %v8259_v45, %v3209_v27 }
 0xe0d   :  { %v8261_v48 = vpop.eup %8260 }
 0xe0e   :  { %v3233_v50 = vmul.f32 %v6736_v46, %v3225_v47  ;;  %v3226_v58 = vmul.f32 %v8261_v48, %v3210_v30 }
 0xe10   :  { %v3234_v60 = vmul.f32 %v6736_v46, %v3226_v58  ;;  %v9298_v61 = vadd.f32 %v6737_v59, %v3233_v50 }
 0xe12   :  { %v9300_v62 = vadd.f32 %v6737_v59, %v3234_v60 }
 0xe14   :  { %v3243_v26 = vpack.c.bf16 %v9300_v62, %v9298_v61 }
 0xe16   :  { %7793 = vmatmul.mubr.msk.bf16.vlgmr.msra.gmra.mrb[68].mxu0 %vm86_vm1, %v3243_v26 }
 0xe17   :  { %7804 = vmatprep.mubr.msk.bf16.mxu0 %vm8307_vm0, %v8306_v0 }
 0xee9   :  { %v3306_v55 = vpop.f32.mrb[68].mxu0 }
 0xeea   :  { %v3307_v56 = vadd.f32 %v6743_v2, %v3306_v55  ;;  %v7794_v63 = vpop.f32.mrb[69].mxu0 }
 0xeeb   :  { %v3309_v14 = vpop.f32.mrb[70].mxu0 }
 0xeec   :  { %v9310_v5 = vpack.c.bf16 %v3307_v56, %v3307_v56  ;;  %v3310_v11 = vadd.f32 %v6743_v2, %v3309_v14  ;;  %v7795_v36 = vpop.f32.mrb[71].mxu0  ;;  %v3313_v10 = vmul.f32 0.35355338, %v3307_v56 }
 0xeee   :  { %v9312_v6 = vpack.c.bf16 %v3310_v11, %v3310_v11  ;;  %3320 = vrot.lane.b32.xlu1 %v9310_v5, %s8308_s0  ;;  %v3314_v49 = vmul.f32 0.35355338, %v3310_v11  ;;  %v9324_v28 = vpack.c.bf16 %v3313_v10, %v3313_v10 }
 0xef0   :  { %3369 = vrot.lane.b32.xlu0 %v9312_v6, %s8308_s0  ;;  %v9326_v13 = vpack.c.bf16 %v3314_v49, %v3314_v49  ;;  %s10187_s0 = smov 112  }
 0xef2   :  { %3437 = vrot.lane.b32.xlu1 %v9310_v5, %s8309_s17 }
 0xf60   :  { %v3321_v8 = vpop.permute.xlu1 %3320 }
 0xf61   :  { %v3326_v41 = vsel %vm140_vm2, %v3321_v8, 0 }
 0xf62   :  { %7797 = vmatpush3.bf16.xpose.msra.mxu1 %v3326_v41  ;;  %v3370_v9 = vpop.permute.xlu0 %3369 }
 0xf63   :  { %v3375_v1 = vsel %vm140_vm2, %v3370_v9, 0  ;;  %7808 = vmatprep.subr.bf16.mxu1 %v8306_v0 }
 0xf64   :  { %7803 = vmatpush3.bf16.xpose.msra.mxu0 %v3375_v1  ;;  %v3438_v7 = vpop.permute.xlu1 %3437 }
 0xf65   :  { %7814 = vmatprep.subr.bf16.mxu0 %v8306_v0  ;;  %v3443_v15 = vsel %vm261_vm3, %v3438_v7, 0 }
 0xf69   :  { %7799 = vmatmul.mubr.msk.bf16.vlgmr.msra.gmra.mrb[68].mxu1 %vm140_vm2, %v9324_v28 }
 0xf6a   :  { %7809 = vmatpush3.bf16.msra.mxu1 %v3443_v15  ;;  %7810 = vmatprep.mubr.msk.bf16.mxu1 %vm8307_vm0, %v8306_v0 }
 0xf6b   :  { %7805 = vmatmul.mubr.msk.bf16.vlgmr.msra.gmra.mrb[72].mxu0 %vm140_vm2, %v9326_v13  ;;  %7820 = vmatprep.subr.bf16.mxu1 %v8306_v0 }
 0xf6c   :  { %7816 = vmatprep.mubr.msk.bf16.mxu0 %vm8307_vm0, %v8306_v0 }
0x103c   :  { %v3362_v20 = vpop.f32.mrb[68].mxu1 }
0x103d   :  { %v3363_v21 = vadd.f32 %v3362_v20, %v8482_v29  ;;  %v7800_v22 = vpop.f32.mrb[69].mxu1 }
0x103e   :  { %v3365_v23 = vpop.f32.mrb[70].mxu1  ;;  %v3411_v53 = vpop.f32.mrb[72].mxu0 }
0x103f   :  { %v3412_v25 = vadd.f32 %v3411_v53, %v8482_v29  ;;  %v7801_v16 = vpop.f32.mrb[71].mxu1  ;;  %v7806_v24 = vpop.f32.mrb[73].mxu0  ;;  %v3417_v27 = vsel %vm140_vm2, %v3363_v21, -inf }
0x1040   :  { %3418 = vmax.xlane.f32.xlu1 %v3417_v27  ;;  %v3414_v18 = vpop.f32.mrb[74].mxu0 }
0x1041   :  { %v7807_v30 = vpop.f32.mrb[75].mxu0  ;;  %v3420_v57 = vsel %vm140_vm2, %v3412_v25, -inf }
0x1042   :  { %3421 = vmax.xlane.f32.xlu0 %v3420_v57 }
0x1051   :  { %3540 = vrot.lane.b32.xlu1 %v9310_v5, %s8310_s18 }
0x1055   :  { %3591 = vrot.lane.b32.xlu1 %v9312_v6, %s8310_s18  ;;  %s10189_s18 = smov 72  }
0x1058   :  { %3485 = vrot.lane.b32.xlu0 %v9312_v6, %s8309_s17  ;;  %s10188_s17 = smov 48  }
0x1059   :  { %3589 = vrot.lane.b32.xlu1 %v9326_v13, %s8311_s19 }
0x105c   :  { %3538 = vrot.lane.b32.xlu0 %v9324_v28, %s8311_s19  ;;  %s10190_s19 = smov 104  }
0x105d   :  { %3707 = vrot.lane.b32.xlu1 %v9312_v6, %s8312_s20 }
0x1060   :  { %3659 = vrot.lane.b32.xlu0 %v9310_v5, %s8312_s20  ;;  %s10191_s20 = smov 40  }
0x10cd   :  { %v3419_v3 = vpop.xlane.xlu1 %3418 }
0x10ce   :  { %v3423_v35 = vsub.f32 %v3363_v21, %v3419_v3 }
0x10cf   :  { %v3422_v17 = vpop.xlane.xlu0 %3421 }
0x10d0   :  { %v3425_v19 = vmul.f32 1.442695, %v3423_v35  ;;  %v3424_v51 = vsub.f32 %v3412_v25, %v3422_v17 }
0x10d1   :  { %v3541_v39 = vpop.permute.xlu1 %3540 }
0x10d2   :  { %8262 = vpow2.f32 %v3425_v19  ;;  %v3427_v12 = vmul.f32 1.442695, %v3424_v51  ;;  %v3546_v48 = vsel %vm140_vm2, %v3541_v39, 0 }
0x10d3   :  { %v3486_v54 = vpop.permute.xlu0 %3485 }
0x10d4   :  { %8264 = vpow2.f32 %v3427_v12  ;;  %v3491_v32 = vsel %vm261_vm3, %v3486_v54, 0 }
0x10d5   :  { %7815 = vmatpush3.bf16.msra.mxu0 %v3491_v32  ;;  %v3592_v40 = vpop.permute.xlu1 %3591 }
0x10d6   :  { %7826 = vmatprep.subr.bf16.mxu0 %v8306_v0  ;;  %v3597_v59 = vsel %vm140_vm2, %v3592_v40, 0 }
0x10d7   :  { %v3539_v47 = vpop.permute.xlu0 %3538 }
0x10d9   :  { %v3590_v58 = vpop.permute.xlu1 %3589 }
0x10db   :  { %v3660_v60 = vpop.permute.xlu0 %3659 }
0x10dc   :  { %v9358_v44 = vpop.eup %8262  ;;  %v3665_v2 = vsel %vm261_vm3, %v3660_v60, 0 }
0x10dd   :  { %v3435_v45 = vpack.c.bf16 %v9358_v44, %v9358_v44  ;;  %v3708_v26 = vpop.permute.xlu1 %3707 }
0x10de   :  { %v9362_v46 = vpop.eup %8264  ;;  %v3713_v55 = vsel %vm261_vm3, %v3708_v26, 0 }
0x10df   :  { %7811 = vmatmul.mubr.msk.bf16.vlgmr.msra.gmra.mrb[72].mxu1 %vm140_vm2, %v3435_v45  ;;  %v3436_v50 = vpack.c.bf16 %v9362_v46, %v9362_v46 }
0x10e0   :  { %7821 = vmatpush3.bf16.xpose.msra.mxu1 %v3546_v48  ;;  %7822 = vmatprep.mubr.msk.bf16.mxu1 %vm8307_vm0, %v8306_v0 }
0x10e1   :  { %7817 = vmatmul.mubr.msk.bf16.vlgmr.msra.gmra.mrb[76].mxu0 %vm140_vm2, %v3436_v50  ;;  %7832 = vmatprep.subr.bf16.mxu1 %v8306_v0 }
0x10e2   :  { %7827 = vmatpush3.bf16.xpose.msra.mxu0 %v3597_v59  ;;  %7828 = vmatprep.mubr.msk.bf16.mxu0 %vm8307_vm0, %v8306_v0 }
0x10e3   :  { %7838 = vmatprep.subr.bf16.mxu0 %v8306_v0 }
0x10e7   :  { %7823 = vmatmul.mubr.msk.bf16.vlgmr.msra.gmra.mrb[76].mxu1 %vm140_vm2, %v3539_v47 }
0x10e8   :  { %7833 = vmatpush3.bf16.msra.mxu1 %v3665_v2  ;;  %7834 = vmatprep.mubr.msk.bf16.mxu1 %vm8307_vm0, %v8306_v0 }
0x10e9   :  { %7829 = vmatmul.mubr.msk.bf16.vlgmr.msra.gmra.mrb[80].mxu0 %vm140_vm2, %v3590_v58  ;;  %7844 = vmatprep.subr.bf16.mxu1 %v8306_v0 }
0x10ea   :  { %7839 = vmatpush3.bf16.msra.mxu0 %v3713_v55  ;;  %7840 = vmatprep.mubr.msk.bf16.mxu0 %vm8307_vm0, %v8306_v0 }
0x10eb   :  { %7850 = vmatprep.subr.bf16.mxu0 %v8306_v0 }
0x11b2   :  { %v9386_v56 = vpop.f32.mrb[72].mxu1 }
0x11b3   :  { %v7812_v63 = vpop.f32.mrb[73].mxu1 }
0x11b4   :  { %v3482_v14 = vpop.f32.mrb[74].mxu1  ;;  %v9388_v11 = vpop.f32.mrb[76].mxu0 }
0x11b5   :  { %v7813_v36 = vpop.f32.mrb[75].mxu1  ;;  %v7818_v8 = vpop.f32.mrb[77].mxu0 }
0x11b6   :  { %v3530_v41 = vpop.f32.mrb[78].mxu0 }
0x11b7   :  { %v7819_v9 = vpop.f32.mrb[79].mxu0 }
0x11ba   :  { %v3582_v10 = vpop.f32.mrb[76].mxu1 }
0x11bb   :  { %v3583_v1 = vadd.f32 %v3582_v10, %v8482_v29  ;;  %v7824_v49 = vpop.f32.mrb[77].mxu1 }
0x11bc   :  { %v3585_v7 = vpop.f32.mrb[78].mxu1  ;;  %v3633_v15 = vpop.f32.mrb[80].mxu0 }
0x11bd   :  { %v3634_v20 = vadd.f32 %v3633_v15, %v8482_v29  ;;  %v7825_v21 = vpop.f32.mrb[79].mxu1  ;;  %v7830_v22 = vpop.f32.mrb[81].mxu0  ;;  %v3639_v23 = vsel %vm140_vm2, %v3583_v1, -inf }
0x11be   :  { %3640 = vmax.xlane.f32.xlu0 %v3639_v23  ;;  %v3636_v53 = vpop.f32.mrb[82].mxu0 }
0x11bf   :  { %v7831_v25 = vpop.f32.mrb[83].mxu0  ;;  %v3642_v16 = vsel %vm140_vm2, %v3634_v20, -inf }
0x11c0   :  { %3643 = vmax.xlane.f32.xlu1 %v3642_v16 }
0x11d1   :  { %3811 = vrot.lane.b32.xlu1 %v9312_v6, %s10186_s2 }
0x11d4   :  { %3761 = vrot.lane.b32.xlu0 %v9310_v5, %s10186_s2 }
0x11d5   :  { %3809 = vrot.lane.b32.xlu1 %v9326_v13, %s10187_s0 }
0x11d8   :  { %3759 = vrot.lane.b32.xlu0 %v9324_v28, %s10187_s0 }
0x11d9   :  { %3927 = vrot.lane.b32.xlu1 %v9312_v6, %s10188_s17 }
0x11dc   :  { %3879 = vrot.lane.b32.xlu0 %v9310_v5, %s10188_s17 }
0x124b   :  { %v3641_v24 = vpop.xlane.xlu0 %3640 }
0x124c   :  { %v3645_v27 = vsub.f32 %v3583_v1, %v3641_v24 }
0x124d   :  { %v3644_v18 = vpop.xlane.xlu1 %3643 }
0x124e   :  { %v3647_v30 = vmul.f32 1.442695, %v3645_v27  ;;  %v3646_v57 = vsub.f32 %v3634_v20, %v3644_v18 }
0x124f   :  { %v3762_v35 = vpop.permute.xlu0 %3761 }
0x1250   :  { %8266 = vpow2.f32 %v3647_v30  ;;  %v3649_v3 = vmul.f32 1.442695, %v3646_v57  ;;  %v3767_v39 = vsel %vm140_vm2, %v3762_v35, 0 }
0x1251   :  { %v3812_v17 = vpop.permute.xlu1 %3811 }
0x1252   :  { %8268 = vpow2.f32 %v3649_v3  ;;  %v3817_v45 = vsel %vm140_vm2, %v3812_v17, 0 }
0x1253   :  { %v3760_v54 = vpop.permute.xlu0 %3759 }
0x1255   :  { %v3810_v40 = vpop.permute.xlu1 %3809 }
0x1257   :  { %v3880_v47 = vpop.permute.xlu0 %3879 }
0x1258   :  { %v3885_v50 = vsel %vm261_vm3, %v3880_v47, 0 }
0x1259   :  { %v3928_v48 = vpop.permute.xlu1 %3927 }
0x125a   :  { %v9406_v19 = vpop.eup %8266  ;;  %v3933_v58 = vsel %vm261_vm3, %v3928_v48, 0 }
0x125b   :  { %v3657_v51 = vpack.c.bf16 %v9406_v19, %v9406_v19 }
0x125c   :  { %v9410_v12 = vpop.eup %8268 }
0x125d   :  { %7835 = vmatmul.mubr.msk.bf16.vlgmr.msra.gmra.mrb[80].mxu1 %vm140_vm2, %v3657_v51  ;;  %v3658_v32 = vpack.c.bf16 %v9410_v12, %v9410_v12 }
0x125e   :  { %7845 = vmatpush3.bf16.xpose.msra.mxu1 %v3767_v39  ;;  %7846 = vmatprep.mubr.msk.bf16.mxu1 %vm8307_vm0, %v8306_v0 }
0x125f   :  { %7841 = vmatmul.mubr.msk.bf16.vlgmr.msra.gmra.mrb[84].mxu0 %vm140_vm2, %v3658_v32  ;;  %7856 = vmatprep.subr.bf16.mxu1 %v8306_v0 }
0x1260   :  { %7851 = vmatpush3.bf16.xpose.msra.mxu0 %v3817_v45  ;;  %7852 = vmatprep.mubr.msk.bf16.mxu0 %vm8307_vm0, %v8306_v0 }
0x1261   :  { %7862 = vmatprep.subr.bf16.mxu0 %v8306_v0 }
0x1265   :  { %7847 = vmatmul.mubr.msk.bf16.vlgmr.msra.gmra.mrb[84].mxu1 %vm140_vm2, %v3760_v54 }
0x1266   :  { %7857 = vmatpush3.bf16.msra.mxu1 %v3885_v50  ;;  %7858 = vmatprep.mubr.msk.bf16.mxu1 %vm8307_vm0, %v8306_v0 }
0x1267   :  { %7853 = vmatmul.mubr.msk.bf16.vlgmr.msra.gmra.mrb[88].mxu0 %vm140_vm2, %v3810_v40  ;;  %7868 = vmatprep.subr.bf16.mxu1 %v8306_v0 }
0x1268   :  { %7863 = vmatpush3.bf16.msra.mxu0 %v3933_v58  ;;  %7864 = vmatprep.mubr.msk.bf16.mxu0 %vm8307_vm0, %v8306_v0 }
0x1269   :  { %7874 = vmatprep.subr.bf16.mxu0 %v8306_v0 }
0x1330   :  { %v9434_v59 = vpop.f32.mrb[80].mxu1 }
0x1331   :  { %v7836_v60 = vpop.f32.mrb[81].mxu1 }
0x1332   :  { %v3704_v26 = vpop.f32.mrb[82].mxu1  ;;  %v9436_v2 = vpop.f32.mrb[84].mxu0 }
0x1333   :  { %v7837_v55 = vpop.f32.mrb[83].mxu1  ;;  %v7842_v63 = vpop.f32.mrb[85].mxu0 }
0x1334   :  { %v3752_v14 = vpop.f32.mrb[86].mxu0 }
0x1335   :  { %v7843_v36 = vpop.f32.mrb[87].mxu0 }
0x1338   :  { %v3803_v8 = vpop.f32.mrb[84].mxu1 }
0x1339   :  { %v3804_v41 = vadd.f32 %v3803_v8, %v8482_v29  ;;  %v7848_v9 = vpop.f32.mrb[85].mxu1 }
0x133a   :  { %v3806_v10 = vpop.f32.mrb[86].mxu1  ;;  %v3853_v1 = vpop.f32.mrb[88].mxu0 }
0x133b   :  { %v3854_v49 = vadd.f32 %v3853_v1, %v8482_v29  ;;  %v7849_v7 = vpop.f32.mrb[87].mxu1  ;;  %v7854_v15 = vpop.f32.mrb[89].mxu0  ;;  %v3859_v20 = vsel %vm140_vm2, %v3804_v41, -inf }
0x133c   :  { %3860 = vmax.xlane.f32.xlu0 %v3859_v20  ;;  %v3856_v21 = vpop.f32.mrb[90].mxu0  ;;  %v3651_v15 = vsel %vm140_vm2, %v9406_v19, 0.0 }
0x133d   :  { %v7855_v22 = vpop.f32.mrb[91].mxu0  ;;  %v3862_v23 = vsel %vm140_vm2, %v3854_v49, -inf }
0x133e   :  { %3863 = vmax.xlane.f32.xlu1 %v3862_v23 }
0x134f   :  { %4031 = vrot.lane.b32.xlu1 %v9312_v6, %s10189_s18 }
0x1352   :  { %3981 = vrot.lane.b32.xlu0 %v9310_v5, %s10189_s18 }
0x1353   :  { %4029 = vrot.lane.b32.xlu1 %v9326_v13, %s10190_s19 }
0x1356   :  { %3979 = vrot.lane.b32.xlu0 %v9324_v28, %s10190_s19 }
0x13c9   :  { %v3861_v53 = vpop.xlane.xlu0 %3860 }
0x13ca   :  { %v3865_v25 = vsub.f32 %v3804_v41, %v3861_v53 }
0x13cb   :  { %v3864_v16 = vpop.xlane.xlu1 %3863 }
0x13cc   :  { %v3867_v24 = vmul.f32 1.442695, %v3865_v25  ;;  %v3866_v27 = vsub.f32 %v3854_v49, %v3864_v16 }
0x13cd   :  { %v3982_v57 = vpop.permute.xlu0 %3981 }
0x13ce   :  { %8270 = vpow2.f32 %v3867_v24  ;;  %v3869_v18 = vmul.f32 1.442695, %v3866_v27  ;;  %v3987_v51 = vsel %vm140_vm2, %v3982_v57, 0 }
0x13cf   :  { %v4032_v17 = vpop.permute.xlu1 %4031 }
0x13d0   :  { %8272 = vpow2.f32 %v3869_v18  ;;  %v4037_v28 = vsel %vm140_vm2, %v4032_v17, 0  ;;  %v3429_v17 = vsel %vm140_vm2, %v9358_v44, 0.0 }
0x13d1   :  { %v3980_v54 = vpop.permute.xlu0 %3979 }
0x13d3   :  { %v4030_v39 = vpop.permute.xlu1 %4029 }
0x13d8   :  { %v8271_v30 = vpop.eup %8270 }
0x13d9   :  { %v3877_v3 = vpack.c.bf16 %v8271_v30, %v8271_v30  ;;  %v3871_v20 = vsel %vm140_vm2, %v8271_v30, 0.0 }
0x13da   :  { %v8273_v35 = vpop.eup %8272 }
0x13db   :  { %7859 = vmatmul.mubr.msk.bf16.vlgmr.msra.gmra.mrb[88].mxu1 %vm140_vm2, %v3877_v3  ;;  %v3878_v13 = vpack.c.bf16 %v8273_v35, %v8273_v35  ;;  %v3874_v21 = vsel %vm140_vm2, %v8273_v35, 0.0 }
0x13dc   :  { %7869 = vmatpush3.bf16.xpose.msra.mxu1 %v3987_v51  ;;  %7870 = vmatprep.mubr.msk.bf16.mxu1 %vm8307_vm0, %v8306_v0  ;;  %v3432_v51 = vsel %vm140_vm2, %v9362_v46, 0.0 }
0x13dd   :  { %7865 = vmatmul.mubr.msk.bf16.vlgmr.msra.gmra.mrb[92].mxu0 %vm140_vm2, %v3878_v13  ;;  %7880 = vmatprep.subr.bf16.mxu1 %v8306_v0 }
0x13de   :  { %7875 = vmatpush3.bf16.xpose.msra.mxu0 %v4037_v28  ;;  %7876 = vmatprep.mubr.msk.bf16.mxu0 %vm8307_vm0, %v8306_v0 }
0x13df   :  { %7886 = vmatprep.subr.bf16.mxu0 %v8306_v0 }
0x13e3   :  { %7871 = vmatmul.mubr.msk.bf16.vlgmr.msra.gmra.mrb[92].mxu1 %vm140_vm2, %v3980_v54 }
0x13e4   :  { %7882 = vmatprep.mubr.msk.bf16.mxu1 %vm8307_vm0, %v8306_v0 }
0x13e5   :  { %7877 = vmatmul.mubr.msk.bf16.vlgmr.msra.gmra.mrb[96].mxu0 %vm140_vm2, %v4030_v39 }
0x13e6   :  { %7888 = vmatprep.mubr.msk.bf16.mxu0 %vm8307_vm0, %v8306_v0 }
0x14ae   :  { %v9466_v32 = vpop.f32.mrb[88].mxu1 }
0x14af   :  { %v7860_v40 = vpop.f32.mrb[89].mxu1 }
0x14b0   :  { %v3924_v45 = vpop.f32.mrb[90].mxu1  ;;  %v9468_v47 = vpop.f32.mrb[92].mxu0 }
0x14b1   :  { %v7861_v48 = vpop.f32.mrb[91].mxu1  ;;  %v7866_v50 = vpop.f32.mrb[93].mxu0 }
0x14b2   :  { %v3972_v58 = vpop.f32.mrb[94].mxu0 }
0x14b3   :  { %v7867_v60 = vpop.f32.mrb[95].mxu0 }
0x14b6   :  { %v4023_v26 = vpop.f32.mrb[92].mxu1 }
0x14b7   :  { %v4024_v55 = vadd.f32 %v4023_v26, %v8482_v29  ;;  %v7872_v63 = vpop.f32.mrb[93].mxu1 }
0x14b8   :  { %v4026_v14 = vpop.f32.mrb[94].mxu1  ;;  %v4073_v36 = vpop.f32.mrb[96].mxu0  ;;  %v8090_v63 = vld [vmem:[%s10154_s3 + $0x10] sm:$0xff]  }
0x14b9   :  { %v4074_v8 = vadd.f32 %v4073_v36, %v8482_v29  ;;  %v7873_v41 = vpop.f32.mrb[95].mxu1  ;;  %v7878_v9 = vpop.f32.mrb[97].mxu0  ;;  %v4079_v10 = vsel %vm140_vm2, %v4024_v55, -inf  ;;  %v3654_v29 = vsel %vm140_vm2, %v9410_v12, 0.0 }
0x14ba   :  { %4080 = vmax.xlane.f32.xlu0 %v4079_v10  ;;  %v4076_v1 = vpop.f32.mrb[98].mxu0 }
0x14bb   :  { %v7879_v49 = vpop.f32.mrb[99].mxu0  ;;  %v4082_v7 = vsel %vm140_vm2, %v4074_v8, -inf }
0x14bc   :  { %4083 = vmax.xlane.f32.xlu1 %v4082_v7 }
0x14cd   :  { %4147 = vrot.lane.b32.xlu1 %v9312_v6, %s10191_s20 }
0x14d0   :  { %4099 = vrot.lane.b32.xlu0 %v9310_v5, %s10191_s20 }
0x14ef   :  { %3652 = vadd.xlane.f32.xlu0 %v3651_v15 }
0x14f1   :  { %3655 = vadd.xlane.f32.xlu1 %v3654_v29 }
0x14f3   :  { %3872 = vadd.xlane.f32.xlu0 %v3871_v20 }
0x14f7   :  { %3875 = vadd.xlane.f32.xlu0 %v3874_v21 }
0x1547   :  { %v4081_v22 = vpop.xlane.xlu0 %4080 }
0x1548   :  { %v4085_v23 = vsub.f32 %v4024_v55, %v4081_v22 }
0x1549   :  { %v4084_v6 = vpop.xlane.xlu1 %4083 }
0x154a   :  { %v4087_v53 = vmul.f32 1.442695, %v4085_v23  ;;  %v4086_v25 = vsub.f32 %v4074_v8, %v4084_v6 }
0x154b   :  { %v4100_v5 = vpop.permute.xlu0 %4099 }
0x154c   :  { %8274 = vpow2.f32 %v4087_v53  ;;  %v4089_v16 = vmul.f32 1.442695, %v4086_v25  ;;  %v4105_v19 = vsel %vm261_vm3, %v4100_v5, 0 }
0x154d   :  { %7881 = vmatpush3.bf16.msra.mxu1 %v4105_v19  ;;  %v4148_v24 = vpop.permute.xlu1 %4147 }
0x154e   :  { %8276 = vpow2.f32 %v4089_v16  ;;  %v4153_v12 = vsel %vm261_vm3, %v4148_v24, 0  ;;  %7892 = vmatprep.subr.bf16.mxu1 %v8306_v0 }
0x154f   :  { %7887 = vmatpush3.bf16.msra.mxu0 %v4153_v12 }
0x1556   :  { %v8275_v27 = vpop.eup %8274 }
0x1557   :  { %v4091_v18 = vsel %vm140_vm2, %v8275_v27, 0.0  ;;  %v4097_v30 = vpack.c.bf16 %v8275_v27, %v8275_v27 }
0x1558   :  { %v8277_v57 = vpop.eup %8276  ;;  %4092 = vadd.xlane.f32.xlu1 %v4091_v18 }
0x1559   :  { %7883 = vmatmul.mubr.msk.bf16.vlgmr.msra.gmra.mrb[96].mxu1 %vm140_vm2, %v4097_v30  ;;  %v4094_v3 = vsel %vm140_vm2, %v8277_v57, 0.0  ;;  %v4098_v35 = vpack.c.bf16 %v8277_v57, %v8277_v57 }
0x155a   :  { %4095 = vadd.xlane.f32.xlu0 %v4094_v3  ;;  %7896 = vmatprep.mubr.msk.bf16.mxu1 %vm8307_vm0, %v8306_v0 }
0x155b   :  { %7889 = vmatmul.mubr.msk.bf16.vlgmr.msra.gmra.mrb[100].mxu0 %vm140_vm2, %v4098_v35  ;;  %7893 = vmatpush3.bf16.msra.mxu1 %v8090_v63 }
0x155c   :  { %3430 = vadd.xlane.f32.xlu1 %v3429_v17  ;;  %4661 = vmatprep.mubr.bf16.mxu0 %v8323_v52 }
0x155d   :  { %7894 = vmatprep.subr.bf16.mxu1 %v8306_v0 }
0x155e   :  { %3433 = vadd.xlane.f32.xlu0 %v3432_v51 }
0x157c   :  { %v3653_v13 = vpop.xlane.xlu0 %3652 }
0x157d   :  { %8278 = vrcp.f32 %v3653_v13 }
0x157e   :  { %v3656_v28 = vpop.xlane.xlu1 %3655 }
0x157f   :  { %8280 = vrcp.f32 %v3656_v28 }
0x1580   :  { %v3873_v54 = vpop.xlane.xlu0 %3872 }
0x1581   :  { %8282 = vrcp.f32 %v3873_v54 }
0x1584   :  { %v3876_v39 = vpop.xlane.xlu0 %3875 }
0x1585   :  { %8284 = vrcp.f32 %v3876_v39 }
0x1587   :  { %v8279_v40 = vpop.eup %8278 }
0x1588   :  { %v3757_v48 = vmul.f32 %v8279_v40, %v9434_v59 }
0x1589   :  { %v8281_v45 = vpop.eup %8280 }
0x158a   :  { %v3758_v44 = vmul.f32 %v8281_v45, %v9436_v2 }
0x158b   :  { %v8283_v58 = vpop.eup %8282 }
0x158c   :  { %v7941_v50 = vpack.i.bf16 %v3758_v44, %v3757_v48  ;;  %v3977_v60 = vmul.f32 %v8283_v58, %v9466_v32  ;;  %v8091_v32 = vld [vmem:[%s10154_s3 + $0x18] sm:$0xff]  }
0x158d   :  { %7895 = vmatpush3.bf16.msra.mxu1 %v8091_v32 }
0x158e   :  { %7942 = vrot.lane.b32.xlu1 %v7941_v50, %s10192_s29 }
0x158f   :  { %v8285_v46 = vpop.eup %8284 }
0x1590   :  { %v3978_v26 = vmul.f32 %v8285_v46, %v9468_v47 }
0x1592   :  { %v7946_v55 = vpack.i.bf16 %v3978_v26, %v3977_v60 }
0x1594   :  { %7947 = vrot.lane.b32.xlu0 %v7946_v55, %s10193_s24 }
0x15e5   :  { %v4093_v59 = vpop.xlane.xlu1 %4092 }
0x15e6   :  { %8286 = vrcp.f32 %v4093_v59 }
0x15e7   :  { %v4096_v2 = vpop.xlane.xlu0 %4095 }
0x15e8   :  { %8288 = vrcp.f32 %v4096_v2 }
0x15e9   :  { %v3431_v21 = vpop.xlane.xlu1 %3430 }
0x15ea   :  { %8290 = vrcp.f32 %v3431_v21 }
0x15eb   :  { %v3434_v22 = vpop.xlane.xlu0 %3433 }
0x15ec   :  { %8292 = vrcp.f32 %v3434_v22  ;;  %v6801_v22 = vld [vmem:[%s10156_s5 + $0x1c8] sm:$0xff] }
0x15f0   :  { %v8287_v14 = vpop.eup %8286 }
0x15f2   :  { %v8289_v8 = vpop.eup %8288 }
0x15f4   :  { %v8291_v6 = vpop.eup %8290 }
0x15f5   :  { %v3535_v12 = vmul.f32 %v8291_v6, %v9386_v56  ;;  %v6768_v56 = vld [vmem:[%s10155_s4 + $0x1] ss:$0 sm:$0xff] }
0x15f6   :  { %v8293_v25 = vpop.eup %8292 }
0x15f7   :  { %v3536_v27 = vmul.f32 %v8293_v25, %v9388_v11  ;;  %v6778_v25 = vld [vmem:[%s10156_s5 + $0x110] sm:$0xff] }
0x1600   :  { %v7943_v23 = vpop.permute.xlu1 %7942 }
0x1601   :  { %v7945_v5 = vunpack.i.h.bf16 %v7943_v23  ;;  %v7944_v16 = vunpack.i.l.bf16 %v7943_v23 }
0x1603   :  { %v4224_v30 = vsel %vm140_vm2, %v3536_v27, %v7945_v5  ;;  %v4223_v57 = vsel %vm140_vm2, %v3535_v12, %v7944_v16  ;;  %v6786_v5 = vld [vmem:[%s10156_s5 + $0x150] sm:$0xff]  ;;  %v6779_v16 = vld [vmem:[%s10156_s5 + $0x118] sm:$0xff] }
0x1604   :  { %v6787_v12 = vld [vmem:[%s10156_s5 + $0x158] sm:$0xff] }
0x1605   :  { %v6816_v27 = vcombine.low %v6779_v16, %v6787_v12 }
0x1606   :  { %v7948_v53 = vpop.permute.xlu0 %7947 }
0x1607   :  { %v7950_v19 = vunpack.i.h.bf16 %v7948_v53  ;;  %v7949_v24 = vunpack.i.l.bf16 %v7948_v53 }
0x1609   :  { %v4225_v17 = vsel %vm1045_vm5, %v4223_v57, %v7949_v24  ;;  %v4226_v51 = vsel %vm1045_vm5, %v4224_v30, %v7950_v19  ;;  %v6814_v19 = vcombine.low %v6778_v25, %v6786_v5  ;;  %v6815_v24 = vcombine.high %v6778_v25, %v6786_v5  ;;  %v6798_v5 = vld [vmem:[%s10156_s5 + $0x1b0] sm:$0xff] }
0x162c   :  { %v4141_v47 = vpop.f32.mrb[96].mxu1 }
0x162d   :  { %v7884_v36 = vpop.f32.mrb[97].mxu1  ;;  %v4197_v10 = vmul.f32 %v8287_v14, %v4141_v47 }
0x162e   :  { %v4144_v41 = vpop.f32.mrb[98].mxu1  ;;  %v4189_v9 = vpop.f32.mrb[100].mxu0 }
0x162f   :  { %v4198_v1 = vmul.f32 %v8289_v8, %v4189_v9  ;;  %v7885_v49 = vpop.f32.mrb[99].mxu1  ;;  %v7890_v7 = vpop.f32.mrb[101].mxu0  ;;  %v6784_v8 = vld [vmem:[%s10156_s5 + $0x140] sm:$0xff]  ;;  %v6777_v41 = vld [vmem:[%s10156_s5 + $0x108] sm:$0xff] }
0x1630   :  { %v4192_v15 = vpop.f32.mrb[102].mxu0 }
0x1631   :  { %v7951_v29 = vpack.i.bf16 %v4198_v1, %v4197_v10  ;;  %v7891_v20 = vpop.f32.mrb[103].mxu0  ;;  %v6785_v10 = vld [vmem:[%s10156_s5 + $0x148] sm:$0xff]  ;;  %v6792_v15 = vld [vmem:[%s10156_s5 + $0x180] sm:$0xff] }
0x1632   :  { %v6812_v49 = vcombine.low %v6777_v41, %v6785_v10  ;;  %v6813_v7 = vcombine.high %v6777_v41, %v6785_v10  ;;  %v6793_v20 = vld [vmem:[%s10156_s5 + $0x188] sm:$0xff]  ;;  %v6804_v41 = vld [vmem:[%s10156_s5 + $0x1e0] sm:$0xff] }
0x1633   :  { %7952 = vrot.lane.b32.xlu1 %v7951_v29, %s10194_s26  ;;  %v6800_v29 = vld [vmem:[%s10156_s5 + $0x1c0] sm:$0xff]  ;;  %v6828_v6 = vcombine.low %v6793_v20, %v6801_v22  ;;  %v6829_v53 = vcombine.high %v6793_v20, %v6801_v22  ;;  %v6805_v10 = vld [vmem:[%s10156_s5 + $0x1e8] sm:$0xff]  ;;  %v6790_v20 = vld [vmem:[%s10156_s5 + $0x170] sm:$0xff] }
0x1634   :  { %4672 = vmatprep.subr.bf16.mxu1 %v6813_v7  ;;  %v6827_v21 = vcombine.high %v6792_v15, %v6800_v29  ;;  %v6826_v23 = vcombine.low %v6792_v15, %v6800_v29  ;;  %v6782_v29 = vld [vmem:[%s10156_s5 + $0x130] sm:$0xff]  ;;  %v6791_v22 = vld [vmem:[%s10156_s5 + $0x178] sm:$0xff] }
0x16a5   :  { %v7953_v18 = vpop.permute.xlu1 %7952 }
0x16a6   :  { %v7955_v3 = vunpack.i.h.bf16 %v7953_v18  ;;  %v7954_v35 = vunpack.i.l.bf16 %v7953_v18  ;;  %v6817_v18 = vcombine.high %v6779_v16, %v6787_v12  ;;  %v6806_v16 = vld [vmem:[%s10156_s5 + $0x1f0] sm:$0xff]  ;;  %v6822_v12 = vcombine.low %v6782_v29, %v6790_v20 }
0x16a8   :  { %v4228_v13 = vsel %vm1048_vm6, %v4226_v51, %v7955_v3  ;;  %v4227_v28 = vsel %vm1048_vm6, %v4225_v17, %v7954_v35 }
0x16a9   :  { %v4229_v54 = vpack.c.bf16 %v4228_v13, %v4227_v28  ;;  %v6774_v28 = vld [vmem:[%s10158_s9 + $0x1] ss:$0 sm:$0xff] }
0x16ab   :  { %7897 = vmatmul.mubr.msk.bf16.vlgmr.msra.gmra.mrb[100].mxu1 %vm86_vm1, %v4229_v54 }
0x16ac   :  { %4704 = vmatprep.mubr.bf16.mxu1 %v8323_v52  ;;  %4673 = vmatpush1.bf16.msra.mxu1 %v6812_v49 }
0x16ad   :  { %4674 = vmatprep.subr.bf16.mxu1 %v6829_v53  ;;  %v6823_v53 = vcombine.high %v6782_v29, %v6790_v20 }
0x16b0   :  { %4675 = vmatpush1.bf16.msra.mxu1 %v6828_v6 }
0x16b1   :  { %4758 = vmatprep.subr.bf16.mxu1 %v6817_v18  ;;  %v6839_v18 = vcombine.high %v6798_v5, %v6806_v16 }
0x177e   :  { %v4292_v11 = vpop.f32.mrb[100].mxu1 }
0x177f   :  { %v4293_v39 = vadd.f32 %v6768_v56, %v4292_v11  ;;  %v7898_v40 = vpop.f32.mrb[101].mxu1 }
0x1780   :  { %v4295_v45 = vpop.f32.mrb[102].mxu1  ;;  %v6775_v40 = vld [vmem:[%s10159_s10 + $0x1] ss:$0 sm:$0xff] }
0x1781   :  { %v4296_v48 = vadd.f32 %v6768_v56, %v4295_v45  ;;  %v7899_v44 = vpop.f32.mrb[103].mxu1  ;;  %v4299_v50 = vadd.f32 %v4293_v39, %v9298_v61 }
0x1782   :  { %v6802_v44 = vld [vmem:[%s10156_s5 + $0x1d0] sm:$0xff] }
0x1783   :  { %v4305_v58 = vsel %vm86_vm1, %v4299_v50, 0.0  ;;  %v4300_v46 = vadd.f32 %v4296_v48, %v9300_v62  ;;  %v6776_v62 = vld [vmem:[%s10156_s5 + $0x100] sm:$0xff]  ;;  %v6794_v48 = vld [vmem:[%s10156_s5 + $0x190] sm:$0xff] }
0x1784   :  { %4306 = vadd.xlane.f32.xlu1 %v4305_v58  ;;  %v6811_v9 = vcombine.high %v6776_v62, %v6784_v8  ;;  %v6810_v1 = vcombine.low %v6776_v62, %v6784_v8  ;;  %v6803_v58 = vld [vmem:[%s10156_s5 + $0x1d8] sm:$0xff]  ;;  %v6796_v8 = vld [vmem:[%s10156_s5 + $0x1a0] sm:$0xff] }
0x1785   :  { %v4308_v60 = vsel %vm86_vm1, %v4300_v46, 0.0  ;;  %v6835_v7 = vcombine.high %v6796_v8, %v6804_v41 }
0x1786   :  { %4309 = vadd.xlane.f32.xlu0 %v4308_v60  ;;  %4629 = vmatprep.subr.bf16.mxu0 %v6811_v9  ;;  %v6797_v9 = vld [vmem:[%s10156_s5 + $0x1a8] sm:$0xff] }
0x1787   :  { %4630 = vmatpush1.bf16.msra.mxu0 %v6810_v1  ;;  %v6837_v15 = vcombine.high %v6797_v9, %v6805_v10  ;;  %v6836_v6 = vcombine.low %v6797_v9, %v6805_v10  ;;  %v8121_v9 = vld [vmem:[%s10157_s7 + $0x4f8] sm:$0xff]  }
0x1788   :  { %4631 = vmatprep.subr.bf16.mxu0 %v6827_v21  ;;  %v6783_v21 = vld [vmem:[%s10156_s5 + $0x138] sm:$0xff] }
0x1789   :  { %v6825_v25 = vcombine.high %v6783_v21, %v6791_v22  ;;  %v8122_v10 = vld [vmem:[%s10157_s7 + $0x438] sm:$0xff]  }
0x178b   :  { %4632 = vmatpush1.bf16.msra.mxu0 %v6826_v23  ;;  %v6834_v23 = vcombine.low %v6796_v8, %v6804_v41  ;;  %v8119_v8 = vld [vmem:[%s10157_s7 + $0x4b0] sm:$0xff]   ;;  %v8120_v41 = vld [vmem:[%s10157_s7 + $0x478] sm:$0xff]  }
0x178c   :  { %4715 = vmatprep.subr.bf16.mxu0 %v6815_v24  ;;  %v6807_v24 = vld [vmem:[%s10156_s5 + $0x1f8] sm:$0xff] }
0x1811   :  { %v4307_v26 = vpop.xlane.xlu1 %4306 }
0x1812   :  { %v4311_v55 = vmul.f32 0.03125, %v4307_v26 }
0x1813   :  { %v4310_v63 = vpop.xlane.xlu0 %4309 }
0x1814   :  { %v4313_v59 = vsub.f32 %v4299_v50, %v4311_v55  ;;  %v4312_v2 = vmul.f32 0.03125, %v4310_v63  ;;  %v6795_v50 = vld [vmem:[%s10156_s5 + $0x198] sm:$0xff]  ;;  %v6831_v55 = vcombine.high %v6794_v48, %v6802_v44 }
0x1815   :  { %v6833_v63 = vcombine.high %v6795_v50, %v6803_v58 }
0x1816   :  { %v4314_v32 = vsub.f32 %v4300_v46, %v4312_v2  ;;  %v4315_v47 = vmul.f32 %v4313_v59, %v4313_v59  ;;  %v6788_v2 = vld [vmem:[%s10156_s5 + $0x160] sm:$0xff] }
0x1818   :  { %v4317_v14 = vsel %vm86_vm1, %v4315_v47, 0.0  ;;  %v4316_v36 = vmul.f32 %v4314_v32, %v4314_v32  ;;  %v6789_v47 = vld [vmem:[%s10156_s5 + $0x168] sm:$0xff] }
0x1819   :  { %4318 = vadd.xlane.f32.xlu0 %v4317_v14  ;;  %v6830_v14 = vcombine.low %v6794_v48, %v6802_v44  ;;  %v8104_v48 = vld [vmem:[%s10157_s7 + $0x458] sm:$0xff]  }
0x181a   :  { %v4320_v61 = vsel %vm86_vm1, %v4316_v36, 0.0  ;;  %v6832_v36 = vcombine.low %v6795_v50, %v6803_v58  ;;  %v8105_v44 = vld [vmem:[%s10157_s7 + $0x4d8] sm:$0xff]  }
0x181b   :  { %4321 = vadd.xlane.f32.xlu1 %v4320_v61  ;;  %v8106_v50 = vld [vmem:[%s10157_s7 + $0x418] sm:$0xff]  }
0x181c   :  { %v8107_v58 = vld [vmem:[%s10157_s7 + $0x498] sm:$0xff]  }
0x18a6   :  { %v4319_v30 = vpop.xlane.xlu0 %4318 }
0x18a7   :  { %v4323_v57 = vmul.f32 0.03125, %v4319_v30 }
0x18a8   :  { %v4322_v3 = vpop.xlane.xlu1 %4321 }
0x18a9   :  { %v4325_v35 = vadd.f32 1e-05, %v4323_v57  ;;  %v4324_v17 = vmul.f32 0.03125, %v4322_v3  ;;  %v6838_v57 = vcombine.low %v6798_v5, %v6806_v16 }
0x18ab   :  { %8294 = vrsqrt.f32 %v4325_v35  ;;  %v4326_v51 = vadd.f32 1e-05, %v4324_v17  ;;  %v8092_v35 = vld [vmem:[%s10157_s7 + $0x440] sm:$0xff]  }
0x18ac   :  { %v8093_v17 = vld [vmem:[%s10157_s7 + $0x4c0] sm:$0xff]  }
0x18ad   :  { %8296 = vrsqrt.f32 %v4326_v51  ;;  %v8094_v51 = vld [vmem:[%s10157_s7 + $0x400] sm:$0xff]  }
0x18b5   :  { %v8295_v13 = vpop.eup %8294 }
0x18b6   :  { %v4329_v54 = vmul.f32 %v8295_v13, %v4313_v59  ;;  %v6780_v59 = vld [vmem:[%s10156_s5 + $0x120] sm:$0xff] }
0x18b7   :  { %v8297_v56 = vpop.eup %8296  ;;  %v6819_v61 = vcombine.high %v6780_v59, %v6788_v2  ;;  %v6818_v1 = vcombine.low %v6780_v59, %v6788_v2  ;;  %v8095_v13 = vld [vmem:[%s10157_s7 + $0x480] sm:$0xff]   ;;  %v8112_v2 = vld [vmem:[%s10157_s7 + $0x468] sm:$0xff]  }
0x18b8   :  { %v4337_v11 = vmul.f32 %v6774_v28, %v4329_v54  ;;  %v4330_v39 = vmul.f32 %v8297_v56, %v4314_v32  ;;  %v6781_v32 = vld [vmem:[%s10156_s5 + $0x128] sm:$0xff]  ;;  %v8111_v59 = vld [vmem:[%s10157_s7 + $0x4a0] sm:$0xff]  }
0x18b9   :  { %v6821_v62 = vcombine.high %v6781_v32, %v6789_v47  ;;  %v6820_v49 = vcombine.low %v6781_v32, %v6789_v47  ;;  %v8098_v54 = vld [vmem:[%s10157_s7 + $0x408] sm:$0xff]  }
0x18ba   :  { %v4338_v45 = vmul.f32 %v6774_v28, %v4330_v39  ;;  %v9585_v46 = vadd.f32 %v6775_v40, %v4337_v11  ;;  %v8096_v28 = vld [vmem:[%s10157_s7 + $0x448] sm:$0xff]   ;;  %v8100_v11 = vld [vmem:[%s10157_s7 + $0x450] sm:$0xff]  }
0x18bb   :  { %v8099_v56 = vld [vmem:[%s10157_s7 + $0x488] sm:$0xff]   ;;  %v8101_v39 = vld [vmem:[%s10157_s7 + $0x4d0] sm:$0xff]  }
0x18bc   :  { %v9587_v60 = vadd.f32 %v6775_v40, %v4338_v45  ;;  %v8102_v40 = vld [vmem:[%s10157_s7 + $0x410] sm:$0xff]   ;;  %v8113_v32 = vld [vmem:[%s10157_s7 + $0x4e8] sm:$0xff]  }
0x18bd   :  { %v8103_v45 = vld [vmem:[%s10157_s7 + $0x490] sm:$0xff]   ;;  %v8114_v47 = vld [vmem:[%s10157_s7 + $0x428] sm:$0xff]  }
0x18be   :  { %v9591_v26 = vpack.c.bf16 %v9587_v60, %v9585_v46 }
0x18c0   :  { %6842 = vmatmul.mubr.msk.bf16.vlgmr.msra.gmra.mrb[104].mxu0 %vm86_vm1, %v9591_v26  ;;  %6843 = vmatmul.mubr.msk.bf16.vlgmr.msra.gmra.mrb[104].mxu1 %vm86_vm1, %v9591_v26 }
0x18c1   :  { %4716 = vmatpush1.bf16.msra.mxu0 %v6814_v19  ;;  %4759 = vmatpush1.bf16.msra.mxu1 %v6816_v27  ;;  %v6799_v19 = vld [vmem:[%s10156_s5 + $0x1b8] sm:$0xff]  ;;  %v6824_v27 = vcombine.low %v6783_v21, %v6791_v22 }
0x18c2   :  { %4717 = vmatprep.subr.bf16.mxu0 %v6831_v55  ;;  %4760 = vmatprep.subr.bf16.mxu1 %v6833_v63  ;;  %v6841_v30 = vcombine.high %v6799_v19, %v6807_v24  ;;  %v6840_v3 = vcombine.low %v6799_v19, %v6807_v24  ;;  %v8109_v55 = vld [vmem:[%s10157_s7 + $0x4e0] sm:$0xff]  }
0x18c3   :  { %4747 = vmatprep.mubr.bf16.mxu0 %v8323_v52  ;;  %4790 = vmatprep.mubr.bf16.mxu1 %v8323_v52  ;;  %v8110_v63 = vld [vmem:[%s10157_s7 + $0x420] sm:$0xff]  }
0x18c5   :  { %4718 = vmatpush1.bf16.msra.mxu0 %v6830_v14  ;;  %4761 = vmatpush1.bf16.msra.mxu1 %v6832_v36  ;;  %v8115_v14 = vld [vmem:[%s10157_s7 + $0x4a8] sm:$0xff]   ;;  %v8116_v36 = vld [vmem:[%s10157_s7 + $0x470] sm:$0xff]  }
0x18c6   :  { %4801 = vmatprep.subr.bf16.mxu0 %v6819_v61  ;;  %4844 = vmatprep.subr.bf16.mxu1 %v6821_v62  ;;  %v8117_v61 = vld [vmem:[%s10157_s7 + $0x4f0] sm:$0xff]  }
0x18c7   :  { %v8118_v62 = vld [vmem:[%s10157_s7 + $0x430] sm:$0xff]  }
0x18c8   :  { %6844 = vmatmul.mubr.msk.bf16.vlgmr.msra.gmra.mrb[108].mxu0 %vm86_vm1, %v9591_v26  ;;  %6845 = vmatmul.mubr.msk.bf16.vlgmr.msra.gmra.mrb[108].mxu1 %vm86_vm1, %v9591_v26 }
0x18c9   :  { %4802 = vmatpush1.bf16.msra.mxu0 %v6818_v1  ;;  %4845 = vmatpush1.bf16.msra.mxu1 %v6820_v49  ;;  %v8123_v1 = vld [vmem:[%s10157_s7 + $0x4b8] sm:$0xff]   ;;  %v8124_v49 = vld [vmem:[%s10157_s7 + $0x540] sm:$0xff]  }
0x18ca   :  { %4803 = vmatprep.subr.bf16.mxu0 %v6835_v7  ;;  %4846 = vmatprep.subr.bf16.mxu1 %v6837_v15  ;;  %v8125_v7 = vld [vmem:[%s10157_s7 + $0x5c0] sm:$0xff]   ;;  %v6808_v15 = vld [vmem:[%s10160_s6 + $0x10] sm:$0xff] }
0x18cb   :  { %4833 = vmatprep.mubr.bf16.mxu0 %v8323_v52  ;;  %4876 = vmatprep.mubr.bf16.mxu1 %v8323_v52  ;;  %v4389_v29 = vrot.slane %v6808_v15, %v8902_v31  ;;  %v4397_v20 = vrot.slane %v6808_v15, %v8905_v33  ;;  %v4393_v21 = vrot.slane %v6808_v15, %v8911_v4 }
0x18cc   :  { %v4401_v22 = vrot.slane %v6808_v15, %v8914_v34 }
0x18cd   :  { %4804 = vmatpush1.bf16.msra.mxu0 %v6834_v23  ;;  %4847 = vmatpush1.bf16.msra.mxu1 %v6836_v6 }
0x18ce   :  { %4887 = vmatprep.subr.bf16.mxu0 %v6823_v53  ;;  %4930 = vmatprep.subr.bf16.mxu1 %v6825_v25 }
0x18d0   :  { %6846 = vmatmul.mubr.msk.bf16.vlgmr.msra.gmra.mrb[112].mxu0 %vm86_vm1, %v9591_v26  ;;  %6847 = vmatmul.mubr.msk.bf16.vlgmr.msra.gmra.mrb[112].mxu1 %vm86_vm1, %v9591_v26 }
0x18d1   :  { %4888 = vmatpush1.bf16.msra.mxu0 %v6822_v12  ;;  %4931 = vmatpush1.bf16.msra.mxu1 %v6824_v27 }
0x18d2   :  { %4889 = vmatprep.subr.bf16.mxu0 %v6839_v18  ;;  %4932 = vmatprep.subr.bf16.mxu1 %v6841_v30 }
0x18d3   :  { %4919 = vmatprep.mubr.bf16.mxu0 %v8323_v52  ;;  %4962 = vmatprep.mubr.bf16.mxu1 %v8323_v52  ;;  %v8097_v52 = vld [vmem:[%s10157_s7 + $0x4c8] sm:$0xff]  }
0x18d5   :  { %4890 = vmatpush1.bf16.msra.mxu0 %v6838_v57  ;;  %4933 = vmatpush1.bf16.msra.mxu1 %v6840_v3 }
0x18d6   :  { %7497 = vmatprep.subr.bf16.mxu0 %v8092_v35  ;;  %7519 = vmatprep.subr.bf16.mxu1 %v8093_v17  ;;  %v4405_v35 = vrot.slane %v6808_v15, %v8921_v37  ;;  %v4413_v17 = vrot.slane %v6808_v15, %v8924_v38 }
0x18d8   :  { %6848 = vmatmul.mubr.msk.bf16.vlgmr.msra.gmra.mrb[116].mxu0 %vm86_vm1, %v9591_v26  ;;  %6849 = vmatmul.mubr.msk.bf16.vlgmr.msra.gmra.mrb[116].mxu1 %vm86_vm1, %v9591_v26  ;;  %v8108_v26 = vld [vmem:[%s10157_s7 + $0x460] sm:$0xff]  }
0x18d9   :  { %7498 = vmatpush3.bf16.msra.mxu0 %v8094_v51  ;;  %7520 = vmatpush3.bf16.msra.mxu1 %v8095_v13 }
0x18da   :  { %7499 = vmatprep.subr.bf16.mxu0 %v8096_v28  ;;  %7521 = vmatprep.subr.bf16.mxu1 %v8097_v52  ;;  %v4409_v28 = vrot.slane %v6808_v15, %v8927_v42  ;;  %v4417_v52 = vrot.slane %v6808_v15, %v8930_v43 }
0x18dd   :  { %7500 = vmatpush3.bf16.msra.mxu0 %v8098_v54  ;;  %7522 = vmatpush3.bf16.msra.mxu1 %v8099_v56 }
0x18de   :  { %7501 = vmatprep.subr.bf16.mxu0 %v8100_v11  ;;  %7523 = vmatprep.subr.bf16.mxu1 %v8101_v39 }
0x18e1   :  { %7502 = vmatpush3.bf16.msra.mxu0 %v8102_v40  ;;  %7524 = vmatpush3.bf16.msra.mxu1 %v8103_v45 }
0x18e2   :  { %7503 = vmatprep.subr.bf16.mxu0 %v8104_v48  ;;  %7525 = vmatprep.subr.bf16.mxu1 %v8105_v44 }
0x18e5   :  { %7504 = vmatpush3.bf16.msra.mxu0 %v8106_v50  ;;  %7526 = vmatpush3.bf16.msra.mxu1 %v8107_v58  ;;  %v9779_v50 = vld [vmem:[%s10160_s6 + $0x18] sm:$0xff] }
0x18e6   :  { %7505 = vmatprep.subr.bf16.mxu0 %v8108_v26  ;;  %7527 = vmatprep.subr.bf16.mxu1 %v8109_v55  ;;  %v4429_v15 = vrot.slane %v9779_v50, %v8905_v33  ;;  %v8131_v33 = vld [vmem:[%s10157_s7 + $0x588] sm:$0xff]  }
0x18e9   :  { %7506 = vmatpush3.bf16.msra.mxu0 %v8110_v63  ;;  %7528 = vmatpush3.bf16.msra.mxu1 %v8111_v59 }
0x18ea   :  { %7507 = vmatprep.subr.bf16.mxu0 %v8112_v2  ;;  %7529 = vmatprep.subr.bf16.mxu1 %v8113_v32  ;;  %v8126_v32 = vld [vmem:[%s10157_s7 + $0x500] sm:$0xff]  }
0x18ed   :  { %7508 = vmatpush3.bf16.msra.mxu0 %v8114_v47  ;;  %7530 = vmatpush3.bf16.msra.mxu1 %v8115_v14  ;;  %v8127_v47 = vld [vmem:[%s10157_s7 + $0x580] sm:$0xff]  }
0x18ee   :  { %7509 = vmatprep.subr.bf16.mxu0 %v8116_v36  ;;  %7531 = vmatprep.subr.bf16.mxu1 %v8117_v61 }
0x18f1   :  { %7510 = vmatpush3.bf16.msra.mxu0 %v8118_v62  ;;  %7532 = vmatpush3.bf16.msra.mxu1 %v8119_v8  ;;  %v8128_v8 = vld [vmem:[%s10157_s7 + $0x548] sm:$0xff]  }
0x18f2   :  { %7511 = vmatprep.subr.bf16.mxu0 %v8120_v41  ;;  %7533 = vmatprep.subr.bf16.mxu1 %v8121_v9  ;;  %v8129_v41 = vld [vmem:[%s10157_s7 + $0x5c8] sm:$0xff]   ;;  %v4421_v9 = vrot.slane %v9779_v50, %v8902_v31 }
0x18f5   :  { %7512 = vmatpush3.bf16.msra.mxu0 %v8122_v10  ;;  %7534 = vmatpush3.bf16.msra.mxu1 %v8123_v1 }
0x18f6   :  { %7541 = vmatprep.subr.bf16.mxu0 %v8124_v49  ;;  %7563 = vmatprep.subr.bf16.mxu1 %v8125_v7 }
0x1993   :  { %v4663_v23 = vpop.f32.mrb[104].mxu0  ;;  %v4706_v6 = vpop.f32.mrb[104].mxu1 }
0x1994   :  { %v4664_v53 = vadd.f32 %v4663_v23, %v4389_v29  ;;  %v4707_v25 = vadd.f32 %v4706_v6, %v4397_v20  ;;  %v4665_v5 = vpop.f32.mrb[105].mxu0  ;;  %v4708_v16 = vpop.f32.mrb[105].mxu1  ;;  %v4425_v23 = vrot.slane %v9779_v50, %v8911_v4  ;;  %v8132_v4 = vld [vmem:[%s10157_s7 + $0x550] sm:$0xff]  }
0x1995   :  { %v4666_v19 = vadd.f32 %v4665_v5, %v4393_v21  ;;  %v4709_v24 = vadd.f32 %v4708_v16, %v4401_v22  ;;  %v4667_v12 = vpop.f32.mrb[106].mxu0  ;;  %v4710_v27 = vpop.f32.mrb[106].mxu1 }
0x1996   :  { %v4668_v18 = vadd.f32 %v4667_v12, %v4389_v29  ;;  %v4711_v30 = vadd.f32 %v4710_v27, %v4397_v20  ;;  %v4669_v57 = vpop.f32.mrb[107].mxu0  ;;  %v4712_v3 = vpop.f32.mrb[107].mxu1  ;;  %v4973_v54 = vmax.f32 %v4664_v53, 0.0  ;;  %v4975_v56 = vmax.f32 %v4707_v25, 0.0  ;;  %v8130_v53 = vld [vmem:[%s10157_s7 + $0x508] sm:$0xff]   ;;  %v8133_v12 = vld [vmem:[%s10157_s7 + $0x5d0] sm:$0xff]  }
0x1997   :  { %v4670_v51 = vadd.f32 %v4669_v57, %v4393_v21  ;;  %v4713_v13 = vadd.f32 %v4712_v3, %v4401_v22  ;;  %v4974_v40 = vmax.f32 %v4666_v19, 0.0  ;;  %v4976_v45 = vmax.f32 %v4709_v24, 0.0 }
0x1998   :  { %v4989_v11 = vmax.f32 %v4668_v18, 0.0  ;;  %v4991_v39 = vmax.f32 %v4711_v30, 0.0  ;;  %v4433_v25 = vrot.slane %v9779_v50, %v8914_v34 }
0x1999   :  { %v4990_v48 = vmax.f32 %v4670_v51, 0.0  ;;  %v4992_v44 = vmax.f32 %v4713_v13, 0.0 }
0x199a   :  { %v5005_v58 = vpack.c.bf16 %v4989_v11, %v4973_v54  ;;  %v5007_v26 = vpack.c.bf16 %v4991_v39, %v4975_v56 }
0x199b   :  { %v5006_v55 = vpack.c.bf16 %v4990_v48, %v4974_v40  ;;  %v5008_v63 = vpack.c.bf16 %v4992_v44, %v4976_v45  ;;  %v4749_v59 = vpop.f32.mrb[108].mxu0  ;;  %v4792_v2 = vpop.f32.mrb[108].mxu1  ;;  %v8136_v40 = vld [vmem:[%s10157_s7 + $0x558] sm:$0xff]  }
0x199c   :  { %v4750_v14 = vadd.f32 %v4749_v59, %v4405_v35  ;;  %v4793_v36 = vadd.f32 %v4792_v2, %v4413_v17  ;;  %v4751_v61 = vpop.f32.mrb[109].mxu0  ;;  %v4794_v62 = vpop.f32.mrb[109].mxu1  ;;  %v8137_v45 = vld [vmem:[%s10157_s7 + $0x5d8] sm:$0xff]  }
0x199d   :  { %v4752_v10 = vadd.f32 %v4751_v61, %v4409_v28  ;;  %v4795_v1 = vadd.f32 %v4794_v62, %v4417_v52  ;;  %v4753_v49 = vpop.f32.mrb[110].mxu0  ;;  %v4796_v7 = vpop.f32.mrb[110].mxu1  ;;  %6086 = vmatprep.mubr.bf16.mxu0 %v5006_v55  ;;  %6127 = vmatprep.mubr.bf16.mxu1 %v5008_v63  ;;  %v4437_v55 = vrot.slane %v9779_v50, %v8921_v37  ;;  %v8138_v62 = vld [vmem:[%s10157_s7 + $0x518] sm:$0xff]  }
0x199e   :  { %v4754_v29 = vadd.f32 %v4753_v49, %v4405_v35  ;;  %v4797_v20 = vadd.f32 %v4796_v7, %v4413_v17  ;;  %v4755_v21 = vpop.f32.mrb[111].mxu0  ;;  %v4798_v22 = vpop.f32.mrb[111].mxu1  ;;  %6087 = vmatmul.mubr.bf16.vlgmr.msra.gmra.mrb[120].mxu0 %v5005_v58  ;;  %6128 = vmatmul.mubr.bf16.vlgmr.msra.gmra.mrb[120].mxu1 %v5007_v26  ;;  %v4977_v5 = vmax.f32 %v4750_v14, 0.0  ;;  %v4979_v16 = vmax.f32 %v4793_v36, 0.0  ;;  %v8139_v37 = vld [vmem:[%s10157_s7 + $0x598] sm:$0xff]  }
0x199f   :  { %v4756_v6 = vadd.f32 %v4755_v21, %v4409_v28  ;;  %v4799_v31 = vadd.f32 %v4798_v22, %v4417_v52  ;;  %7542 = vmatpush3.bf16.msra.mxu0 %v8126_v32  ;;  %7564 = vmatpush3.bf16.msra.mxu1 %v8127_v47  ;;  %v4978_v27 = vmax.f32 %v4752_v10, 0.0  ;;  %v4980_v18 = vmax.f32 %v4795_v1, 0.0  ;;  %v8134_v28 = vld [vmem:[%s10157_s7 + $0x510] sm:$0xff]   ;;  %v8141_v1 = vld [vmem:[%s10157_s7 + $0x5e0] sm:$0xff]  }
0x19a0   :  { %v4993_v19 = vmax.f32 %v4754_v29, 0.0  ;;  %v4995_v24 = vmax.f32 %v4797_v20, 0.0  ;;  %7543 = vmatprep.subr.bf16.mxu0 %v8128_v8  ;;  %7565 = vmatprep.subr.bf16.mxu1 %v8129_v41  ;;  %v8135_v52 = vld [vmem:[%s10157_s7 + $0x590] sm:$0xff]   ;;  %v4445_v47 = vrot.slane %v9779_v50, %v8924_v38  ;;  %v4441_v14 = vrot.slane %v9779_v50, %v8927_v42  ;;  %v8140_v42 = vld [vmem:[%s10157_s7 + $0x560] sm:$0xff]  }
0x19a1   :  { %v4994_v30 = vmax.f32 %v4756_v6, 0.0  ;;  %v4996_v57 = vmax.f32 %v4799_v31, 0.0  ;;  %v4449_v8 = vrot.slane %v9779_v50, %v8930_v43  ;;  %v8142_v6 = vld [vmem:[%s10157_s7 + $0x520] sm:$0xff]  }
0x19a2   :  { %v9813_v3 = vpack.c.bf16 %v4993_v19, %v4977_v5  ;;  %v9815_v34 = vpack.c.bf16 %v4995_v24, %v4979_v16  ;;  %v8143_v31 = vld [vmem:[%s10157_s7 + $0x5a0] sm:$0xff]   ;;  %v8144_v16 = vld [vmem:[%s10157_s7 + $0x568] sm:$0xff]  }
0x19a3   :  { %v5010_v35 = vpack.c.bf16 %v4994_v30, %v4978_v27  ;;  %v5012_v17 = vpack.c.bf16 %v4996_v57, %v4980_v18  ;;  %7544 = vmatpush3.bf16.msra.mxu0 %v8130_v53  ;;  %7566 = vmatpush3.bf16.msra.mxu1 %v8131_v33  ;;  %v4835_v51 = vpop.f32.mrb[112].mxu0  ;;  %v4878_v13 = vpop.f32.mrb[112].mxu1  ;;  %v8145_v19 = vld [vmem:[%s10157_s7 + $0x5e8] sm:$0xff]  }
0x19a4   :  { %v4836_v54 = vadd.f32 %v4835_v51, %v4421_v9  ;;  %v4879_v56 = vadd.f32 %v4878_v13, %v4429_v15  ;;  %v4837_v11 = vpop.f32.mrb[113].mxu0  ;;  %v4880_v39 = vpop.f32.mrb[113].mxu1  ;;  %7545 = vmatprep.subr.bf16.mxu0 %v8132_v4  ;;  %7567 = vmatprep.subr.bf16.mxu1 %v8133_v12  ;;  %v8146_v13 = vld [vmem:[%s10157_s7 + $0x528] sm:$0xff]  }
0x19a5   :  { %v4838_v48 = vadd.f32 %v4837_v11, %v4425_v23  ;;  %v4881_v44 = vadd.f32 %v4880_v39, %v4433_v25  ;;  %v4839_v58 = vpop.f32.mrb[114].mxu0  ;;  %v4882_v26 = vpop.f32.mrb[114].mxu1  ;;  %6168 = vmatprep.mubr.bf16.mxu0 %v5010_v35  ;;  %6209 = vmatprep.mubr.bf16.mxu1 %v5012_v17  ;;  %v8148_v39 = vld [vmem:[%s10157_s7 + $0x570] sm:$0xff]  }
0x19a6   :  { %v4840_v63 = vadd.f32 %v4839_v58, %v4421_v9  ;;  %v4883_v59 = vadd.f32 %v4882_v26, %v4429_v15  ;;  %v4841_v2 = vpop.f32.mrb[115].mxu0  ;;  %v4884_v32 = vpop.f32.mrb[115].mxu1  ;;  %v4981_v41 = vmax.f32 %v4836_v54, 0.0  ;;  %v4983_v38 = vmax.f32 %v4879_v56, 0.0 }
0x19a7   :  { %v4842_v36 = vadd.f32 %v4841_v2, %v4425_v23  ;;  %v4885_v61 = vadd.f32 %v4884_v32, %v4433_v25  ;;  %7546 = vmatpush3.bf16.msra.mxu0 %v8134_v28  ;;  %7568 = vmatpush3.bf16.msra.mxu1 %v8135_v52  ;;  %v4982_v49 = vmax.f32 %v4838_v48, 0.0  ;;  %v4984_v7 = vmax.f32 %v4881_v44, 0.0  ;;  %v8147_v28 = vld [vmem:[%s10157_s7 + $0x5a8] sm:$0xff]   ;;  %v8150_v2 = vld [vmem:[%s10157_s7 + $0x530] sm:$0xff]  }
0x19a8   :  { %v4997_v9 = vmax.f32 %v4840_v63, 0.0  ;;  %v4999_v10 = vmax.f32 %v4883_v59, 0.0  ;;  %7547 = vmatprep.subr.bf16.mxu0 %v8136_v40  ;;  %7569 = vmatprep.subr.bf16.mxu1 %v8137_v45  ;;  %v8149_v40 = vld [vmem:[%s10157_s7 + $0x5f0] sm:$0xff]  }
0x19a9   :  { %v4998_v15 = vmax.f32 %v4842_v36, 0.0  ;;  %v5000_v29 = vmax.f32 %v4885_v61, 0.0  ;;  %v8151_v32 = vld [vmem:[%s10157_s7 + $0x5b0] sm:$0xff]   ;;  %v8154_v36 = vld [vmem:[%s10157_s7 + $0x538] sm:$0xff]  }
0x19aa   :  { %v9849_v20 = vpack.c.bf16 %v4997_v9, %v4981_v41  ;;  %v9851_v43 = vpack.c.bf16 %v4999_v10, %v4983_v38  ;;  %v8155_v61 = vld [vmem:[%s10157_s7 + $0x5b8] sm:$0xff]   ;;  %v8159_v41 = vld [vmem:[%s10157_s7 + $0x680] sm:$0xff]   ;;  %v8160_v38 = vld [vmem:[%s10157_s7 + $0x648] sm:$0xff]  }
0x19ab   :  { %v9853_v50 = vpack.c.bf16 %v4998_v15, %v4982_v49  ;;  %v9855_v21 = vpack.c.bf16 %v5000_v29, %v4984_v7  ;;  %7548 = vmatpush3.bf16.msra.mxu0 %v8138_v62  ;;  %7570 = vmatpush3.bf16.msra.mxu1 %v8139_v37  ;;  %v4921_v22 = vpop.f32.mrb[116].mxu0  ;;  %v4964_v23 = vpop.f32.mrb[116].mxu1  ;;  %v8156_v62 = vld [vmem:[%s10157_s7 + $0x640] sm:$0xff]   ;;  %v8161_v9 = vld [vmem:[%s10157_s7 + $0x6c8] sm:$0xff]   ;;  %v8167_v49 = vld [vmem:[%s10157_s7 + $0x690] sm:$0xff]  }
0x19ac   :  { %v4922_v53 = vadd.f32 %v4921_v22, %v4437_v55  ;;  %v4965_v33 = vadd.f32 %v4964_v23, %v4445_v47  ;;  %v4923_v25 = vpop.f32.mrb[117].mxu0  ;;  %v4966_v5 = vpop.f32.mrb[117].mxu1  ;;  %7549 = vmatprep.subr.bf16.mxu0 %v8140_v42  ;;  %7571 = vmatprep.subr.bf16.mxu1 %v8141_v1  ;;  %v8157_v37 = vld [vmem:[%s10157_s7 + $0x6c0] sm:$0xff]   ;;  %v8162_v10 = vld [vmem:[%s10157_s7 + $0x608] sm:$0xff]   ;;  %v8166_v1 = vld [vmem:[%s10157_s7 + $0x610] sm:$0xff]  }
0x19ad   :  { %v4924_v24 = vadd.f32 %v4923_v25, %v4441_v14  ;;  %v4967_v4 = vadd.f32 %v4966_v5, %v4449_v8  ;;  %v4925_v12 = vpop.f32.mrb[118].mxu0  ;;  %v4968_v27 = vpop.f32.mrb[118].mxu1  ;;  %v8163_v42 = vld [vmem:[%s10157_s7 + $0x688] sm:$0xff]   ;;  %v8168_v7 = vld [vmem:[%s10157_s7 + $0x658] sm:$0xff]   ;;  %v8173_v22 = vld [vmem:[%s10157_s7 + $0x6e0] sm:$0xff]  }
0x19ae   :  { %v4926_v18 = vadd.f32 %v4925_v12, %v4437_v55  ;;  %v4969_v30 = vadd.f32 %v4968_v27, %v4445_v47  ;;  %v4927_v57 = vpop.f32.mrb[119].mxu0  ;;  %v4970_v35 = vpop.f32.mrb[119].mxu1  ;;  %v4985_v52 = vmax.f32 %v4922_v53, 0.0  ;;  %v4987_v54 = vmax.f32 %v4965_v33, 0.0  ;;  %v8152_v47 = vld [vmem:[%s10157_s7 + $0x578] sm:$0xff]   ;;  %v8174_v23 = vld [vmem:[%s10157_s7 + $0x620] sm:$0xff]  }
0x19af   :  { %v4928_v17 = vadd.f32 %v4927_v57, %v4441_v14  ;;  %v4971_v51 = vadd.f32 %v4970_v35, %v4449_v8  ;;  %7550 = vmatpush3.bf16.msra.mxu0 %v8142_v6  ;;  %7572 = vmatpush3.bf16.msra.mxu1 %v8143_v31  ;;  %v4986_v45 = vmax.f32 %v4924_v24, 0.0  ;;  %v4988_v48 = vmax.f32 %v4967_v4, 0.0  ;;  %v8153_v14 = vld [vmem:[%s10157_s7 + $0x5f8] sm:$0xff]   ;;  %v8158_v8 = vld [vmem:[%s10157_s7 + $0x600] sm:$0xff]   ;;  %v8176_v31 = vld [vmem:[%s10157_s7 + $0x668] sm:$0xff]  }
0x19b0   :  { %v5001_v56 = vmax.f32 %v4926_v18, 0.0  ;;  %v5003_v11 = vmax.f32 %v4969_v30, 0.0  ;;  %7551 = vmatprep.subr.bf16.mxu0 %v8144_v16  ;;  %7573 = vmatprep.subr.bf16.mxu1 %v8145_v19  ;;  %v8169_v15 = vld [vmem:[%s10157_s7 + $0x6d8] sm:$0xff]   ;;  %v8175_v6 = vld [vmem:[%s10157_s7 + $0x6a0] sm:$0xff]   ;;  %v8177_v53 = vld [vmem:[%s10157_s7 + $0x6e8] sm:$0xff]  }
0x19b1   :  { %v5002_v44 = vmax.f32 %v4928_v17, 0.0  ;;  %v5004_v58 = vmax.f32 %v4971_v51, 0.0  ;;  %v8170_v29 = vld [vmem:[%s10157_s7 + $0x618] sm:$0xff]   ;;  %v8178_v33 = vld [vmem:[%s10157_s7 + $0x628] sm:$0xff]   ;;  %v8180_v5 = vld [vmem:[%s10157_s7 + $0x670] sm:$0xff]  }
0x19b2   :  { %v9881_v26 = vpack.c.bf16 %v5001_v56, %v4985_v52  ;;  %v9883_v55 = vpack.c.bf16 %v5003_v11, %v4987_v54  ;;  %v8179_v25 = vld [vmem:[%s10157_s7 + $0x6a8] sm:$0xff]   ;;  %v8181_v16 = vld [vmem:[%s10157_s7 + $0x6f0] sm:$0xff]   ;;  %v8184_v4 = vld [vmem:[%s10157_s7 + $0x678] sm:$0xff]  }
0x19b3   :  { %v9885_v63 = vpack.c.bf16 %v5002_v44, %v4986_v45  ;;  %v9887_v59 = vpack.c.bf16 %v5004_v58, %v4988_v48  ;;  %7552 = vmatpush3.bf16.msra.mxu0 %v8146_v13  ;;  %7574 = vmatpush3.bf16.msra.mxu1 %v8147_v28  ;;  %v8182_v19 = vld [vmem:[%s10157_s7 + $0x630] sm:$0xff]   ;;  %v8185_v12 = vld [vmem:[%s10157_s7 + $0x6f8] sm:$0xff]   ;;  %v8188_v30 = vld [vmem:[%s10157_s7 + $0x740] sm:$0xff]  }
0x19b4   :  { %7553 = vmatprep.subr.bf16.mxu0 %v8148_v39  ;;  %7575 = vmatprep.subr.bf16.mxu1 %v8149_v40  ;;  %v8183_v24 = vld [vmem:[%s10157_s7 + $0x6b0] sm:$0xff]   ;;  %v8186_v27 = vld [vmem:[%s10157_s7 + $0x638] sm:$0xff]   ;;  %v8189_v57 = vld [vmem:[%s10157_s7 + $0x7c0] sm:$0xff]  }
0x19b5   :  { %v8187_v18 = vld [vmem:[%s10157_s7 + $0x6b8] sm:$0xff]   ;;  %v8190_v35 = vld [vmem:[%s10157_s7 + $0x700] sm:$0xff]   ;;  %v8192_v51 = vld [vmem:[%s10157_s7 + $0x748] sm:$0xff]  }
0x19b6   :  { %v8191_v17 = vld [vmem:[%s10157_s7 + $0x780] sm:$0xff]   ;;  %v8193_v13 = vld [vmem:[%s10157_s7 + $0x7c8] sm:$0xff]   ;;  %v8198_v54 = vld [vmem:[%s10157_s7 + $0x710] sm:$0xff]  }
0x19b7   :  { %7554 = vmatpush3.bf16.msra.mxu0 %v8150_v2  ;;  %7576 = vmatpush3.bf16.msra.mxu1 %v8151_v32  ;;  %v8194_v28 = vld [vmem:[%s10157_s7 + $0x708] sm:$0xff]   ;;  %v8199_v56 = vld [vmem:[%s10157_s7 + $0x790] sm:$0xff]   ;;  %v8200_v11 = vld [vmem:[%s10157_s7 + $0x758] sm:$0xff]  }
0x19b8   :  { %7555 = vmatprep.subr.bf16.mxu0 %v8152_v47  ;;  %7577 = vmatprep.subr.bf16.mxu1 %v8153_v14  ;;  %v8195_v52 = vld [vmem:[%s10157_s7 + $0x788] sm:$0xff]   ;;  %v8201_v39 = vld [vmem:[%s10157_s7 + $0x7d8] sm:$0xff]   ;;  %v8204_v48 = vld [vmem:[%s10157_s7 + $0x760] sm:$0xff]  }
0x19b9   :  { %v8202_v40 = vld [vmem:[%s10157_s7 + $0x718] sm:$0xff]   ;;  %v8205_v44 = vld [vmem:[%s10157_s7 + $0x7e0] sm:$0xff]   ;;  %v8209_v2 = vld [vmem:[%s10157_s7 + $0x7e8] sm:$0xff]  }
0x19ba   :  { %v8203_v45 = vld [vmem:[%s10157_s7 + $0x798] sm:$0xff]   ;;  %v8206_v58 = vld [vmem:[%s10157_s7 + $0x720] sm:$0xff]   ;;  %v8210_v32 = vld [vmem:[%s10157_s7 + $0x728] sm:$0xff]  }
0x19bb   :  { %7556 = vmatpush3.bf16.msra.mxu0 %v8154_v36  ;;  %7578 = vmatpush3.bf16.msra.mxu1 %v8155_v61  ;;  %v8211_v47 = vld [vmem:[%s10157_s7 + $0x7a8] sm:$0xff]   ;;  %v8212_v14 = vld [vmem:[%s10157_s7 + $0x770] sm:$0xff]  }
0x19bc   :  { %7585 = vmatprep.subr.bf16.mxu0 %v8156_v62  ;;  %7607 = vmatprep.subr.bf16.mxu1 %v8157_v37  ;;  %v8213_v36 = vld [vmem:[%s10157_s7 + $0x7f0] sm:$0xff]   ;;  %v8216_v37 = vld [vmem:[%s10157_s7 + $0x778] sm:$0xff]  }
0x19bd   :  { %v8214_v61 = vld [vmem:[%s10157_s7 + $0x730] sm:$0xff]  }
0x19be   :  { %6169 = vmatmul.mubr.bf16.vlgmr.msra.gmra.mrb[124].mxu0 %v9813_v3  ;;  %6210 = vmatmul.mubr.bf16.vlgmr.msra.gmra.mrb[124].mxu1 %v9815_v34  ;;  %v8164_v3 = vld [vmem:[%s10157_s7 + $0x650] sm:$0xff]  }
0x19bf   :  { %7586 = vmatpush3.bf16.msra.mxu0 %v8158_v8  ;;  %6250 = vmatprep.mubr.bf16.mxu0 %v9853_v50  ;;  %v8165_v34 = vld [vmem:[%s10157_s7 + $0x6d0] sm:$0xff]   ;;  %v8171_v50 = vld [vmem:[%s10157_s7 + $0x698] sm:$0xff]  }
0x19c0   :  { %7608 = vmatpush3.bf16.msra.mxu1 %v8159_v41  ;;  %6291 = vmatprep.mubr.bf16.mxu1 %v9855_v21  ;;  %v8172_v21 = vld [vmem:[%s10157_s7 + $0x660] sm:$0xff]   ;;  %v8215_v62 = vld [vmem:[%s10157_s7 + $0x7b0] sm:$0xff]   ;;  %v8217_v8 = vld [vmem:[%s10157_s7 + $0x7f8] sm:$0xff]  }
0x19c1   :  { %7587 = vmatprep.subr.bf16.mxu0 %v8160_v38  ;;  %7609 = vmatprep.subr.bf16.mxu1 %v8161_v9  ;;  %v8218_v41 = vld [vmem:[%s10157_s7 + $0x738] sm:$0xff]  }
0x19c2   :  { %v8219_v38 = vld [vmem:[%s10157_s7 + $0x7b8] sm:$0xff]  }
0x19c3   :  { %7588 = vmatpush3.bf16.msra.mxu0 %v8162_v10 }
0x19c4   :  { %7610 = vmatpush3.bf16.msra.mxu1 %v8163_v42  ;;  %7589 = vmatprep.subr.bf16.mxu0 %v8164_v3  ;;  %v7107_v42 = vld [vmem:[%s10161_s8 + $0x1] ss:$0 sm:$0xff] }
0x19c5   :  { %7611 = vmatprep.subr.bf16.mxu1 %v8165_v34 }
0x19c7   :  { %7590 = vmatpush3.bf16.msra.mxu0 %v8166_v1 }
0x19c8   :  { %7612 = vmatpush3.bf16.msra.mxu1 %v8167_v49  ;;  %7591 = vmatprep.subr.bf16.mxu0 %v8168_v7 }
0x19c9   :  { %7613 = vmatprep.subr.bf16.mxu1 %v8169_v15 }
0x19cb   :  { %7592 = vmatpush3.bf16.msra.mxu0 %v8170_v29 }
0x19cc   :  { %7614 = vmatpush3.bf16.msra.mxu1 %v8171_v50  ;;  %7593 = vmatprep.subr.bf16.mxu0 %v8172_v21 }
0x19cd   :  { %7615 = vmatprep.subr.bf16.mxu1 %v8173_v22 }
0x19cf   :  { %7594 = vmatpush3.bf16.msra.mxu0 %v8174_v23 }
0x19d0   :  { %7616 = vmatpush3.bf16.msra.mxu1 %v8175_v6  ;;  %7595 = vmatprep.subr.bf16.mxu0 %v8176_v31 }
0x19d1   :  { %7617 = vmatprep.subr.bf16.mxu1 %v8177_v53 }
0x19d3   :  { %7596 = vmatpush3.bf16.msra.mxu0 %v8178_v33 }
0x19d4   :  { %7618 = vmatpush3.bf16.msra.mxu1 %v8179_v25  ;;  %7597 = vmatprep.subr.bf16.mxu0 %v8180_v5 }
0x19d5   :  { %7619 = vmatprep.subr.bf16.mxu1 %v8181_v16 }
0x19d7   :  { %7598 = vmatpush3.bf16.msra.mxu0 %v8182_v19 }
0x19d8   :  { %7620 = vmatpush3.bf16.msra.mxu1 %v8183_v24  ;;  %7599 = vmatprep.subr.bf16.mxu0 %v8184_v4 }
0x19d9   :  { %7621 = vmatprep.subr.bf16.mxu1 %v8185_v12 }
0x19db   :  { %7600 = vmatpush3.bf16.msra.mxu0 %v8186_v27 }
0x19dc   :  { %7622 = vmatpush3.bf16.msra.mxu1 %v8187_v18  ;;  %7629 = vmatprep.subr.bf16.mxu0 %v8188_v30 }
0x19dd   :  { %7651 = vmatprep.subr.bf16.mxu1 %v8189_v57 }
0x19de   :  { %6251 = vmatmul.mubr.bf16.vlgmr.msra.gmra.mrb[128].mxu0 %v9849_v20  ;;  %v8196_v20 = vld [vmem:[%s10157_s7 + $0x750] sm:$0xff]  }
0x19df   :  { %6292 = vmatmul.mubr.bf16.vlgmr.msra.gmra.mrb[128].mxu1 %v9851_v43  ;;  %7630 = vmatpush3.bf16.msra.mxu0 %v8190_v35  ;;  %v8197_v43 = vld [vmem:[%s10157_s7 + $0x7d0] sm:$0xff]  }
0x19e0   :  { %6332 = vmatprep.mubr.bf16.mxu0 %v9885_v63  ;;  %7652 = vmatpush3.bf16.msra.mxu1 %v8191_v17  ;;  %v8207_v63 = vld [vmem:[%s10157_s7 + $0x7a0] sm:$0xff]  }
0x19e1   :  { %6373 = vmatprep.mubr.bf16.mxu1 %v9887_v59  ;;  %7631 = vmatprep.subr.bf16.mxu0 %v8192_v51  ;;  %v8208_v59 = vld [vmem:[%s10157_s7 + $0x768] sm:$0xff]  }
0x19e2   :  { %7653 = vmatprep.subr.bf16.mxu1 %v8193_v13 }
0x19e3   :  { %7632 = vmatpush3.bf16.msra.mxu0 %v8194_v28 }
0x19e4   :  { %7654 = vmatpush3.bf16.msra.mxu1 %v8195_v52  ;;  %7633 = vmatprep.subr.bf16.mxu0 %v8196_v20 }
0x19e5   :  { %7655 = vmatprep.subr.bf16.mxu1 %v8197_v43 }
0x19e7   :  { %7634 = vmatpush3.bf16.msra.mxu0 %v8198_v54 }
0x19e8   :  { %7656 = vmatpush3.bf16.msra.mxu1 %v8199_v56  ;;  %7635 = vmatprep.subr.bf16.mxu0 %v8200_v11 }
0x19e9   :  { %7657 = vmatprep.subr.bf16.mxu1 %v8201_v39 }
0x19eb   :  { %7636 = vmatpush3.bf16.msra.mxu0 %v8202_v40 }
0x19ec   :  { %7658 = vmatpush3.bf16.msra.mxu1 %v8203_v45  ;;  %7637 = vmatprep.subr.bf16.mxu0 %v8204_v48 }
0x19ed   :  { %7659 = vmatprep.subr.bf16.mxu1 %v8205_v44 }
0x19ef   :  { %7638 = vmatpush3.bf16.msra.mxu0 %v8206_v58 }
0x19f0   :  { %7660 = vmatpush3.bf16.msra.mxu1 %v8207_v63  ;;  %7639 = vmatprep.subr.bf16.mxu0 %v8208_v59 }
0x19f1   :  { %7661 = vmatprep.subr.bf16.mxu1 %v8209_v2 }
0x19f3   :  { %7640 = vmatpush3.bf16.msra.mxu0 %v8210_v32 }
0x19f4   :  { %7662 = vmatpush3.bf16.msra.mxu1 %v8211_v47  ;;  %7641 = vmatprep.subr.bf16.mxu0 %v8212_v14 }
0x19f5   :  { %7663 = vmatprep.subr.bf16.mxu1 %v8213_v36 }
0x19f7   :  { %7642 = vmatpush3.bf16.msra.mxu0 %v8214_v61 }
0x19f8   :  { %7664 = vmatpush3.bf16.msra.mxu1 %v8215_v62  ;;  %7643 = vmatprep.subr.bf16.mxu0 %v8216_v37 }
0x19f9   :  { %7665 = vmatprep.subr.bf16.mxu1 %v8217_v8 }
0x19fb   :  { %7644 = vmatpush3.bf16.msra.mxu0 %v8218_v41 }
0x19fc   :  { %7666 = vmatpush3.bf16.msra.mxu1 %v8219_v38  ;;  %7900 = vmatprep.subr.bf16.mxu0 %v8306_v0 }
0x19fe   :  { %6333 = vmatmul.mubr.bf16.vlgmr.msra.gmra.mrb[132].mxu0 %v9881_v26 }
0x19ff   :  { %6374 = vmatmul.mubr.bf16.vlgmr.msra.gmra.mrb[132].mxu1 %v9883_v55  ;;  %7904 = vmatprep.mubr.msk.bf16.mxu0 %vm8307_vm0, %v8306_v0 }
0x1a71   :  { %v7513_v9 = vpop.f32.mrb[120].mxu0  ;;  %v7535_v10 = vpop.f32.mrb[120].mxu1 }
0x1a72   :  { %v7514_v3 = vpop.f32.mrb[121].mxu0  ;;  %v7536_v34 = vpop.f32.mrb[121].mxu1 }
0x1a73   :  { %v7515_v1 = vadd.f32 %v7514_v3, %v7513_v9  ;;  %v7537_v49 = vadd.f32 %v7536_v34, %v7535_v10  ;;  %v7516_v7 = vpop.f32.mrb[122].mxu0  ;;  %v7538_v15 = vpop.f32.mrb[122].mxu1 }
0x1a74   :  { %v7517_v29 = vpop.f32.mrb[123].mxu0  ;;  %v7539_v50 = vpop.f32.mrb[123].mxu1 }
0x1a75   :  { %v6089_v26 = vadd.f32 %v7515_v1, %v7107_v42  ;;  %v7518_v21 = vadd.f32 %v7517_v29, %v7516_v7  ;;  %v7540_v55 = vadd.f32 %v7539_v50, %v7538_v15 }
0x1a77   :  { %v6130_v22 = vadd.f32 %v7537_v49, %v6089_v26  ;;  %v6092_v23 = vadd.f32 %v7518_v21, %v7107_v42 }
0x1a79   :  { %v6133_v6 = vadd.f32 %v7540_v55, %v6092_v23 }
0x1a91   :  { %v7557_v31 = vpop.f32.mrb[124].mxu0  ;;  %v7579_v53 = vpop.f32.mrb[124].mxu1 }
0x1a92   :  { %v7558_v33 = vpop.f32.mrb[125].mxu0  ;;  %v7580_v25 = vpop.f32.mrb[125].mxu1 }
0x1a93   :  { %v7559_v5 = vadd.f32 %v7558_v33, %v7557_v31  ;;  %v7581_v16 = vadd.f32 %v7580_v25, %v7579_v53  ;;  %v7560_v19 = vpop.f32.mrb[126].mxu0  ;;  %v7582_v24 = vpop.f32.mrb[126].mxu1 }
0x1a94   :  { %v7561_v4 = vpop.f32.mrb[127].mxu0  ;;  %v7583_v12 = vpop.f32.mrb[127].mxu1 }
0x1a95   :  { %v6171_v27 = vadd.f32 %v7559_v5, %v6130_v22  ;;  %v7562_v18 = vadd.f32 %v7561_v4, %v7560_v19  ;;  %v7584_v30 = vadd.f32 %v7583_v12, %v7582_v24  ;;  %v7238_v19 = vld [vmem:[%s10162_s11 + $0x1] ss:$0 sm:$0xff] }
0x1a96   :  { %v7239_v12 = vld [vmem:[%s10163_s12 + $0x1] ss:$0 sm:$0xff] }
0x1a97   :  { %v6212_v57 = vadd.f32 %v7581_v16, %v6171_v27  ;;  %v6174_v35 = vadd.f32 %v7562_v18, %v6133_v6 }
0x1a99   :  { %v6215_v17 = vadd.f32 %v7584_v30, %v6174_v35 }
0x1ab1   :  { %v7601_v51 = vpop.f32.mrb[128].mxu0 }
0x1ab2   :  { %v7623_v13 = vpop.f32.mrb[128].mxu1  ;;  %v7602_v28 = vpop.f32.mrb[129].mxu0 }
0x1ab3   :  { %v7603_v52 = vadd.f32 %v7602_v28, %v7601_v51  ;;  %v7624_v20 = vpop.f32.mrb[129].mxu1  ;;  %v7604_v43 = vpop.f32.mrb[130].mxu0 }
0x1ab4   :  { %v7625_v54 = vadd.f32 %v7624_v20, %v7623_v13  ;;  %v7626_v56 = vpop.f32.mrb[130].mxu1  ;;  %v7605_v11 = vpop.f32.mrb[131].mxu0 }
0x1ab5   :  { %v6253_v39 = vadd.f32 %v7603_v52, %v6212_v57  ;;  %v7606_v40 = vadd.f32 %v7605_v11, %v7604_v43  ;;  %v7627_v45 = vpop.f32.mrb[131].mxu1 }
0x1ab6   :  { %v7628_v48 = vadd.f32 %v7627_v45, %v7626_v56  ;;  %v8220_v45 = vld [vmem:[%s10164_s15] sm:$0xff]  }
0x1ab7   :  { %v6294_v44 = vadd.f32 %v7625_v54, %v6253_v39  ;;  %v6256_v58 = vadd.f32 %v7606_v40, %v6215_v17  ;;  %7901 = vmatpush3.bf16.msra.mxu0 %v8220_v45 }
0x1ab8   :  { %7902 = vmatprep.subr.bf16.mxu0 %v8306_v0  ;;  %v7241_v0 = vld [vmem:[%s10166_s14] ss:$0 sm:$0xff] }
0x1ab9   :  { %v6297_v63 = vadd.f32 %v7628_v48, %v6256_v58  ;;  %v8221_v48 = vld [vmem:[%s10164_s15 + $0x8] sm:$0xff]  }
0x1abb   :  { %7903 = vmatpush3.bf16.msra.mxu0 %v8221_v48 }
0x1ad1   :  { %v7645_v59 = vpop.f32.mrb[132].mxu0 }
0x1ad2   :  { %v7667_v2 = vpop.f32.mrb[132].mxu1  ;;  %v7646_v32 = vpop.f32.mrb[133].mxu0 }
0x1ad3   :  { %v7647_v47 = vadd.f32 %v7646_v32, %v7645_v59  ;;  %v7668_v14 = vpop.f32.mrb[133].mxu1  ;;  %v7648_v36 = vpop.f32.mrb[134].mxu0 }
0x1ad4   :  { %v7669_v61 = vadd.f32 %v7668_v14, %v7667_v2  ;;  %v7670_v62 = vpop.f32.mrb[134].mxu1  ;;  %v7649_v37 = vpop.f32.mrb[135].mxu0  ;;  %v7240_v14 = vld [vmem:[%s10165_s13] ss:$0 sm:$0xff] }
0x1ad5   :  { %v6335_v8 = vadd.f32 %v7647_v47, %v6294_v44  ;;  %v7650_v41 = vadd.f32 %v7649_v37, %v7648_v36  ;;  %v7671_v38 = vpop.f32.mrb[135].mxu1 }
0x1ad6   :  { %v7672_v9 = vadd.f32 %v7671_v38, %v7670_v62 }
0x1ad7   :  { %v6376_v10 = vadd.f32 %v7669_v61, %v6335_v8  ;;  %v6338_v42 = vadd.f32 %v7650_v41, %v6297_v63 }
0x1ad9   :  { %v6379_v3 = vadd.f32 %v7672_v9, %v6338_v42  ;;  %v6382_v34 = vadd.f32 %v6376_v10, %v9585_v46 }
0x1adb   :  { %v6388_v1 = vsel %vm86_vm1, %v6382_v34, 0.0  ;;  %v6383_v49 = vadd.f32 %v6379_v3, %v9587_v60 }
0x1adc   :  { %6389 = vadd.xlane.f32.xlu0 %v6388_v1 }
0x1add   :  { %v6391_v7 = vsel %vm86_vm1, %v6383_v49, 0.0 }
0x1ade   :  { %6392 = vadd.xlane.f32.xlu1 %v6391_v7 }
0x1b69   :  { %v6390_v15 = vpop.xlane.xlu0 %6389 }
0x1b6a   :  { %v6394_v29 = vmul.f32 0.03125, %v6390_v15 }
0x1b6b   :  { %v6393_v50 = vpop.xlane.xlu1 %6392 }
0x1b6c   :  { %v6396_v26 = vsub.f32 %v6382_v34, %v6394_v29  ;;  %v6395_v21 = vmul.f32 0.03125, %v6393_v50 }
0x1b6e   :  { %v6397_v55 = vsub.f32 %v6383_v49, %v6395_v21  ;;  %v6398_v22 = vmul.f32 %v6396_v26, %v6396_v26 }
0x1b70   :  { %v6400_v23 = vsel %vm86_vm1, %v6398_v22, 0.0  ;;  %v6399_v6 = vmul.f32 %v6397_v55, %v6397_v55 }
0x1b71   :  { %6401 = vadd.xlane.f32.xlu0 %v6400_v23 }
0x1b72   :  { %v6403_v46 = vsel %vm86_vm1, %v6399_v6, 0.0 }
0x1b73   :  { %6404 = vadd.xlane.f32.xlu1 %v6403_v46 }
0x1bfe   :  { %v6402_v31 = vpop.xlane.xlu0 %6401 }
0x1bff   :  { %v6406_v60 = vmul.f32 0.03125, %v6402_v31 }
0x1c00   :  { %v6405_v53 = vpop.xlane.xlu1 %6404 }
0x1c01   :  { %v6408_v33 = vadd.f32 1e-05, %v6406_v60  ;;  %v6407_v25 = vmul.f32 0.03125, %v6405_v53 }
0x1c03   :  { %8298 = vrsqrt.f32 %v6408_v33  ;;  %v6409_v5 = vadd.f32 1e-05, %v6407_v25 }
0x1c05   :  { %8300 = vrsqrt.f32 %v6409_v5 }
0x1c0d   :  { %v8299_v16 = vpop.eup %8298 }
0x1c0e   :  { %v6412_v24 = vmul.f32 %v8299_v16, %v6396_v26 }
0x1c0f   :  { %v8301_v4 = vpop.eup %8300 }
0x1c10   :  { %v6420_v27 = vmul.f32 %v7238_v19, %v6412_v24  ;;  %v6413_v18 = vmul.f32 %v8301_v4, %v6397_v55 }
0x1c12   :  { %v6428_v30 = vadd.f32 %v7239_v12, %v6420_v27  ;;  %v6421_v57 = vmul.f32 %v7238_v19, %v6413_v18 }
0x1c14   :  { %v6432_v35 = vsel %vm86_vm1, %v6428_v30, 0.0  ;;  %v6429_v17 = vadd.f32 %v7239_v12, %v6421_v57 }
0x1c15   :  { %6433 = vadd.xlane.f32.xlu0 %v6432_v35 }
0x1c16   :  { %v6435_v51 = vsel %vm86_vm1, %v6429_v17, 0.0 }
0x1c17   :  { %6436 = vadd.xlane.f32.xlu1 %v6435_v51 }
0x1ca2   :  { %v6434_v13 = vpop.xlane.xlu0 %6433 }
0x1ca3   :  { %v6438_v28 = vmul.f32 0.03125, %v6434_v13 }
0x1ca4   :  { %v6437_v52 = vpop.xlane.xlu1 %6436 }
0x1ca5   :  { %v6440_v20 = vsub.f32 %v6428_v30, %v6438_v28  ;;  %v6439_v43 = vmul.f32 0.03125, %v6437_v52 }
0x1ca7   :  { %v6441_v54 = vsub.f32 %v6429_v17, %v6439_v43  ;;  %v6442_v56 = vmul.f32 %v6440_v20, %v6440_v20 }
0x1ca9   :  { %v6444_v11 = vsel %vm86_vm1, %v6442_v56, 0.0  ;;  %v6443_v39 = vmul.f32 %v6441_v54, %v6441_v54 }
0x1caa   :  { %6445 = vadd.xlane.f32.xlu0 %v6444_v11 }
0x1cab   :  { %v6447_v40 = vsel %vm86_vm1, %v6443_v39, 0.0 }
0x1cac   :  { %6448 = vadd.xlane.f32.xlu1 %v6447_v40 }
0x1d37   :  { %v6446_v44 = vpop.xlane.xlu0 %6445 }
0x1d38   :  { %v6450_v58 = vmul.f32 0.03125, %v6446_v44 }
0x1d39   :  { %v6449_v63 = vpop.xlane.xlu1 %6448 }
0x1d3a   :  { %v6452_v59 = vadd.f32 1e-05, %v6450_v58  ;;  %v6451_v2 = vmul.f32 0.03125, %v6449_v63 }
0x1d3c   :  { %8302 = vrsqrt.f32 %v6452_v59  ;;  %v6453_v32 = vadd.f32 1e-05, %v6451_v2 }
0x1d3e   :  { %8304 = vrsqrt.f32 %v6453_v32 }
0x1d46   :  { %v8303_v47 = vpop.eup %8302 }
0x1d47   :  { %v6456_v36 = vmul.f32 %v8303_v47, %v6440_v20 }
0x1d48   :  { %v8305_v61 = vpop.eup %8304 }
0x1d49   :  { %v6464_v62 = vmul.f32 %v7240_v14, %v6456_v36  ;;  %v6457_v37 = vmul.f32 %v8305_v61, %v6441_v54 }
0x1d4b   :  { %v6465_v8 = vmul.f32 %v7240_v14, %v6457_v37  ;;  %v6472_v41 = vadd.f32 %v7241_v0, %v6464_v62 }
0x1d4d   :  { %v6473_v38 = vadd.f32 %v7241_v0, %v6465_v8 }
0x1d4f   :  { %v6474_v9 = vpack.c.bf16 %v6473_v38, %v6472_v41 }
0x1d51   :  { %7905 = vmatmul.mubr.msk.bf16.vlgmr.msra.gmra.mrb[136].mxu0 %vm86_vm1, %v6474_v9 }
0x1e24   :  { %v6528_v10 = vpop.f32.mrb[136].mxu0 }
0x1e25   :  { %6535 = vst [vmem:[%s10167_s16] sm:$0xff] %v6528_v10  ;;  %v7906_v42 = vpop.f32.mrb[137].mxu0 }
0x1e26   :  { %v6531_v3 = vpop.f32.mrb[138].mxu0 }
0x1e27   :  { %6536 = vst [vmem:[%s10167_s16 + $0x8] sm:$0xff] %v6531_v3  ;;  %v7907_v34 = vpop.f32.mrb[139].mxu0 }

</bundles_post_ra>
